<compile_context>
chip_gen: v5e
topology: v5e:2x2
jax: 0.10.0
libtpu: 0.0.40
codegen_flags: <defaults>
</compile_context>

<pallas_src>
import functools

import jax
import jax.numpy as jnp
from jax.experimental import pallas as pl
from jax.experimental.pallas import tpu as pltpu


# -----------------------------------------------------------------------------
# Tiling helpers (static, used both at param-prep time and at trace time so the
# padding and the BlockSpec tile width can never drift out of sync).
# -----------------------------------------------------------------------------
def _round_up(x, m):
    return ((x + m - 1) // m) * m


def _choose_tn(d_out):
    """Output-feature tile width: one tile when it fits, else 1-2K tiles with
    an even tile count preferred (v7x megacore splits the w3 stream)."""
    d128 = _round_up(d_out, 128)
    if d128 <= 2048:
        return d128                      # single lane-dense tile
    for tn in (2048, 1024):
        if pl.cdiv(d128, tn) % 2 == 0:   # even -> both TCs share the stream
            return tn
    return 2048


# -----------------------------------------------------------------------------
# Pallas kernel: fused 3-layer MLP (Linear-ReLU-Linear-ReLU-Linear-Sigmoid),
# tiled over the final output dimension.
#   grid = (d_out_padded // TN,)
#   t:  (B, d_in)     f32  (resident, cast to bf16 in-kernel)
#   w1: (d_in, 512)   bf16 (resident)     w2: (512, 1024) bf16 (resident)
#   w3: (1024, TN)    bf16 (streamed)     b*: f32, shape (1, N)
#   out: (B, TN)      f32
# h1/h2 are recomputed per tile (tiny; usually 1-4 tiles) so every grid step
# is independent -> axis marked "parallel".
# -----------------------------------------------------------------------------
def _decoder_mlp_kernel(t_ref, w1_ref, b1_ref, w2_ref, b2_ref, w3_ref, b3_ref,
                        out_ref):
    t = t_ref[...].astype(jnp.bfloat16)
    h1 = jnp.dot(t, w1_ref[...], preferred_element_type=jnp.float32) + b1_ref[...]
    h1 = jnp.maximum(h1, 0.0).astype(jnp.bfloat16)                    # ReLU
    h2 = jnp.dot(h1, w2_ref[...], preferred_element_type=jnp.float32) + b2_ref[...]
    h2 = jnp.maximum(h2, 0.0).astype(jnp.bfloat16)                    # ReLU
    z = jnp.dot(h2, w3_ref[...], preferred_element_type=jnp.float32) + b3_ref[...]
    out_ref[...] = jax.nn.sigmoid(z)                                  # f32 out


# -----------------------------------------------------------------------------
# One-time parameter preparation (OUTSIDE the per-call jit): cast weights to
# bf16 and pad w3/b3 to the tile width.
# -----------------------------------------------------------------------------
def prepare_decoder_params(params, *, input_width, input_height, input_channel):
    w1, b1, w2, b2, w3, b3 = params
    d_out = input_width * input_height * input_channel
    tn = _choose_tn(d_out)
    d_out_p = _round_up(d_out, tn)

    w1b = jnp.asarray(w1, jnp.bfloat16)
    w2b = jnp.asarray(w2, jnp.bfloat16)
    w3b = jnp.asarray(w3, jnp.bfloat16)
    b1f = jnp.asarray(b1, jnp.float32)
    b2f = jnp.asarray(b2, jnp.float32)
    b3f = jnp.asarray(b3, jnp.float32)
    if d_out_p != d_out:
        # Padded outputs are sigmoid(0)=0.5 and sliced off in the wrapper.
        w3b = jnp.pad(w3b, ((0, 0), (0, d_out_p - d_out)))
        b3f = jnp.pad(b3f, ((0, 0), (0, d_out_p - d_out)))
    return (w1b, b1f, w2b, b2f, w3b, b3f)


# -----------------------------------------------------------------------------
# Forward pass (jitted).  `prepared_params` must come from
# prepare_decoder_params with the same image dims.
# -----------------------------------------------------------------------------
@functools.partial(jax.jit, static_argnames=("input_width", "input_height",
                                             "input_channel"))
def decoder_forward(x, prepared_params, *, input_width, input_height,
                    input_channel):
    """x: (B, num_classes, out_caps) f32 -> (recon (B,C,W,H) f32, masked (B,NC) f32)."""
    w1, b1, w2, b2, w3, b3 = prepared_params
    B, num_classes, out_caps = x.shape
    d_in = num_classes * out_caps
    d_out = input_width * input_height * input_channel
    tn = _choose_tn(d_out)
    d_out_p = _round_up(d_out, tn)
    assert w3.shape[1] == d_out_p and b3.shape[1] == d_out_p, (
        "params were not prepared with prepare_decoder_params for these dims")
    num_tiles = d_out_p // tn

    # ---- glue: class norms, softmax (dim=0, torch quirk), argmax, eye mask ----
    classes = jnp.sqrt(jnp.sum(x * x, axis=2))            # (B, num_classes)
    classes = jax.nn.softmax(classes, axis=0)              # dim=0 as in torch ref
    max_idx = jnp.argmax(classes, axis=1)                  # (B,)
    masked = jnp.eye(num_classes, dtype=x.dtype)[max_idx]  # (B, num_classes)
    t = (x * masked[:, :, None]).reshape(B, d_in)          # stays f32; cast in-kernel

    # ---- scheduler hint ----
    flops = 2 * B * (d_in * 512 + 512 * 1024 + 1024 * d_out_p)
    bytes_accessed = ((w1.size + w2.size + w3.size) * 2          # bf16 weights
                      + (b1.size + b2.size + b3.size) * 4
                      + t.size * 4 + B * d_out_p * 4)            # t in, out
    cost = pl.CostEstimate(flops=flops, transcendentals=B * d_out_p,
                           bytes_accessed=bytes_accessed)

    # ---- derived VMEM budget: 2x (double-buffer) everything + headroom ----
    resident = t.size * 4 + w1.size * 2 + w2.size * 2 + (b1.size + b2.size) * 4
    streamed = w3.shape[0] * tn * 2 + tn * 4 + B * tn * 4
    vmem_bytes = int(min(2 * (resident + streamed) + (4 << 20), 32 * 1024 * 1024))

    # ---- hot path: fused MLP in Pallas, w3 streamed per N tile ----
    recon_flat = pl.pallas_call(
        _decoder_mlp_kernel,
        out_shape=jax.ShapeDtypeStruct((B, d_out_p), jnp.float32),
        grid=(num_tiles,),
        in_specs=[
            pl.BlockSpec((B, d_in), lambda j: (0, 0)),              # t   (resident)
            pl.BlockSpec(w1.shape, lambda j: (0, 0)),               # w1  (resident)
            pl.BlockSpec(b1.shape, lambda j: (0, 0)),               # b1
            pl.BlockSpec(w2.shape, lambda j: (0, 0)),               # w2  (resident)
            pl.BlockSpec(b2.shape, lambda j: (0, 0)),               # b2
            pl.BlockSpec((w3.shape[0], tn), lambda j: (0, j)),      # w3 tile (streamed)
            pl.BlockSpec((1, tn), lambda j: (0, j)),                # b3 tile
        ],
        out_specs=pl.BlockSpec((B, tn), lambda j: (0, j)),
        compiler_params=pltpu.CompilerParams(
            dimension_semantics=("parallel",),   # independent N tiles (2 TCs on v7x)
            vmem_limit_bytes=vmem_bytes,
        ),
        cost_estimate=cost,
    )(t, w1, b1, w2, b2, w3, b3)

    recon = recon_flat[:, :d_out].reshape(-1, input_channel, input_width,
                                          input_height)
    return recon, masked


# -----------------------------------------------------------------------------
# Pure-JAX reference (same bf16 weight/activation path) for correctness checks
# -----------------------------------------------------------------------------
def _reference_forward(x, params, *, input_width, input_height, input_channel):
    w1, b1, w2, b2, w3, b3 = params
    B, num_classes, out_caps = x.shape
    classes = jnp.sqrt(jnp.sum(x * x, axis=2))
    classes = jax.nn.softmax(classes, axis=0)
    max_idx = jnp.argmax(classes, axis=1)
    masked = jnp.eye(num_classes, dtype=x.dtype)[max_idx]
    t = (x * masked[:, :, None]).reshape(B, num_classes * out_caps)

    tb = t.astype(jnp.bfloat16)
    h1 = jnp.maximum(jnp.dot(tb, w1.astype(jnp.bfloat16),
                             preferred_element_type=jnp.float32) + b1, 0.0)
    h1 = h1.astype(jnp.bfloat16)
    h2 = jnp.maximum(jnp.dot(h1, w2.astype(jnp.bfloat16),
                             preferred_element_type=jnp.float32) + b2, 0.0)
    h2 = h2.astype(jnp.bfloat16)
    z = jnp.dot(h2, w3.astype(jnp.bfloat16),
                preferred_element_type=jnp.float32) + b3
    recon = jax.nn.sigmoid(z).reshape(-1, input_channel, input_width, input_height)
    return recon, masked


# -----------------------------------------------------------------------------
# Deterministic parameter init (shapes from Decoder.__init__)
# -----------------------------------------------------------------------------
def init_decoder_params(key, out_caps, num_classes, input_width, input_height,
                        input_channel):
    d_in = out_caps * num_classes
    d_out = input_width * input_height * input_channel
    k1, k2, k3 = jax.random.split(key, 3)

    def linear(k, fan_in, fan_out):
        bound = 1.0 / jnp.sqrt(fan_in)
        kw, kb = jax.random.split(k)
        # stored as (in, out) so the kernel computes t @ W  (== torch x @ W.T)
        w = jax.random.uniform(kw, (fan_in, fan_out), jnp.float32, -bound, bound)
        b = jax.random.uniform(kb, (1, fan_out), jnp.float32, -bound, bound)
        return w, b

    w1, b1 = linear(k1, d_in, 512)
    w2, b2 = linear(k2, 512, 1024)
    w3, b3 = linear(k3, 1024, d_out)
    return (w1, b1, w2, b2, w3, b3)


if __name__ == "__main__":
    # num_classes=8 (eye(8) is hardcoded in the torch forward), out_caps=16
    # (-> d_in=128), small images, batch=4.
    def run_case(B, num_classes, out_caps, W, H, C, key):
        kx, kp = jax.random.split(key)
        x = jax.random.normal(kx, (B, num_classes, out_caps), dtype=jnp.float32)
        params = init_decoder_params(kp, out_caps, num_classes, W, H, C)
        prepared = prepare_decoder_params(
            params, input_width=W, input_height=H, input_channel=C)

        recon, masked = decoder_forward(
            x, prepared, input_width=W, input_height=H, input_channel=C)
        jax.block_until_ready((recon, masked))

        assert recon.shape == (B, C, W, H), recon.shape
        assert masked.shape == (B, num_classes), masked.shape

        recon_ref, masked_ref = _reference_forward(
            x, params, input_width=W, input_height=H, input_channel=C)
        assert jnp.allclose(masked, masked_ref), "mask mismatch"
        err = float(jnp.max(jnp.abs(recon - recon_ref)))
        assert err < 2e-2, ("recon mismatch", err)

    key = jax.random.PRNGKey(0)
    k1, k2 = jax.random.split(key)
    # Single-tile path: 16x16x3 -> d_out = 768 (one 768-wide lane-dense tile).
    run_case(4, 8, 16, 16, 16, 3, k1)
    # Streamed multi-tile path: 32x32x3 -> d_out = 3072 -> 2 x 2048 tiles
    # (even tile count -> both TCs on v7x share the w3 stream).
    run_case(4, 8, 16, 32, 32, 3, k2)

    print("KERNEL_OK")
</pallas_src>

<mosaic_0001>
module attributes {stable_mosaic.version = 11 : i64} {
  func.func @_decoder_mlp_kernel(%arg0: i32, %arg1: memref<4x128xf32, #tpu.memory_space<vmem>>, %arg2: memref<128x512xbf16, #tpu.memory_space<vmem>>, %arg3: memref<1x512xf32, #tpu.memory_space<vmem>>, %arg4: memref<512x1024xbf16, #tpu.memory_space<vmem>>, %arg5: memref<1x1024xf32, #tpu.memory_space<vmem>>, %arg6: memref<1024x768xbf16, #tpu.memory_space<vmem>>, %arg7: memref<1x768xf32, #tpu.memory_space<vmem>>, %arg8: memref<4x768xf32, #tpu.memory_space<vmem>>) attributes {dimension_semantics = [#tpu.dimension_semantics<parallel>], iteration_bounds = array<i64: 1>, scalar_prefetch = 0 : i64, scratch_operands = 0 : i64, tpu.core_type = #tpu.core_type<tc>, window_params = [{pipeline_mode = #tpu.pipeline_mode<synchronous>, transform_indices = @transform_0, window_bounds = array<i64: 4, 128>}, {pipeline_mode = #tpu.pipeline_mode<synchronous>, transform_indices = @transform_1, window_bounds = array<i64: 128, 512>}, {pipeline_mode = #tpu.pipeline_mode<synchronous>, transform_indices = @transform_2, window_bounds = array<i64: 1, 512>}, {pipeline_mode = #tpu.pipeline_mode<synchronous>, transform_indices = @transform_3, window_bounds = array<i64: 512, 1024>}, {pipeline_mode = #tpu.pipeline_mode<synchronous>, transform_indices = @transform_4, window_bounds = array<i64: 1, 1024>}, {transform_indices = @transform_5, window_bounds = array<i64: 1024, 768>}, {transform_indices = @transform_6, window_bounds = array<i64: 1, 768>}, {transform_indices = @transform_7, window_bounds = array<i64: 4, 768>}]} {
    %c0 = arith.constant 0 : index
    %c0_0 = arith.constant 0 : index
    %0 = vector.load %arg1[%c0, %c0_0] : memref<4x128xf32, #tpu.memory_space<vmem>>, vector<4x128xf32>
    %1 = arith.truncf %0 : vector<4x128xf32> to vector<4x128xbf16>
    %c0_1 = arith.constant 0 : index
    %c0_2 = arith.constant 0 : index
    %2 = vector.load %arg2[%c0_1, %c0_2] : memref<128x512xbf16, #tpu.memory_space<vmem>>, vector<128x512xbf16>
    %cst = arith.constant dense<0.000000e+00> : vector<4x512xf32>
    %3 = tpu.matmul %1, %2, %cst {dimension_numbers = #tpu.dot_dimension_numbers<[1], [0], [0], [1], [0, 0, 1, 1], [], []>} : vector<4x128xbf16>, vector<128x512xbf16>, vector<4x512xf32> -> vector<4x512xf32>
    %c0_3 = arith.constant 0 : index
    %c0_4 = arith.constant 0 : index
    %4 = vector.load %arg3[%c0_3, %c0_4] : memref<1x512xf32, #tpu.memory_space<vmem>>, vector<1x512xf32>
    %5 = vector.broadcast %4 : vector<1x512xf32> to vector<4x512xf32>
    %6 = arith.addf %3, %5 : vector<4x512xf32>
    %cst_5 = arith.constant 0.000000e+00 : f32
    %7 = vector.broadcast %cst_5 : f32 to vector<4x512xf32>
    %8 = arith.maximumf %6, %7 : vector<4x512xf32>
    %9 = arith.truncf %8 : vector<4x512xf32> to vector<4x512xbf16>
    %c0_6 = arith.constant 0 : index
    %c0_7 = arith.constant 0 : index
    %10 = vector.load %arg4[%c0_6, %c0_7] : memref<512x1024xbf16, #tpu.memory_space<vmem>>, vector<512x1024xbf16>
    %cst_8 = arith.constant dense<0.000000e+00> : vector<4x1024xf32>
    %11 = tpu.matmul %9, %10, %cst_8 {dimension_numbers = #tpu.dot_dimension_numbers<[1], [0], [0], [1], [0, 0, 1, 1], [], []>} : vector<4x512xbf16>, vector<512x1024xbf16>, vector<4x1024xf32> -> vector<4x1024xf32>
    %c0_9 = arith.constant 0 : index
    %c0_10 = arith.constant 0 : index
    %12 = vector.load %arg5[%c0_9, %c0_10] : memref<1x1024xf32, #tpu.memory_space<vmem>>, vector<1x1024xf32>
    %13 = vector.broadcast %12 : vector<1x1024xf32> to vector<4x1024xf32>
    %14 = arith.addf %11, %13 : vector<4x1024xf32>
    %cst_11 = arith.constant 0.000000e+00 : f32
    %15 = vector.broadcast %cst_11 : f32 to vector<4x1024xf32>
    %16 = arith.maximumf %14, %15 : vector<4x1024xf32>
    %17 = arith.truncf %16 : vector<4x1024xf32> to vector<4x1024xbf16>
    %c0_12 = arith.constant 0 : index
    %c0_13 = arith.constant 0 : index
    %18 = vector.load %arg6[%c0_12, %c0_13] : memref<1024x768xbf16, #tpu.memory_space<vmem>>, vector<1024x768xbf16>
    %cst_14 = arith.constant dense<0.000000e+00> : vector<4x768xf32>
    %19 = tpu.matmul %17, %18, %cst_14 {dimension_numbers = #tpu.dot_dimension_numbers<[1], [0], [0], [1], [0, 0, 1, 1], [], []>} : vector<4x1024xbf16>, vector<1024x768xbf16>, vector<4x768xf32> -> vector<4x768xf32>
    %c0_15 = arith.constant 0 : index
    %c0_16 = arith.constant 0 : index
    %20 = vector.load %arg7[%c0_15, %c0_16] : memref<1x768xf32, #tpu.memory_space<vmem>>, vector<1x768xf32>
    %21 = vector.broadcast %20 : vector<1x768xf32> to vector<4x768xf32>
    %22 = arith.addf %19, %21 : vector<4x768xf32>
    %23 = arith.negf %22 : vector<4x768xf32>
    %24 = math.exp %23 : vector<4x768xf32>
    %cst_17 = arith.constant 1.000000e+00 : f32
    %25 = vector.broadcast %cst_17 : f32 to vector<4x768xf32>
    %26 = arith.addf %25, %24 : vector<4x768xf32>
    %27 = arith.divf %25, %26 : vector<4x768xf32>
    %c0_18 = arith.constant 0 : index
    %c0_19 = arith.constant 0 : index
    %28 = vector.load %arg8[%c0_18, %c0_19] : memref<4x768xf32, #tpu.memory_space<vmem>>, vector<4x768xf32>
    tpu.vector_store %arg8[%c0_18, %c0_19], %27 {strides = array<i32>} : memref<4x768xf32, #tpu.memory_space<vmem>>, vector<4x768xf32>,
    return
  }
  func.func @transform_0(%arg0: i32) -> (i32, i32) {
    %c0_i32 = arith.constant 0 : i32
    %c0_i32_0 = arith.constant 0 : i32
    %c0_i32_1 = arith.constant 0 : i32
    return %c0_i32, %c0_i32_0 : i32, i32
  }
  func.func @transform_1(%arg0: i32) -> (i32, i32) {
    %c0_i32 = arith.constant 0 : i32
    %c0_i32_0 = arith.constant 0 : i32
    %c0_i32_1 = arith.constant 0 : i32
    return %c0_i32, %c0_i32_0 : i32, i32
  }
  func.func @transform_2(%arg0: i32) -> (i32, i32) {
    %c0_i32 = arith.constant 0 : i32
    %c0_i32_0 = arith.constant 0 : i32
    %c0_i32_1 = arith.constant 0 : i32
    return %c0_i32, %c0_i32_0 : i32, i32
  }
  func.func @transform_3(%arg0: i32) -> (i32, i32) {
    %c0_i32 = arith.constant 0 : i32
    %c0_i32_0 = arith.constant 0 : i32
    %c0_i32_1 = arith.constant 0 : i32
    return %c0_i32, %c0_i32_0 : i32, i32
  }
  func.func @transform_4(%arg0: i32) -> (i32, i32) {
    %c0_i32 = arith.constant 0 : i32
    %c0_i32_0 = arith.constant 0 : i32
    %c0_i32_1 = arith.constant 0 : i32
    return %c0_i32, %c0_i32_0 : i32, i32
  }
  func.func @transform_5(%arg0: i32) -> (i32, i32) {
    %c0_i32 = arith.constant 0 : i32
    %c0_i32_0 = arith.constant 0 : i32
    return %c0_i32, %arg0 : i32, i32
  }
  func.func @transform_6(%arg0: i32) -> (i32, i32) {
    %c0_i32 = arith.constant 0 : i32
    %c0_i32_0 = arith.constant 0 : i32
    return %c0_i32, %arg0 : i32, i32
  }
  func.func @transform_7(%arg0: i32) -> (i32, i32) {
    %c0_i32 = arith.constant 0 : i32
    %c0_i32_0 = arith.constant 0 : i32
    return %c0_i32, %arg0 : i32, i32
  }
}

</mosaic_0001>

<bundles_post_ra>
// kernel: decoder_forward.1
= control target key start
LH: loop header
LB: loop body
LE: loop exit
PB: predicated region body
PF: predicated region fallthrough
CT: control target
= control target key end

     0   :  { %12 = vsyncpa [#allocation3], 0  ;;  %s9371_s0 = inlined_call_operand.vmem [shape: f32[4,128], index: 0, kind: input, shape index: {}]   ;;  %s9372_s1 = inlined_call_operand.hbm [shape: bf16[128,512], index: 1, kind: input, shape index: {}]   ;;  %s9373_s2 = inlined_call_operand.hbm [shape: f32[1,512], index: 2, kind: input, shape index: {}]   ;;  %s9374_s3 = inlined_call_operand.hbm [shape: bf16[512,1024], index: 3, kind: input, shape index: {}]   ;;  %s9375_s4 = inlined_call_operand.hbm [shape: f32[1,1024], index: 4, kind: input, shape index: {}]   ;;  %s9376_s5 = inlined_call_operand.hbm [shape: bf16[1024,768], index: 5, kind: input, shape index: {}]   ;;  %s9377_s6 = inlined_call_operand.hbm [shape: f32[1,768], index: 6, kind: input, shape index: {}]   ;;  %s9378_s7 = inlined_call_operand.vmem [shape: f32[4,768], index: 7, kind: output, shape index: {}]  }
   0x1   :  { %13 = vsyncpa [#allocation5], 0 }
   0x2   :  { %14 = vsyncpa [#allocation8], 0  ;;  %s36_s26 = sshll.u32 %s9373_s2, 4  ;;  %s37_s26 = int_to_ptr.hbm [resolvable:$true] %s36_s26 }
   0x3   :  { %15 = vsyncpa [#allocation11], 0  ;;  %s9004_s27 = smov [#allocation4]   ;;  %s60_s8 = sshll.u32 %s9375_s4, 4  ;;  %s61_s8 = int_to_ptr.hbm [resolvable:$true] %s60_s8 }
   0x4   :  { %s38_s28 = sshll.u32 %s9004_s27, 4  ;;  %s9005_s9 = smov [#allocation7]   ;;  %s39_s28 = int_to_ptr.vmem [resolvable:$true] %s38_s28 }
   0x5   :  { %41 = dma.hbm_to_vmem [thread:$0]  %s37_s26, 64, %s39_s28, [#allocation5]  }
   0x6   :  { %s62_s10 = sshll.u32 %s9005_s9, 4  ;;  %s22_s13 = sshll.u32 %s9372_s1, 4  ;;  %s63_s10 = int_to_ptr.vmem [resolvable:$true] %s62_s10  ;;  %s23_s13 = int_to_ptr.hbm [resolvable:$true] %s22_s13 }
   0x7   :  { %65 = dma.hbm_to_vmem [thread:$0]  %s61_s8, 128, %s63_s10, [#allocation8]  }
   0x8   :  { %s9006_s2 = smov [#allocation2]   ;;  %s46_s17 = sshll.u32 %s9374_s3, 4  ;;  %s47_s17 = int_to_ptr.hbm [resolvable:$true] %s46_s17 }
   0x9   :  { %s24_s14 = sshll.u32 %s9006_s2, 4  ;;  %s9007_s18 = smov 256   ;;  %s25_s14 = int_to_ptr.vmem [resolvable:$true] %s24_s14 }
   0xa   :  { %s9008_s4 = smov 16   ;;  %s9009_s19 = smov [#allocation6]  }
   0xb   :  { %30 = dma.hbm_to_vmem [thread:$0]  %s23_s13, 4096, %s25_s14, [#allocation3], %s9007_s18, %s9007_s18, %s9008_s4  }
   0xc   :  { %s48_s20 = sshll.u32 %s9009_s19, 4  ;;  %s9010_s21 = smov 512   ;;  %s49_s20 = int_to_ptr.vmem [resolvable:$true] %s48_s20 }
   0xd   :  { %s9011_s22 = smov 32   ;;  %s70_s24 = sshll.u32 %s9376_s5, 4  ;;  %s71_s24 = int_to_ptr.hbm [resolvable:$true] %s70_s24 }
   0xe   :  { %54 = dma.hbm_to_vmem [thread:$0]  %s47_s17, 32768, %s49_s20, [#allocation5], %s9010_s21, %s9010_s21, %s9011_s22  }
   0xf   :  { %s9012_s25 = smov [#allocation9]   ;;  %s84_s28 = sshll.u32 %s9377_s6, 4  ;;  %s85_s28 = int_to_ptr.hbm [resolvable:$true] %s84_s28 }
  0x10   :  { %s72_s26 = sshll.u32 %s9012_s25, 4  ;;  %s9013_s29 = smov 384   ;;  %s73_s26 = int_to_ptr.vmem [resolvable:$true] %s72_s26 }
  0x11   :  { %s9014_s30 = smov 24   ;;  %s9015_s8 = smov [#allocation10]  }
  0x12   :  { %78 = dma.hbm_to_vmem [thread:$0]  %s71_s24, 49152, %s73_s26, [#allocation8], %s9013_s29, %s9013_s29, %s9014_s30  }
  0x13   :  { %s86_s9 = sshll.u32 %s9015_s8, 4  ;;  %s87_s9 = int_to_ptr.vmem [resolvable:$true] %s86_s9 }
  0x14   :  { %89 = dma.hbm_to_vmem [thread:$0]  %s85_s28, 96, %s87_s9, [#allocation11]  }
  0x15   :  { %8996 = dma.done.wait [#allocation3], 4096  }
  0x16   :  { %8997 = vsyncadd [#allocation3], 4294963200 }
  0x17   :  { %8998 = dma.done.wait [#allocation5], 32832  }
  0x18   :  { %8999 = vsyncadd [#allocation5], 4294934464 }
  0x19   :  { %9000 = dma.done.wait [#allocation8], 49280  }
  0x1a   :  { %9001 = vsyncadd [#allocation8], 4294918016 }
  0x1b   :  { %9002 = dma.done.wait [#allocation11], 96  }
  0x1c   :  { %9003 = vsyncadd [#allocation11], 4294967200  ;;  %v5561_v0 = vld [vmem:[#allocation2 + $0xe0] sm:$0xf]  ;;  %v8171_v1 = vld [vmem:[#allocation2 + $0xec] sm:$0xf0] }
  0x1d   :  { %v8169_v2 = vld [vmem:[#allocation2 + $0xe4] sm:$0xf]  ;;  %v5562_v3 = vor.u32 %v8171_v1, %v5561_v0  ;;  %v5563_v4 = vld [vmem:[#allocation2 + $0xf0] sm:$0xf0]  ;;  %v5569_v5 = vld [vmem:[#allocation2 + $0xe8] sm:$0xf] }
  0x1e   :  { %v8172_v6 = vld [vmem:[#allocation2 + $0xf4] sm:$0xf0]  ;;  %v5566_v7 = vor.u32 %v8169_v2, %v5563_v4  ;;  %v8170_v9 = vld [vmem:[#allocation2 + $0xec] sm:$0xf]  ;;  %v5571_v10 = vld [vmem:[#allocation2 + $0xf8] sm:$0xf0] }
  0x1f   :  { %v5570_v8 = vor.u32 %v8172_v6, %v5569_v5  ;;  %v5545_v11 = vld [vmem:[#allocation2 + $0xc0] sm:$0xf]  ;;  %318 = vmatpush.bf16.msra.mxu0 %v5562_v3  ;;  %v5574_v12 = vor.u32 %v8170_v9, %v5571_v10  ;;  %v8167_v13 = vld [vmem:[#allocation2 + $0xcc] sm:$0xf0]  ;;  %v8165_v14 = vld [vmem:[#allocation2 + $0xc4] sm:$0xf] }
  0x20   :  { %v5547_v15 = vld [vmem:[#allocation2 + $0xd0] sm:$0xf0]  ;;  %331 = vmatpush.bf16.msra.mxu1 %v5566_v7  ;;  %v5546_v16 = vor.u32 %v8167_v13, %v5545_v11  ;;  %v5553_v18 = vld [vmem:[#allocation2 + $0xc8] sm:$0xf]  ;;  %v8168_v19 = vld [vmem:[#allocation2 + $0xd4] sm:$0xf0] }
  0x21   :  { %344 = vmatpush.bf16.msra.mxu2 %v5570_v8  ;;  %v5550_v17 = vor.u32 %v8165_v14, %v5547_v15  ;;  %v8166_v20 = vld [vmem:[#allocation2 + $0xcc] sm:$0xf]  ;;  %357 = vmatpush.bf16.msra.mxu3 %v5574_v12  ;;  %v5554_v21 = vor.u32 %v8168_v19, %v5553_v18  ;;  %v5555_v22 = vld [vmem:[#allocation2 + $0xd8] sm:$0xf0]  ;;  %v5529_v23 = vld [vmem:[#allocation2 + $0xa0] sm:$0xf] }
  0x22   :  { %v8163_v24 = vld [vmem:[#allocation2 + $0xac] sm:$0xf0]  ;;  %v5558_v25 = vor.u32 %v8166_v20, %v5555_v22  ;;  %v8161_v26 = vld [vmem:[#allocation2 + $0xa4] sm:$0xf]  ;;  %v5531_v27 = vld [vmem:[#allocation2 + $0xb0] sm:$0xf0] }
  0x23   :  { %v5537_v28 = vld [vmem:[#allocation2 + $0xa8] sm:$0xf]  ;;  %319 = vmatpush.bf16.msra.mxu0 %v5546_v16  ;;  %v5530_v29 = vor.u32 %v8163_v24, %v5529_v23  ;;  %v8164_v30 = vld [vmem:[#allocation2 + $0xb4] sm:$0xf0]  ;;  %v8162_v31 = vld [vmem:[#allocation2 + $0xac] sm:$0xf]  ;;  %v5534_v33 = vor.u32 %v8161_v26, %v5531_v27 }
  0x24   :  { %v5539_v32 = vld [vmem:[#allocation2 + $0xb8] sm:$0xf0]  ;;  %332 = vmatpush.bf16.msra.mxu1 %v5550_v17  ;;  %v5538_v34 = vor.u32 %v8164_v30, %v5537_v28  ;;  %v5513_v35 = vld [vmem:[#allocation2 + $0x80] sm:$0xf]  ;;  %v8159_v36 = vld [vmem:[#allocation2 + $0x8c] sm:$0xf0] }
  0x25   :  { %345 = vmatpush.bf16.msra.mxu2 %v5554_v21  ;;  %v8157_v37 = vld [vmem:[#allocation2 + $0x84] sm:$0xf]  ;;  %358 = vmatpush.bf16.msra.mxu3 %v5558_v25  ;;  %v5542_v38 = vor.u32 %v8162_v31, %v5539_v32  ;;  %v5515_v39 = vld [vmem:[#allocation2 + $0x90] sm:$0xf0]  ;;  %v5521_v40 = vld [vmem:[#allocation2 + $0x88] sm:$0xf]  ;;  %v5514_v44 = vor.u32 %v8159_v36, %v5513_v35 }
  0x26   :  { %v8160_v41 = vld [vmem:[#allocation2 + $0x94] sm:$0xf0]  ;;  %v8158_v42 = vld [vmem:[#allocation2 + $0x8c] sm:$0xf]  ;;  %v5523_v43 = vld [vmem:[#allocation2 + $0x98] sm:$0xf0]  ;;  %v5518_v45 = vor.u32 %v8157_v37, %v5515_v39 }
  0x27   :  { %320 = vmatpush.bf16.msra.mxu0 %v5530_v29  ;;  %v5522_v46 = vor.u32 %v8160_v41, %v5521_v40  ;;  %v5497_v47 = vld [vmem:[#allocation2 + $0x60] sm:$0xf]  ;;  %v8155_v48 = vld [vmem:[#allocation2 + $0x6c] sm:$0xf0]  ;;  %v8153_v49 = vld [vmem:[#allocation2 + $0x64] sm:$0xf]  ;;  %v5526_v50 = vor.u32 %v8158_v42, %v5523_v43 }
  0x28   :  { %333 = vmatpush.bf16.msra.mxu1 %v5534_v33  ;;  %v5499_v51 = vld [vmem:[#allocation2 + $0x70] sm:$0xf0]  ;;  %v5505_v52 = vld [vmem:[#allocation2 + $0x68] sm:$0xf]  ;;  %v8156_v53 = vld [vmem:[#allocation2 + $0x74] sm:$0xf0]  ;;  %v5498_v56 = vor.u32 %v8155_v48, %v5497_v47 }
  0x29   :  { %346 = vmatpush.bf16.msra.mxu2 %v5538_v34  ;;  %359 = vmatpush.bf16.msra.mxu3 %v5542_v38  ;;  %v8154_v54 = vld [vmem:[#allocation2 + $0x6c] sm:$0xf]  ;;  %v5507_v55 = vld [vmem:[#allocation2 + $0x78] sm:$0xf0]  ;;  %v5502_v57 = vor.u32 %v8153_v49, %v5499_v51  ;;  %v5506_v58 = vor.u32 %v8156_v53, %v5505_v52  ;;  %v5481_v59 = vld [vmem:[#allocation2 + $0x40] sm:$0xf] }
  0x2a   :  { %v8151_v60 = vld [vmem:[#allocation2 + $0x4c] sm:$0xf0]  ;;  %v8149_v61 = vld [vmem:[#allocation2 + $0x44] sm:$0xf]  ;;  %v5510_v62 = vor.u32 %v8154_v54, %v5507_v55  ;;  %v5483_v63 = vld [vmem:[#allocation2 + $0x50] sm:$0xf0] }
  0x2b   :  { %321 = vmatpush.bf16.msra.mxu0 %v5514_v44  ;;  %v5489_v0 = vld [vmem:[#allocation2 + $0x48] sm:$0xf]  ;;  %v8152_v1 = vld [vmem:[#allocation2 + $0x54] sm:$0xf0]  ;;  %v8150_v2 = vld [vmem:[#allocation2 + $0x4c] sm:$0xf]  ;;  %v5482_v4 = vor.u32 %v8151_v60, %v5481_v59  ;;  %v5486_v5 = vor.u32 %v8149_v61, %v5483_v63 }
  0x2c   :  { %334 = vmatpush.bf16.msra.mxu1 %v5518_v45  ;;  %v5491_v3 = vld [vmem:[#allocation2 + $0x58] sm:$0xf0]  ;;  %v5490_v6 = vor.u32 %v8152_v1, %v5489_v0  ;;  %v5465_v7 = vld [vmem:[#allocation2 + $0x20] sm:$0xf]  ;;  %v8147_v8 = vld [vmem:[#allocation2 + $0x2c] sm:$0xf0] }
  0x2d   :  { %347 = vmatpush.bf16.msra.mxu2 %v5522_v46  ;;  %360 = vmatpush.bf16.msra.mxu3 %v5526_v50  ;;  %v8145_v9 = vld [vmem:[#allocation2 + $0x24] sm:$0xf]  ;;  %v5494_v10 = vor.u32 %v8150_v2, %v5491_v3  ;;  %v5467_v11 = vld [vmem:[#allocation2 + $0x30] sm:$0xf0]  ;;  %v5473_v12 = vld [vmem:[#allocation2 + $0x28] sm:$0xf]  ;;  %v5466_v16 = vor.u32 %v8147_v8, %v5465_v7 }
  0x2e   :  { %v8148_v13 = vld [vmem:[#allocation2 + $0x34] sm:$0xf0]  ;;  %v8146_v14 = vld [vmem:[#allocation2 + $0x2c] sm:$0xf]  ;;  %v5475_v15 = vld [vmem:[#allocation2 + $0x38] sm:$0xf0]  ;;  %v5470_v18 = vor.u32 %v8145_v9, %v5467_v11 }
  0x2f   :  { %322 = vmatpush.bf16.msra.mxu0 %v5498_v56  ;;  %v5449_v17 = vld [vmem:[#allocation2] sm:$0xf]  ;;  %v5474_v19 = vor.u32 %v8148_v13, %v5473_v12  ;;  %v8143_v20 = vld [vmem:[#allocation2 + $0xc] sm:$0xf0]  ;;  %v8141_v21 = vld [vmem:[#allocation2 + $0x4] sm:$0xf]  ;;  %v5478_v23 = vor.u32 %v8146_v14, %v5475_v15 }
  0x30   :  { %335 = vmatpush.bf16.msra.mxu1 %v5502_v57  ;;  %v5451_v22 = vld [vmem:[#allocation2 + $0x10] sm:$0xf0]  ;;  %v5457_v24 = vld [vmem:[#allocation2 + $0x8] sm:$0xf]  ;;  %v8144_v25 = vld [vmem:[#allocation2 + $0x14] sm:$0xf0]  ;;  %v5450_v30 = vor.u32 %v8143_v20, %v5449_v17 }
  0x31   :  { %348 = vmatpush.bf16.msra.mxu2 %v5506_v58  ;;  %361 = vmatpush.bf16.msra.mxu3 %v5510_v62  ;;  %v8142_v26 = vld [vmem:[#allocation2 + $0xc] sm:$0xf]  ;;  %v5459_v27 = vld [vmem:[#allocation2 + $0x18] sm:$0xf0]  ;;  %v5801_v28 = vld [vmem:[#allocation6 + $0x1c0] sm:$0xf]  ;;  %v5454_v34 = vor.u32 %v8141_v21, %v5451_v22  ;;  %v5458_v35 = vor.u32 %v8144_v25, %v5457_v24 }
  0x32   :  { %v8233_v29 = vld [vmem:[#allocation6 + $0x1dc] sm:$0xf0]  ;;  %v114_v31 = vld [vmem:[%s9371_s0] sm:$0xf]  ;;  %v5462_v36 = vor.u32 %v8142_v26, %v5459_v27  ;;  %vm5429_vm7 = vcmask 1043456  }
  0x33   :  { %323 = vmatpush.bf16.msra.mxu0 %v5482_v4  ;;  %v6057_v32 = vld [vmem:[#allocation6 + $0x3c0] sm:$0xf]  ;;  %v5802_v37 = vor.u32 %v8233_v29, %v5801_v28  ;;  %v115_v41 = vpack.c.bf16 %v114_v31, %v114_v31 }
  0x34   :  { %336 = vmatpush.bf16.msra.mxu1 %v5486_v5  ;;  %v8297_v33 = vld [vmem:[#allocation6 + $0x3dc] sm:$0xf0] }
  0x35   :  { %349 = vmatpush.bf16.msra.mxu2 %v5490_v6  ;;  %362 = vmatpush.bf16.msra.mxu3 %v5494_v10  ;;  %v5769_v38 = vld [vmem:[#allocation6 + $0x180] sm:$0xf]  ;;  %v6058_v42 = vor.u32 %v8297_v33, %v6057_v32 }
  0x36   :  { %v6313_v39 = vld [vmem:[#allocation6 + $0x5c0] sm:$0xf] }
  0x37   :  { %324 = vmatpush.bf16.msra.mxu0 %v5466_v16  ;;  %v8361_v40 = vld [vmem:[#allocation6 + $0x5dc] sm:$0xf0] }
  0x38   :  { %337 = vmatpush.bf16.msra.mxu1 %v5470_v18  ;;  %v8225_v43 = vld [vmem:[#allocation6 + $0x19c] sm:$0xf0]  ;;  %v6314_v48 = vor.u32 %v8361_v40, %v6313_v39 }
  0x39   :  { %350 = vmatpush.bf16.msra.mxu2 %v5474_v19  ;;  %363 = vmatpush.bf16.msra.mxu3 %v5478_v23  ;;  %v6569_v44 = vld [vmem:[#allocation6 + $0x7c0] sm:$0xf]  ;;  %v5770_v49 = vor.u32 %v8225_v43, %v5769_v38 }
  0x3a   :  { %v8425_v45 = vld [vmem:[#allocation6 + $0x7dc] sm:$0xf0] }
  0x3b   :  { %325 = vmatpush.bf16.msra.mxu0 %v5450_v30  ;;  %v6025_v46 = vld [vmem:[#allocation6 + $0x380] sm:$0xf]  ;;  %v6570_v50 = vor.u32 %v8425_v45, %v6569_v44 }
  0x3c   :  { %v8289_v47 = vld [vmem:[#allocation6 + $0x39c] sm:$0xf0]  ;;  %338 = vmatpush.bf16.msra.mxu1 %v5454_v34 }
  0x3d   :  { %351 = vmatpush.bf16.msra.mxu2 %v5458_v35  ;;  %364 = vmatpush.bf16.msra.mxu3 %v5462_v36  ;;  %v5737_v51 = vld [vmem:[#allocation6 + $0x140] sm:$0xf]  ;;  %v6026_v54 = vor.u32 %v8289_v47, %v6025_v46 }
  0x3e   :  { %v6281_v52 = vld [vmem:[#allocation6 + $0x580] sm:$0xf]  ;;  %326 = vmatmul.bf16.vlgmr.msra.gmra.mxu0 %v115_v41 }
  0x3f   :  { %1932 = vmatpush.bf16.msrb.mxu0 %v5802_v37  ;;  %v8353_v53 = vld [vmem:[#allocation6 + $0x59c] sm:$0xf0]  ;;  %339 = vmatmul.bf16.vlgmr.msra.gmra.mxu1 %v115_v41 }
  0x40   :  { %1945 = vmatpush.bf16.msrb.mxu1 %v6058_v42  ;;  %v8217_v55 = vld [vmem:[#allocation6 + $0x15c] sm:$0xf0]  ;;  %352 = vmatmul.bf16.vlgmr.msra.gmra.mxu2 %v115_v41  ;;  %v6282_v60 = vor.u32 %v8353_v53, %v6281_v52 }
  0x41   :  { %v6537_v56 = vld [vmem:[#allocation6 + $0x780] sm:$0xf]  ;;  %365 = vmatmul.bf16.vlgmr.msra.gmra.mxu3 %v115_v41  ;;  %1958 = vmatpush.bf16.msrb.mxu2 %v6314_v48  ;;  %v5738_v61 = vor.u32 %v8217_v55, %v5737_v51 }
  0x42   :  { %v8417_v57 = vld [vmem:[#allocation6 + $0x79c] sm:$0xf0]  ;;  %1971 = vmatpush.bf16.msrb.mxu3 %v6570_v50 }
  0x43   :  { %v5993_v58 = vld [vmem:[#allocation6 + $0x340] sm:$0xf]  ;;  %1933 = vmatpush.bf16.msrb.mxu0 %v5770_v49  ;;  %v6538_v62 = vor.u32 %v8417_v57, %v6537_v56  ;;  %v8229_v56 = vld [vmem:[#allocation6 + $0x1c4] sm:$0xf] }
  0x44   :  { %v8281_v59 = vld [vmem:[#allocation6 + $0x35c] sm:$0xf0]  ;;  %1946 = vmatpush.bf16.msrb.mxu1 %v6026_v54  ;;  %v5803_v57 = vld [vmem:[#allocation6 + $0x1e0] sm:$0xf0] }
  0x45   :  { %v5705_v63 = vld [vmem:[#allocation6 + $0x100] sm:$0xf]  ;;  %v5994_v2 = vor.u32 %v8281_v59, %v5993_v58  ;;  %1959 = vmatpush.bf16.msrb.mxu2 %v6282_v60  ;;  %v8293_v58 = vld [vmem:[#allocation6 + $0x3c4] sm:$0xf] }
  0x46   :  { %v6249_v0 = vld [vmem:[#allocation6 + $0x540] sm:$0xf]  ;;  %1972 = vmatpush.bf16.msrb.mxu3 %v6538_v62  ;;  %v6059_v59 = vld [vmem:[#allocation6 + $0x3e0] sm:$0xf0] }
  0x47   :  { %v8345_v1 = vld [vmem:[#allocation6 + $0x55c] sm:$0xf0]  ;;  %1934 = vmatpush.bf16.msrb.mxu0 %v5738_v61 }
  0x48   :  { %v8209_v3 = vld [vmem:[#allocation6 + $0x11c] sm:$0xf0]  ;;  %v6250_v8 = vor.u32 %v8345_v1, %v6249_v0  ;;  %1947 = vmatpush.bf16.msrb.mxu1 %v5994_v2 }
  0x49   :  { %v6505_v4 = vld [vmem:[#allocation6 + $0x740] sm:$0xf]  ;;  %v5706_v9 = vor.u32 %v8209_v3, %v5705_v63  ;;  %v8221_v63 = vld [vmem:[#allocation6 + $0x184] sm:$0xf] }
  0x4a   :  { %v8409_v5 = vld [vmem:[#allocation6 + $0x75c] sm:$0xf0]  ;;  %1960 = vmatpush.bf16.msrb.mxu2 %v6250_v8  ;;  %v6062_v8 = vor.u32 %v8293_v58, %v6059_v59  ;;  %v8253_v58 = vld [vmem:[#allocation6 + $0x284] sm:$0xf] }
  0x4b   :  { %v5961_v6 = vld [vmem:[#allocation6 + $0x300] sm:$0xf]  ;;  %v6506_v10 = vor.u32 %v8409_v5, %v6505_v4  ;;  %1935 = vmatpush.bf16.msrb.mxu0 %v5706_v9  ;;  %v5806_v4 = vor.u32 %v8229_v56, %v5803_v57  ;;  %v5771_v9 = vld [vmem:[#allocation6 + $0x1a0] sm:$0xf0] }
  0x4c   :  { %v8273_v7 = vld [vmem:[#allocation6 + $0x31c] sm:$0xf0]  ;;  %v8189_v56 = vld [vmem:[#allocation6 + $0x84] sm:$0xf] }
  0x4d   :  { %v5673_v11 = vld [vmem:[#allocation6 + $0xc0] sm:$0xf]  ;;  %v5962_v14 = vor.u32 %v8273_v7, %v5961_v6  ;;  %1973 = vmatpush.bf16.msrb.mxu3 %v6506_v10  ;;  %v8357_v6 = vld [vmem:[#allocation6 + $0x5c4] sm:$0xf] }
  0x4e   :  { %v6217_v12 = vld [vmem:[#allocation6 + $0x500] sm:$0xf]  ;;  %v6315_v7 = vld [vmem:[#allocation6 + $0x5e0] sm:$0xf0] }
  0x4f   :  { %v8337_v13 = vld [vmem:[#allocation6 + $0x51c] sm:$0xf0]  ;;  %1948 = vmatpush.bf16.msrb.mxu1 %v5962_v14  ;;  %v8421_v10 = vld [vmem:[#allocation6 + $0x7c4] sm:$0xf] }
  0x50   :  { %v8201_v15 = vld [vmem:[#allocation6 + $0xdc] sm:$0xf0]  ;;  %v6218_v20 = vor.u32 %v8337_v13, %v6217_v12  ;;  %v8285_v12 = vld [vmem:[#allocation6 + $0x384] sm:$0xf] }
  0x51   :  { %v6473_v16 = vld [vmem:[#allocation6 + $0x700] sm:$0xf]  ;;  %v5674_v21 = vor.u32 %v8201_v15, %v5673_v11  ;;  %v6571_v11 = vld [vmem:[#allocation6 + $0x7e0] sm:$0xf0] }
  0x52   :  { %v8401_v17 = vld [vmem:[#allocation6 + $0x71c] sm:$0xf0]  ;;  %1961 = vmatpush.bf16.msrb.mxu2 %v6218_v20  ;;  %v6027_v13 = vld [vmem:[#allocation6 + $0x3a0] sm:$0xf0] }
  0x53   :  { %v5929_v18 = vld [vmem:[#allocation6 + $0x2c0] sm:$0xf]  ;;  %v6474_v22 = vor.u32 %v8401_v17, %v6473_v16  ;;  %1936 = vmatpush.bf16.msrb.mxu0 %v5674_v21  ;;  %v6318_v16 = vor.u32 %v8357_v6, %v6315_v7  ;;  %v5774_v17 = vor.u32 %v8221_v63, %v5771_v9  ;;  %v8349_v20 = vld [vmem:[#allocation6 + $0x584] sm:$0xf] }
  0x54   :  { %v8265_v19 = vld [vmem:[#allocation6 + $0x2dc] sm:$0xf0]  ;;  %v6283_v21 = vld [vmem:[#allocation6 + $0x5a0] sm:$0xf0] }
  0x55   :  { %v5641_v23 = vld [vmem:[#allocation6 + $0x80] sm:$0xf]  ;;  %v5930_v26 = vor.u32 %v8265_v19, %v5929_v18  ;;  %1974 = vmatpush.bf16.msrb.mxu3 %v6474_v22  ;;  %v6574_v18 = vor.u32 %v8421_v10, %v6571_v11  ;;  %v8213_v19 = vld [vmem:[#allocation6 + $0x144] sm:$0xf]  ;;  %v6030_v22 = vor.u32 %v8285_v12, %v6027_v13 }
  0x56   :  { %v6185_v24 = vld [vmem:[#allocation6 + $0x4c0] sm:$0xf]  ;;  %v5643_v57 = vld [vmem:[#allocation6 + $0xa0] sm:$0xf0] }
  0x57   :  { %v8329_v25 = vld [vmem:[#allocation6 + $0x4dc] sm:$0xf0]  ;;  %1949 = vmatpush.bf16.msrb.mxu1 %v5930_v26  ;;  %v8277_v26 = vld [vmem:[#allocation6 + $0x344] sm:$0xf] }
  0x58   :  { %v8193_v27 = vld [vmem:[#allocation6 + $0x9c] sm:$0xf0]  ;;  %v6186_v32 = vor.u32 %v8329_v25, %v6185_v24  ;;  %v8413_v24 = vld [vmem:[#allocation6 + $0x784] sm:$0xf] }
  0x59   :  { %v6441_v28 = vld [vmem:[#allocation6 + $0x6c0] sm:$0xf]  ;;  %v5642_v33 = vor.u32 %v8193_v27, %v5641_v23  ;;  %v5739_v23 = vld [vmem:[#allocation6 + $0x160] sm:$0xf0] }
  0x5a   :  { %v8393_v29 = vld [vmem:[#allocation6 + $0x6dc] sm:$0xf0]  ;;  %1962 = vmatpush.bf16.msrb.mxu2 %v6186_v32  ;;  %v6539_v25 = vld [vmem:[#allocation6 + $0x7a0] sm:$0xf0] }
  0x5b   :  { %v5897_v30 = vld [vmem:[#allocation6 + $0x280] sm:$0xf]  ;;  %v6442_v34 = vor.u32 %v8393_v29, %v6441_v28  ;;  %1937 = vmatpush.bf16.msrb.mxu0 %v5642_v33  ;;  %v5995_v27 = vld [vmem:[#allocation6 + $0x360] sm:$0xf0]  ;;  %v6286_v28 = vor.u32 %v8349_v20, %v6283_v21  ;;  %v5742_v29 = vor.u32 %v8213_v19, %v5739_v23 }
  0x5c   :  { %v8257_v31 = vld [vmem:[#allocation6 + $0x29c] sm:$0xf0]  ;;  %v8341_v32 = vld [vmem:[#allocation6 + $0x544] sm:$0xf] }
  0x5d   :  { %v5609_v35 = vld [vmem:[#allocation6 + $0x40] sm:$0xf]  ;;  %v5898_v38 = vor.u32 %v8257_v31, %v5897_v30  ;;  %1975 = vmatpush.bf16.msrb.mxu3 %v6442_v34  ;;  %v6542_v30 = vor.u32 %v8413_v24, %v6539_v25  ;;  %v8205_v31 = vld [vmem:[#allocation6 + $0x104] sm:$0xf]  ;;  %v5998_v34 = vor.u32 %v8277_v26, %v5995_v27 }
  0x5e   :  { %v6153_v36 = vld [vmem:[#allocation6 + $0x480] sm:$0xf]  ;;  %v6251_v33 = vld [vmem:[#allocation6 + $0x560] sm:$0xf0] }
  0x5f   :  { %v8321_v37 = vld [vmem:[#allocation6 + $0x49c] sm:$0xf0]  ;;  %1950 = vmatpush.bf16.msrb.mxu1 %v5898_v38  ;;  %v8269_v38 = vld [vmem:[#allocation6 + $0x304] sm:$0xf] }
  0x60   :  { %v8185_v39 = vld [vmem:[#allocation6 + $0x5c] sm:$0xf0]  ;;  %v6154_v44 = vor.u32 %v8321_v37, %v6153_v36  ;;  %v8405_v36 = vld [vmem:[#allocation6 + $0x744] sm:$0xf] }
  0x61   :  { %v6409_v40 = vld [vmem:[#allocation6 + $0x680] sm:$0xf]  ;;  %v5610_v46 = vor.u32 %v8185_v39, %v5609_v35  ;;  %v5707_v35 = vld [vmem:[#allocation6 + $0x120] sm:$0xf0] }
  0x62   :  { %v8385_v41 = vld [vmem:[#allocation6 + $0x69c] sm:$0xf0]  ;;  %1963 = vmatpush.bf16.msrb.mxu2 %v6154_v44  ;;  %v6507_v37 = vld [vmem:[#allocation6 + $0x760] sm:$0xf0] }
  0x63   :  { %v5865_v42 = vld [vmem:[#allocation6 + $0x240] sm:$0xf]  ;;  %v6410_v47 = vor.u32 %v8385_v41, %v6409_v40  ;;  %1938 = vmatpush.bf16.msrb.mxu0 %v5610_v46  ;;  %v5963_v39 = vld [vmem:[#allocation6 + $0x320] sm:$0xf0]  ;;  %v6254_v40 = vor.u32 %v8341_v32, %v6251_v33  ;;  %v5710_v41 = vor.u32 %v8205_v31, %v5707_v35 }
  0x64   :  { %v8249_v43 = vld [vmem:[#allocation6 + $0x25c] sm:$0xf0]  ;;  %v8333_v44 = vld [vmem:[#allocation6 + $0x504] sm:$0xf]  ;;  %v5966_v46 = vor.u32 %v8269_v38, %v5963_v39 }
  0x65   :  { %v5577_v45 = vld [vmem:[#allocation6] sm:$0xf]  ;;  %v5866_v51 = vor.u32 %v8249_v43, %v5865_v42  ;;  %1976 = vmatpush.bf16.msrb.mxu3 %v6410_v47  ;;  %v6510_v42 = vor.u32 %v8405_v36, %v6507_v37  ;;  %v8197_v43 = vld [vmem:[#allocation6 + $0xc4] sm:$0xf] }
  0x66   :  { %v8177_v48 = vld [vmem:[#allocation6 + $0x1c] sm:$0xf0]  ;;  %v5675_v47 = vld [vmem:[#allocation6 + $0xe0] sm:$0xf0] }
  0x67   :  { %v6121_v49 = vld [vmem:[#allocation6 + $0x440] sm:$0xf]  ;;  %v5578_v61 = vor.u32 %v8177_v48, %v5577_v45  ;;  %1951 = vmatpush.bf16.msrb.mxu1 %v5866_v51  ;;  %v6219_v45 = vld [vmem:[#allocation6 + $0x520] sm:$0xf0] }
  0x68   :  { %v8313_v50 = vld [vmem:[#allocation6 + $0x45c] sm:$0xf0]  ;;  %v8397_v48 = vld [vmem:[#allocation6 + $0x704] sm:$0xf] }
  0x69   :  { %v5833_v52 = vld [vmem:[#allocation6 + $0x200] sm:$0xf]  ;;  %v6122_v60 = vor.u32 %v8313_v50, %v6121_v49  ;;  %1939 = vmatpush.bf16.msrb.mxu0 %v5578_v61  ;;  %v6475_v49 = vld [vmem:[#allocation6 + $0x720] sm:$0xf0] }
  0x6a   :  { %v6377_v53 = vld [vmem:[#allocation6 + $0x640] sm:$0xf]  ;;  %v8261_v50 = vld [vmem:[#allocation6 + $0x2c4] sm:$0xf] }
  0x6b   :  { %v8377_v54 = vld [vmem:[#allocation6 + $0x65c] sm:$0xf0]  ;;  %1964 = vmatpush.bf16.msrb.mxu2 %v6122_v60  ;;  %v5931_v51 = vld [vmem:[#allocation6 + $0x2e0] sm:$0xf0]  ;;  %v5646_v60 = vor.u32 %v8189_v56, %v5643_v57  ;;  %v8290_v56 = vld [vmem:[#allocation6 + $0x3a4] sm:$0xf0] }
  0x6c   :  { %v8241_v55 = vld [vmem:[#allocation6 + $0x21c] sm:$0xf0]  ;;  %v6378_v62 = vor.u32 %v8377_v54, %v6377_v53  ;;  %v5678_v53 = vor.u32 %v8197_v43, %v5675_v47  ;;  %v6478_v54 = vor.u32 %v8397_v48, %v6475_v49  ;;  %v5899_v59 = vld [vmem:[#allocation6 + $0x2a0] sm:$0xf0]  ;;  %v6065_v43 = vld [vmem:[#allocation6 + $0x3c8] sm:$0xf] }
  0x6d   :  { %v6089_v0 = vld [vmem:[#allocation6 + $0x400] sm:$0xf]  ;;  %v5834_v3 = vor.u32 %v8241_v55, %v5833_v52  ;;  %1984 = vmatpush.bf16.msra.mxu0 %v5806_v4  ;;  %v6222_v52 = vor.u32 %v8333_v44, %v6219_v45  ;;  %v5934_v55 = vor.u32 %v8261_v50, %v5931_v51  ;;  %v5902_v61 = vor.u32 %v8253_v58, %v5899_v59  ;;  %v6187_v63 = vld [vmem:[#allocation6 + $0x4e0] sm:$0xf0]  ;;  %v8298_v44 = vld [vmem:[#allocation6 + $0x3e4] sm:$0xf0] }
  0x6e   :  { %v8305_v1 = vld [vmem:[#allocation6 + $0x41c] sm:$0xf0]  ;;  %1977 = vmatpush.bf16.msrb.mxu3 %v6378_v62  ;;  %v8325_v62 = vld [vmem:[#allocation6 + $0x4c4] sm:$0xf]  ;;  %v6066_v51 = vor.u32 %v8298_v44, %v6065_v43 }
  0x6f   :  { %v6345_v2 = vld [vmem:[#allocation6 + $0x600] sm:$0xf]  ;;  %v6090_v14 = vor.u32 %v8305_v1, %v6089_v0  ;;  %1952 = vmatpush.bf16.msrb.mxu1 %v5834_v3  ;;  %v8389_v0 = vld [vmem:[#allocation6 + $0x6c4] sm:$0xf]  ;;  %v6190_v1 = vor.u32 %v8325_v62, %v6187_v63  ;;  %v6321_v62 = vld [vmem:[#allocation6 + $0x5c8] sm:$0xf] }
  0x70   :  { %v8369_v5 = vld [vmem:[#allocation6 + $0x61c] sm:$0xf0]  ;;  %v8181_v4 = vld [vmem:[#allocation6 + $0x44] sm:$0xf]  ;;  %v8362_v63 = vld [vmem:[#allocation6 + $0x5e4] sm:$0xf0] }
  0x71   :  { %v6346_v15 = vor.u32 %v8369_v5, %v6345_v2  ;;  %1965 = vmatpush.bf16.msrb.mxu2 %v6090_v14  ;;  %1985 = vmatpush.bf16.msra.mxu0 %v5774_v17  ;;  %v6443_v2 = vld [vmem:[#allocation6 + $0x6e0] sm:$0xf0] }
  0x72   :  { %v6446_v3 = vor.u32 %v8389_v0, %v6443_v2  ;;  %v5611_v5 = vld [vmem:[#allocation6 + $0x60] sm:$0xf0]  ;;  %v6577_v0 = vld [vmem:[#allocation6 + $0x7c8] sm:$0xf] }
  0x73   :  { %1997 = vmatpush.bf16.msra.mxu1 %v6062_v8  ;;  %1978 = vmatpush.bf16.msrb.mxu3 %v6346_v15  ;;  %v5614_v6 = vor.u32 %v8181_v4, %v5611_v5  ;;  %v8245_v7 = vld [vmem:[#allocation6 + $0x244] sm:$0xf]  ;;  %v8426_v4 = vld [vmem:[#allocation6 + $0x7e4] sm:$0xf0] }
  0x74   :  { %v5867_v8 = vld [vmem:[#allocation6 + $0x260] sm:$0xf0]  ;;  %v5745_v5 = vld [vmem:[#allocation6 + $0x148] sm:$0xf] }
  0x75   :  { %2010 = vmatpush.bf16.msra.mxu2 %v6318_v16  ;;  %1986 = vmatpush.bf16.msra.mxu0 %v5742_v29  ;;  %v5870_v9 = vor.u32 %v8245_v7, %v5867_v8  ;;  %v8317_v10 = vld [vmem:[#allocation6 + $0x484] sm:$0xf]  ;;  %v6001_v8 = vld [vmem:[#allocation6 + $0x348] sm:$0xf] }
  0x76   :  { %v6155_v11 = vld [vmem:[#allocation6 + $0x4a0] sm:$0xf0] }
  0x77   :  { %2023 = vmatpush.bf16.msra.mxu3 %v6574_v18  ;;  %1998 = vmatpush.bf16.msra.mxu1 %v6030_v22  ;;  %v8381_v12 = vld [vmem:[#allocation6 + $0x684] sm:$0xf]  ;;  %v6158_v13 = vor.u32 %v8317_v10, %v6155_v11  ;;  %v6322_v11 = vor.u32 %v8362_v63, %v6321_v62  ;;  %v8186_v62 = vld [vmem:[#allocation6 + $0x64] sm:$0xf0] }
  0x78   :  { %v6411_v14 = vld [vmem:[#allocation6 + $0x6a0] sm:$0xf0]  ;;  %v5873_v63 = vld [vmem:[#allocation6 + $0x248] sm:$0xf] }
  0x79   :  { %2011 = vmatpush.bf16.msra.mxu2 %v6286_v28  ;;  %1987 = vmatpush.bf16.msra.mxu0 %v5710_v41  ;;  %v6414_v15 = vor.u32 %v8381_v12, %v6411_v14  ;;  %v8173_v16 = vld [vmem:[#allocation6 + $0x4] sm:$0xf]  ;;  %v8234_v41 = vld [vmem:[#allocation6 + $0x1e4] sm:$0xf0] }
  0x7a   :  { %v5579_v17 = vld [vmem:[#allocation6 + $0x20] sm:$0xf0] }
  0x7b   :  { %2024 = vmatpush.bf16.msra.mxu3 %v6542_v30  ;;  %1999 = vmatpush.bf16.msra.mxu1 %v5998_v34  ;;  %v8237_v18 = vld [vmem:[#allocation6 + $0x204] sm:$0xf]  ;;  %v5582_v19 = vor.u32 %v8173_v16, %v5579_v17  ;;  %v148_v34 = vld [vmem:[#allocation4] sm:$0xf]  ;;  %v8354_v16 = vld [vmem:[#allocation6 + $0x5a4] sm:$0xf0] }
  0x7c   :  { %v5835_v20 = vld [vmem:[#allocation6 + $0x220] sm:$0xf0]  ;;  %v150_v35 = vperm.slane %v148_v34, 0  ;;  %v151_v36 = vperm.slane %v148_v34, 1  ;;  %v152_v47 = vperm.slane %v148_v34, 2  ;;  %v153_v50 = vperm.slane %v148_v34, 3 }
  0x7d   :  { %2012 = vmatpush.bf16.msra.mxu2 %v6254_v40  ;;  %1988 = vmatpush.bf16.msra.mxu0 %v5678_v53  ;;  %v5838_v21 = vor.u32 %v8237_v18, %v5835_v20  ;;  %v8309_v22 = vld [vmem:[#allocation6 + $0x444] sm:$0xf]  ;;  %v5809_v40 = vld [vmem:[#allocation6 + $0x1c8] sm:$0xf] }
  0x7e   :  { %v6123_v23 = vld [vmem:[#allocation6 + $0x460] sm:$0xf0]  ;;  %v5810_v48 = vor.u32 %v8234_v41, %v5809_v40  ;;  %v8226_v53 = vld [vmem:[#allocation6 + $0x1a4] sm:$0xf0] }
  0x7f   :  { %2025 = vmatpush.bf16.msra.mxu3 %v6510_v42  ;;  %2000 = vmatpush.bf16.msra.mxu1 %v5966_v46  ;;  %v6126_v24 = vor.u32 %v8309_v22, %v6123_v23  ;;  %v8373_v25 = vld [vmem:[#allocation6 + $0x644] sm:$0xf]  ;;  %v6545_v17 = vld [vmem:[#allocation6 + $0x788] sm:$0xf] }
  0x80   :  { %v6379_v26 = vld [vmem:[#allocation6 + $0x660] sm:$0xf0]  ;;  %v8418_v20 = vld [vmem:[#allocation6 + $0x7a4] sm:$0xf0] }
  0x81   :  { %2013 = vmatpush.bf16.msra.mxu2 %v6222_v52  ;;  %1989 = vmatpush.bf16.msra.mxu0 %v5646_v60  ;;  %v6382_v27 = vor.u32 %v8373_v25, %v6379_v26  ;;  %v8301_v28 = vld [vmem:[#allocation6 + $0x404] sm:$0xf]  ;;  %v5777_v52 = vld [vmem:[#allocation6 + $0x188] sm:$0xf] }
  0x82   :  { %v6091_v29 = vld [vmem:[#allocation6 + $0x420] sm:$0xf0]  ;;  %v8210_v22 = vld [vmem:[#allocation6 + $0x124] sm:$0xf0] }
  0x83   :  { %2026 = vmatpush.bf16.msra.mxu3 %v6478_v54  ;;  %2001 = vmatpush.bf16.msra.mxu1 %v5934_v55  ;;  %v6094_v30 = vor.u32 %v8301_v28, %v6091_v29  ;;  %v8365_v31 = vld [vmem:[#allocation6 + $0x604] sm:$0xf]  ;;  %v6033_v55 = vld [vmem:[#allocation6 + $0x388] sm:$0xf]  ;;  %v6546_v28 = vor.u32 %v8418_v20, %v6545_v17  ;;  %v8294_v17 = vld [vmem:[#allocation6 + $0x3cc] sm:$0xf] }
  0x84   :  { %v6347_v32 = vld [vmem:[#allocation6 + $0x620] sm:$0xf0]  ;;  %v5969_v23 = vld [vmem:[#allocation6 + $0x308] sm:$0xf] }
  0x85   :  { %2014 = vmatpush.bf16.msra.mxu2 %v6190_v1  ;;  %1990 = vmatpush.bf16.msra.mxu0 %v5614_v6  ;;  %v6350_v33 = vor.u32 %v8365_v31, %v6347_v32  ;;  %v8218_v6 = vld [vmem:[#allocation6 + $0x164] sm:$0xf0] }
  0x86   :  { %v5746_v14 = vor.u32 %v8218_v6, %v5745_v5  ;;  %v8346_v31 = vld [vmem:[#allocation6 + $0x564] sm:$0xf0] }
  0x87   :  { %2002 = vmatpush.bf16.msra.mxu1 %v5902_v61  ;;  %2027 = vmatpush.bf16.msra.mxu3 %v6446_v3  ;;  %v5778_v61 = vor.u32 %v8226_v53, %v5777_v52  ;;  %v6034_v3 = vor.u32 %v8290_v56, %v6033_v55  ;;  %v8410_v34 = vld [vmem:[#allocation6 + $0x764] sm:$0xf0] }
  0x88   :  { %v6225_v41 = vld [vmem:[#allocation6 + $0x508] sm:$0xf] }
  0x89   :  { %2015 = vmatpush.bf16.msra.mxu2 %v6158_v13  ;;  %1991 = vmatpush.bf16.msra.mxu0 %v5582_v19  ;;  %v6578_v13 = vor.u32 %v8426_v4, %v6577_v0  ;;  %v6193_v55 = vld [vmem:[#allocation6 + $0x4c8] sm:$0xf] }
  0x8a   :  { %v8330_v56 = vld [vmem:[#allocation6 + $0x4e4] sm:$0xf0] }
  0x8b   :  { %2003 = vmatpush.bf16.msra.mxu1 %v5870_v9  ;;  %2028 = vmatpush.bf16.msra.mxu3 %v6414_v15  ;;  %v8282_v9 = vld [vmem:[#allocation6 + $0x364] sm:$0xf0] }
  0x8c   :  { %v6289_v15 = vld [vmem:[#allocation6 + $0x588] sm:$0xf]  ;;  %v6002_v19 = vor.u32 %v8282_v9, %v6001_v8 }
  0x8d   :  { %2016 = vmatpush.bf16.msra.mxu2 %v6126_v24  ;;  %v8274_v24 = vld [vmem:[#allocation6 + $0x324] sm:$0xf0]  ;;  %v6290_v26 = vor.u32 %v8354_v16, %v6289_v15  ;;  %v5811_v16 = vld [vmem:[#allocation6 + $0x1e8] sm:$0xf0] }
  0x8e   :  { %v5970_v32 = vor.u32 %v8274_v24, %v5969_v23  ;;  %v8250_v0 = vld [vmem:[#allocation6 + $0x264] sm:$0xf0] }
  0x8f   :  { %2004 = vmatpush.bf16.msra.mxu1 %v5838_v21  ;;  %2029 = vmatpush.bf16.msra.mxu3 %v6382_v27  ;;  %v5713_v21 = vld [vmem:[#allocation6 + $0x108] sm:$0xf] }
  0x90   :  { %v5714_v29 = vor.u32 %v8210_v22, %v5713_v21  ;;  %v8322_v4 = vld [vmem:[#allocation6 + $0x4a4] sm:$0xf0] }
  0x91   :  { %2017 = vmatpush.bf16.msra.mxu2 %v6094_v30  ;;  %v6257_v30 = vld [vmem:[#allocation6 + $0x548] sm:$0xf] }
  0x92   :  { %v6417_v5 = vld [vmem:[#allocation6 + $0x688] sm:$0xf] }
  0x93   :  { %2030 = vmatpush.bf16.msra.mxu3 %v6350_v33  ;;  %v6513_v33 = vld [vmem:[#allocation6 + $0x748] sm:$0xf] }
  0x94   :  { %v6514_v40 = vor.u32 %v8410_v34, %v6513_v33  ;;  %v8386_v8 = vld [vmem:[#allocation6 + $0x6a4] sm:$0xf0]  ;;  %v6035_v33 = vld [vmem:[#allocation6 + $0x3a8] sm:$0xf0] }
  0x95   :  { %v5585_v9 = vld [vmem:[#allocation6 + $0x8] sm:$0xf]  ;;  %v6418_v20 = vor.u32 %v8386_v8, %v6417_v5  ;;  %v6515_v8 = vld [vmem:[#allocation6 + $0x768] sm:$0xf0] }
  0x96   :  { %v6129_v21 = vld [vmem:[#allocation6 + $0x448] sm:$0xf] }
  0x97   :  { %v8314_v22 = vld [vmem:[#allocation6 + $0x464] sm:$0xf0] }
  0xbb   :  { %v327_v37 = vpop.f32.mrf.mxu0 }
  0xbc   :  { %v328_v38 = vadd.f32 %v327_v37, %v150_v35  ;;  %v340_v39 = vpop.f32.mrf.mxu1  ;;  %v5681_v35 = vld [vmem:[#allocation6 + $0xc8] sm:$0xf] }
  0xbd   :  { %v341_v42 = vadd.f32 %v340_v39, %v151_v36  ;;  %v8202_v36 = vld [vmem:[#allocation6 + $0xe4] sm:$0xf0]  ;;  %v6258_v39 = vor.u32 %v8346_v31, %v6257_v30  ;;  %v6130_v30 = vor.u32 %v8314_v22, %v6129_v21  ;;  %v5779_v31 = vld [vmem:[#allocation6 + $0x1a8] sm:$0xf0] }
  0xbe   :  { %v370_v45 = vmax.f32 %v328_v38, 0.0  ;;  %v5937_v37 = vld [vmem:[#allocation6 + $0x2c8] sm:$0xf]  ;;  %v5682_v43 = vor.u32 %v8202_v36, %v5681_v35  ;;  %v8398_v21 = vld [vmem:[#allocation6 + $0x70c] sm:$0xf] }
  0xbf   :  { %v371_v46 = vmax.f32 %v341_v42, 0.0  ;;  %v8266_v38 = vld [vmem:[#allocation6 + $0x2e4] sm:$0xf0]  ;;  %v6483_v22 = vld [vmem:[#allocation6 + $0x728] sm:$0xf0] }
  0xc0   :  { %v9077_v49 = vpack.c.bf16 %v370_v45, %v370_v45  ;;  %v8338_v42 = vld [vmem:[#allocation6 + $0x524] sm:$0xf0]  ;;  %v5938_v44 = vor.u32 %v8266_v38, %v5937_v37 }
  0xc1   :  { %v9079_v54 = vpack.c.bf16 %v371_v46, %v371_v46  ;;  %v6481_v45 = vld [vmem:[#allocation6 + $0x708] sm:$0xf]  ;;  %v6226_v52 = vor.u32 %v8338_v42, %v6225_v41 }
  0xc2   :  { %1940 = vmatmul.bf16.vlgmr.msrb.gmra.mxu0 %v9077_v49  ;;  %v8402_v46 = vld [vmem:[#allocation6 + $0x724] sm:$0xf0] }
  0xc3   :  { %v353_v57 = vpop.f32.mrf.mxu2  ;;  %1953 = vmatmul.bf16.vlgmr.msrb.gmra.mxu1 %v9079_v54  ;;  %2036 = vmatpush.bf16.msrb.mxu0 %v5810_v48  ;;  %v329_v60 = vpop.f32.mrf.mxu0  ;;  %v8194_v48 = vld [vmem:[#allocation6 + $0xa4] sm:$0xf0]  ;;  %v6482_v53 = vor.u32 %v8402_v46, %v6481_v45  ;;  %v8214_v45 = vld [vmem:[#allocation6 + $0x14c] sm:$0xf] }
  0xc4   :  { %v354_v58 = vadd.f32 %v353_v57, %v152_v47  ;;  %v366_v59 = vpop.f32.mrf.mxu3  ;;  %2049 = vmatpush.bf16.msrb.mxu1 %v6066_v51  ;;  %v342_v2 = vpop.f32.mrf.mxu1  ;;  %v5649_v47 = vld [vmem:[#allocation6 + $0x88] sm:$0xf] }
  0xc5   :  { %v367_v1 = vadd.f32 %v366_v59, %v153_v50  ;;  %v5905_v50 = vld [vmem:[#allocation6 + $0x288] sm:$0xf]  ;;  %v5650_v57 = vor.u32 %v8194_v48, %v5649_v47  ;;  %v5747_v47 = vld [vmem:[#allocation6 + $0x168] sm:$0xf0] }
  0xc6   :  { %v372_v7 = vmax.f32 %v354_v58, 0.0  ;;  %v8258_v51 = vld [vmem:[#allocation6 + $0x2a4] sm:$0xf0]  ;;  %v8278_v48 = vld [vmem:[#allocation6 + $0x34c] sm:$0xf] }
  0xc7   :  { %v373_v10 = vmax.f32 %v367_v1, 0.0  ;;  %2037 = vmatpush.bf16.msrb.mxu0 %v5778_v61  ;;  %v5906_v58 = vor.u32 %v8258_v51, %v5905_v50  ;;  %v6449_v59 = vld [vmem:[#allocation6 + $0x6c8] sm:$0xf]  ;;  %v6194_v1 = vor.u32 %v8330_v56, %v6193_v55  ;;  %v6003_v50 = vld [vmem:[#allocation6 + $0x368] sm:$0xf0] }
  0xc8   :  { %v9083_v12 = vpack.c.bf16 %v372_v7, %v372_v7  ;;  %2050 = vmatpush.bf16.msrb.mxu1 %v6034_v3  ;;  %v8394_v60 = vld [vmem:[#allocation6 + $0x6e4] sm:$0xf0]  ;;  %v5874_v7 = vor.u32 %v8250_v0, %v5873_v63  ;;  %v8350_v55 = vld [vmem:[#allocation6 + $0x58c] sm:$0xf] }
  0xc9   :  { %v9085_v18 = vpack.c.bf16 %v373_v10, %v373_v10  ;;  %v5617_v61 = vld [vmem:[#allocation6 + $0x48] sm:$0xf]  ;;  %v6450_v2 = vor.u32 %v8394_v60, %v6449_v59  ;;  %v6291_v56 = vld [vmem:[#allocation6 + $0x5a8] sm:$0xf0] }
  0xca   :  { %1966 = vmatmul.bf16.vlgmr.msrb.gmra.mxu2 %v9083_v12  ;;  %v6161_v3 = vld [vmem:[#allocation6 + $0x488] sm:$0xf]  ;;  %v5618_v6 = vor.u32 %v8186_v62, %v5617_v61  ;;  %v8414_v59 = vld [vmem:[#allocation6 + $0x78c] sm:$0xf] }
  0xcb   :  { %1979 = vmatmul.bf16.vlgmr.msrb.gmra.mxu3 %v9085_v18  ;;  %2062 = vmatpush.bf16.msrb.mxu2 %v6322_v11  ;;  %v355_v25 = vpop.f32.mrf.mxu2  ;;  %v8178_v10 = vld [vmem:[#allocation6 + $0x24] sm:$0xf0]  ;;  %v6162_v15 = vor.u32 %v8322_v4, %v6161_v3  ;;  %v6547_v60 = vld [vmem:[#allocation6 + $0x7a8] sm:$0xf0] }
  0xcc   :  { %2075 = vmatpush.bf16.msrb.mxu3 %v6578_v13  ;;  %v368_v27 = vpop.f32.mrf.mxu3  ;;  %2038 = vmatpush.bf16.msrb.mxu0 %v5746_v14  ;;  %v5841_v11 = vld [vmem:[#allocation6 + $0x208] sm:$0xf]  ;;  %v8230_v14 = vld [vmem:[#allocation6 + $0x1cc] sm:$0xf]  ;;  %v5586_v23 = vor.u32 %v8178_v10, %v5585_v9 }
  0xcd   :  { %2051 = vmatpush.bf16.msrb.mxu1 %v6002_v19  ;;  %v8242_v13 = vld [vmem:[#allocation6 + $0x224] sm:$0xf0]  ;;  %v6067_v19 = vld [vmem:[#allocation6 + $0x3e8] sm:$0xf0]  ;;  %v5814_v27 = vor.u32 %v8230_v14, %v5811_v16 }
  0xce   :  { %v5842_v24 = vor.u32 %v8242_v13, %v5841_v11  ;;  %v6385_v25 = vld [vmem:[#allocation6 + $0x648] sm:$0xf]  ;;  %v8206_v61 = vld [vmem:[#allocation6 + $0x10c] sm:$0xf] }
  0xcf   :  { %2063 = vmatpush.bf16.msrb.mxu2 %v6290_v26  ;;  %v8378_v26 = vld [vmem:[#allocation6 + $0x664] sm:$0xf0]  ;;  %v5715_v62 = vld [vmem:[#allocation6 + $0x128] sm:$0xf0] }
  0xd0   :  { %2076 = vmatpush.bf16.msrb.mxu3 %v6546_v28  ;;  %2039 = vmatpush.bf16.msrb.mxu0 %v5714_v29  ;;  %v6070_v28 = vor.u32 %v8294_v17, %v6067_v19  ;;  %v8222_v29 = vld [vmem:[#allocation6 + $0x18c] sm:$0xf]  ;;  %v6386_v34 = vor.u32 %v8378_v26, %v6385_v25  ;;  %v6097_v35 = vld [vmem:[#allocation6 + $0x408] sm:$0xf]  ;;  %v5718_v5 = vor.u32 %v8206_v61, %v5715_v62 }
  0xd1   :  { %2052 = vmatpush.bf16.msrb.mxu1 %v5970_v32  ;;  %v8286_v32 = vld [vmem:[#allocation6 + $0x38c] sm:$0xf]  ;;  %v8306_v36 = vld [vmem:[#allocation6 + $0x424] sm:$0xf0]  ;;  %v5782_v41 = vor.u32 %v8222_v29, %v5779_v31 }
  0xd2   :  { %1992 = vmatmul.bf16.vlgmr.msra.gmra.mxu0 %v9077_v49  ;;  %v6353_v37 = vld [vmem:[#allocation6 + $0x608] sm:$0xf]  ;;  %v6038_v42 = vor.u32 %v8286_v32, %v6035_v33  ;;  %v6098_v46 = vor.u32 %v8306_v36, %v6097_v35  ;;  %v8270_v63 = vld [vmem:[#allocation6 + $0x30c] sm:$0xf] }
  0xd3   :  { %2064 = vmatpush.bf16.msrb.mxu2 %v6258_v39  ;;  %2005 = vmatmul.bf16.vlgmr.msra.gmra.mxu1 %v9079_v54  ;;  %v8370_v38 = vld [vmem:[#allocation6 + $0x624] sm:$0xf0]  ;;  %v8358_v39 = vld [vmem:[#allocation6 + $0x5cc] sm:$0xf] }
  0xd4   :  { %2077 = vmatpush.bf16.msrb.mxu3 %v6514_v40  ;;  %2040 = vmatpush.bf16.msrb.mxu0 %v5682_v43  ;;  %v6323_v40 = vld [vmem:[#allocation6 + $0x5e8] sm:$0xf0]  ;;  %v6354_v51 = vor.u32 %v8370_v38, %v6353_v37 }
  0xd5   :  { %2053 = vmatpush.bf16.msrb.mxu1 %v5938_v44  ;;  %v8422_v43 = vld [vmem:[#allocation6 + $0x7cc] sm:$0xf] }
  0xd6   :  { %v6579_v44 = vld [vmem:[#allocation6 + $0x7e8] sm:$0xf0] }
  0xd7   :  { %2065 = vmatpush.bf16.msrb.mxu2 %v6226_v52  ;;  %v6326_v52 = vor.u32 %v8358_v39, %v6323_v40  ;;  %v5971_v0 = vld [vmem:[#allocation6 + $0x328] sm:$0xf0] }
  0xd8   :  { %2078 = vmatpush.bf16.msrb.mxu3 %v6482_v53  ;;  %2041 = vmatpush.bf16.msrb.mxu0 %v5650_v57  ;;  %v6582_v53 = vor.u32 %v8422_v43, %v6579_v44  ;;  %v5750_v57 = vor.u32 %v8214_v45, %v5747_v47  ;;  %v8342_v3 = vld [vmem:[#allocation6 + $0x54c] sm:$0xf] }
  0xd9   :  { %2054 = vmatpush.bf16.msrb.mxu1 %v5906_v58  ;;  %v6006_v58 = vor.u32 %v8278_v48, %v6003_v50  ;;  %v6259_v4 = vld [vmem:[#allocation6 + $0x568] sm:$0xf0] }
  0xda   :  { %2018 = vmatmul.bf16.vlgmr.msra.gmra.mxu2 %v9083_v12  ;;  %v8198_v9 = vld [vmem:[#allocation6 + $0xcc] sm:$0xf]  ;;  %v6262_v14 = vor.u32 %v8342_v3, %v6259_v4  ;;  %v5785_v3 = vld [vmem:[#allocation6 + $0x190] sm:$0xf] }
  0xdb   :  { %2031 = vmatmul.bf16.vlgmr.msra.gmra.mxu3 %v9085_v18  ;;  %2066 = vmatpush.bf16.msrb.mxu2 %v6194_v1  ;;  %v6294_v1 = vor.u32 %v8350_v55, %v6291_v56  ;;  %v5683_v10 = vld [vmem:[#allocation6 + $0xe8] sm:$0xf0]  ;;  %v8235_v55 = vld [vmem:[#allocation6 + $0x1ec] sm:$0xf0] }
  0xdc   :  { %2079 = vmatpush.bf16.msrb.mxu3 %v6450_v2  ;;  %2042 = vmatpush.bf16.msrb.mxu0 %v5618_v6  ;;  %v6550_v2 = vor.u32 %v8414_v59, %v6547_v60  ;;  %v5974_v6 = vor.u32 %v8270_v63, %v5971_v0  ;;  %v8262_v11 = vld [vmem:[#allocation6 + $0x2cc] sm:$0xf]  ;;  %v5686_v19 = vor.u32 %v8198_v9, %v5683_v10  ;;  %v6073_v56 = vld [vmem:[#allocation6 + $0x3d0] sm:$0xf] }
  0xdd   :  { %2055 = vmatpush.bf16.msrb.mxu1 %v5874_v7  ;;  %v8406_v7 = vld [vmem:[#allocation6 + $0x74c] sm:$0xf] }
  0xde   :  { %v5939_v13 = vld [vmem:[#allocation6 + $0x2e8] sm:$0xf0] }
  0xdf   :  { %2067 = vmatpush.bf16.msrb.mxu2 %v6162_v15  ;;  %v6518_v15 = vor.u32 %v8406_v7, %v6515_v8  ;;  %v8334_v16 = vld [vmem:[#allocation6 + $0x50c] sm:$0xf]  ;;  %v8291_v7 = vld [vmem:[#allocation6 + $0x3ac] sm:$0xf0] }
  0xe0   :  { %2080 = vmatpush.bf16.msrb.mxu3 %v6418_v20  ;;  %2043 = vmatpush.bf16.msrb.mxu0 %v5586_v23  ;;  %v6227_v17 = vld [vmem:[#allocation6 + $0x528] sm:$0xf0]  ;;  %v5942_v20 = vor.u32 %v8262_v11, %v5939_v13 }
  0xe1   :  { %2056 = vmatpush.bf16.msrb.mxu1 %v5842_v24  ;;  %v8190_v23 = vld [vmem:[#allocation6 + $0x8c] sm:$0xf] }
  0xe2   :  { %v5651_v24 = vld [vmem:[#allocation6 + $0xa8] sm:$0xf0] }
  0xe3   :  { %2068 = vmatpush.bf16.msrb.mxu2 %v6130_v30  ;;  %2044 = vmatmul.bf16.vlgmr.msrb.gmra.mxu0 %v9077_v49  ;;  %v8254_v25 = vld [vmem:[#allocation6 + $0x28c] sm:$0xf]  ;;  %v5654_v31 = vor.u32 %v8190_v23, %v5651_v24  ;;  %v8219_v23 = vld [vmem:[#allocation6 + $0x16c] sm:$0xf0] }
  0xe4   :  { %2088 = vmatpush.bf16.msra.mxu0 %v5814_v27  ;;  %2081 = vmatpush.bf16.msrb.mxu3 %v6386_v34  ;;  %v5907_v26 = vld [vmem:[#allocation6 + $0x2a8] sm:$0xf0]  ;;  %v6230_v27 = vor.u32 %v8334_v16, %v6227_v17 }
  0xe5   :  { %2101 = vmatpush.bf16.msra.mxu1 %v6070_v28  ;;  %v6486_v28 = vor.u32 %v8398_v21, %v6483_v22  ;;  %v8326_v29 = vld [vmem:[#allocation6 + $0x4cc] sm:$0xf]  ;;  %v5910_v32 = vor.u32 %v8254_v25, %v5907_v26  ;;  %v5753_v22 = vld [vmem:[#allocation6 + $0x150] sm:$0xf] }
  0xe6   :  { %2057 = vmatmul.bf16.vlgmr.msrb.gmra.mxu1 %v9079_v54  ;;  %v6195_v30 = vld [vmem:[#allocation6 + $0x4e8] sm:$0xf0]  ;;  %v6009_v26 = vld [vmem:[#allocation6 + $0x350] sm:$0xf] }
  0xe7   :  { %2069 = vmatpush.bf16.msrb.mxu2 %v6098_v46  ;;  %v8390_v33 = vld [vmem:[#allocation6 + $0x6cc] sm:$0xf]  ;;  %v6198_v39 = vor.u32 %v8326_v29, %v6195_v30  ;;  %v6297_v29 = vld [vmem:[#allocation6 + $0x590] sm:$0xf] }
  0xe8   :  { %2089 = vmatpush.bf16.msra.mxu0 %v5782_v41  ;;  %2082 = vmatpush.bf16.msrb.mxu3 %v6354_v51  ;;  %v6451_v34 = vld [vmem:[#allocation6 + $0x6e8] sm:$0xf0]  ;;  %v8355_v30 = vld [vmem:[#allocation6 + $0x5ac] sm:$0xf0] }
  0xe9   :  { %2102 = vmatpush.bf16.msra.mxu1 %v6038_v42  ;;  %v8182_v35 = vld [vmem:[#allocation6 + $0x4c] sm:$0xf]  ;;  %v6454_v40 = vor.u32 %v8390_v33, %v6451_v34  ;;  %v8419_v33 = vld [vmem:[#allocation6 + $0x7ac] sm:$0xf0] }
  0xea   :  { %2070 = vmatmul.bf16.vlgmr.msrb.gmra.mxu2 %v9083_v12  ;;  %v5619_v36 = vld [vmem:[#allocation6 + $0x68] sm:$0xf0] }
  0xeb   :  { %2114 = vmatpush.bf16.msra.mxu2 %v6326_v52  ;;  %2083 = vmatmul.bf16.vlgmr.msrb.gmra.mxu3 %v9085_v18  ;;  %v8246_v37 = vld [vmem:[#allocation6 + $0x24c] sm:$0xf]  ;;  %v5622_v44 = vor.u32 %v8182_v35, %v5619_v36  ;;  %v5817_v52 = vld [vmem:[#allocation6 + $0x1d0] sm:$0xf] }
  0xec   :  { %2127 = vmatpush.bf16.msra.mxu3 %v6582_v53  ;;  %2090 = vmatpush.bf16.msra.mxu0 %v5750_v57  ;;  %v5875_v38 = vld [vmem:[#allocation6 + $0x268] sm:$0xf0]  ;;  %v8299_v57 = vld [vmem:[#allocation6 + $0x3ec] sm:$0xf0] }
  0xed   :  { %2103 = vmatpush.bf16.msra.mxu1 %v6006_v58  ;;  %v8318_v41 = vld [vmem:[#allocation6 + $0x48c] sm:$0xf]  ;;  %v5878_v45 = vor.u32 %v8246_v37, %v5875_v38  ;;  %v5721_v35 = vld [vmem:[#allocation6 + $0x110] sm:$0xf]  ;;  %v6298_v37 = vor.u32 %v8355_v30, %v6297_v29  ;;  %v5819_v29 = vld [vmem:[#allocation6 + $0x1f0] sm:$0xf0] }
  0xee   :  { %v6163_v42 = vld [vmem:[#allocation6 + $0x4a8] sm:$0xf0]  ;;  %v8211_v36 = vld [vmem:[#allocation6 + $0x12c] sm:$0xf0]  ;;  %v8295_v30 = vld [vmem:[#allocation6 + $0x3d4] sm:$0xf] }
  0xef   :  { %2115 = vmatpush.bf16.msra.mxu2 %v6294_v1  ;;  %v8382_v43 = vld [vmem:[#allocation6 + $0x68c] sm:$0xf]  ;;  %v6166_v53 = vor.u32 %v8318_v41, %v6163_v42  ;;  %v5818_v1 = vor.u32 %v8235_v55, %v5817_v52  ;;  %v5977_v38 = vld [vmem:[#allocation6 + $0x310] sm:$0xf] }
  0xf0   :  { %2128 = vmatpush.bf16.msra.mxu3 %v6550_v2  ;;  %2091 = vmatpush.bf16.msra.mxu0 %v5718_v5  ;;  %v6419_v46 = vld [vmem:[#allocation6 + $0x6a8] sm:$0xf0]  ;;  %v6074_v2 = vor.u32 %v8299_v57, %v6073_v56  ;;  %v8227_v5 = vld [vmem:[#allocation6 + $0x1ac] sm:$0xf0] }
  0xf1   :  { %2104 = vmatpush.bf16.msra.mxu1 %v5974_v6  ;;  %v8174_v47 = vld [vmem:[#allocation6 + $0xc] sm:$0xf]  ;;  %v6422_v58 = vor.u32 %v8382_v43, %v6419_v46  ;;  %v6041_v6 = vld [vmem:[#allocation6 + $0x390] sm:$0xf]  ;;  %v5786_v16 = vor.u32 %v8227_v5, %v5785_v3  ;;  %v5722_v43 = vor.u32 %v8211_v36, %v5721_v35 }
  0xf2   :  { %v5587_v48 = vld [vmem:[#allocation6 + $0x28] sm:$0xf0]  ;;  %v6042_v17 = vor.u32 %v8291_v7, %v6041_v6  ;;  %v6265_v41 = vld [vmem:[#allocation6 + $0x550] sm:$0xf] }
  0xf3   :  { %2116 = vmatpush.bf16.msra.mxu2 %v6262_v14  ;;  %v8238_v50 = vld [vmem:[#allocation6 + $0x20c] sm:$0xf]  ;;  %v5590_v61 = vor.u32 %v8174_v47, %v5587_v48  ;;  %v6329_v14 = vld [vmem:[#allocation6 + $0x5d0] sm:$0xf] }
  0xf4   :  { %2129 = vmatpush.bf16.msra.mxu3 %v6518_v15  ;;  %2092 = vmatpush.bf16.msra.mxu0 %v5686_v19  ;;  %v5843_v51 = vld [vmem:[#allocation6 + $0x228] sm:$0xf0]  ;;  %v8363_v15 = vld [vmem:[#allocation6 + $0x5ec] sm:$0xf0] }
  0xf5   :  { %2105 = vmatpush.bf16.msra.mxu1 %v5942_v20  ;;  %v8310_v59 = vld [vmem:[#allocation6 + $0x44c] sm:$0xf]  ;;  %v5846_v62 = vor.u32 %v8238_v50, %v5843_v51  ;;  %v6585_v19 = vld [vmem:[#allocation6 + $0x7d0] sm:$0xf]  ;;  %v6330_v25 = vor.u32 %v8363_v15, %v6329_v14 }
  0xf6   :  { %v6131_v60 = vld [vmem:[#allocation6 + $0x468] sm:$0xf0]  ;;  %v8427_v20 = vld [vmem:[#allocation6 + $0x7ec] sm:$0xf0] }
  0xf7   :  { %2117 = vmatpush.bf16.msra.mxu2 %v6230_v27  ;;  %v8374_v63 = vld [vmem:[#allocation6 + $0x64c] sm:$0xf]  ;;  %v6134_v4 = vor.u32 %v8310_v59, %v6131_v60  ;;  %v8283_v27 = vld [vmem:[#allocation6 + $0x36c] sm:$0xf0] }
  0xf8   :  { %2130 = vmatpush.bf16.msra.mxu3 %v6486_v28  ;;  %2093 = vmatpush.bf16.msra.mxu0 %v5654_v31  ;;  %v6387_v0 = vld [vmem:[#allocation6 + $0x668] sm:$0xf0]  ;;  %v6586_v28 = vor.u32 %v8427_v20, %v6585_v19  ;;  %v5754_v31 = vor.u32 %v8219_v23, %v5753_v22  ;;  %v6010_v34 = vor.u32 %v8283_v27, %v6009_v26  ;;  %v8347_v42 = vld [vmem:[#allocation6 + $0x56c] sm:$0xf0] }
  0xf9   :  { %2106 = vmatpush.bf16.msra.mxu1 %v5910_v32  ;;  %v6390_v8 = vor.u32 %v8374_v63, %v6387_v0  ;;  %v8302_v9 = vld [vmem:[#allocation6 + $0x40c] sm:$0xf]  ;;  %v6553_v32 = vld [vmem:[#allocation6 + $0x790] sm:$0xf]  ;;  %v6266_v50 = vor.u32 %v8347_v42, %v6265_v41 }
  0xfa   :  { %v6099_v10 = vld [vmem:[#allocation6 + $0x428] sm:$0xf0]  ;;  %v5689_v47 = vld [vmem:[#allocation6 + $0xd0] sm:$0xf] }
  0xfb   :  { %2118 = vmatpush.bf16.msra.mxu2 %v6198_v39  ;;  %v8366_v11 = vld [vmem:[#allocation6 + $0x60c] sm:$0xf]  ;;  %v6102_v21 = vor.u32 %v8302_v9, %v6099_v10  ;;  %v8275_v39 = vld [vmem:[#allocation6 + $0x32c] sm:$0xf0] }
  0xfc   :  { %2131 = vmatpush.bf16.msra.mxu3 %v6454_v40  ;;  %2094 = vmatpush.bf16.msra.mxu0 %v5622_v44  ;;  %v6355_v13 = vld [vmem:[#allocation6 + $0x628] sm:$0xf0]  ;;  %v6554_v40 = vor.u32 %v8419_v33, %v6553_v32  ;;  %v6521_v44 = vld [vmem:[#allocation6 + $0x750] sm:$0xf]  ;;  %v5978_v46 = vor.u32 %v8275_v39, %v5977_v38  ;;  %v6075_v32 = vld [vmem:[#allocation6 + $0x3f0] sm:$0xf0] }
  0xfd   :  { %2107 = vmatpush.bf16.msra.mxu1 %v5878_v45  ;;  %v6358_v24 = vor.u32 %v8366_v11, %v6355_v13  ;;  %v8411_v45 = vld [vmem:[#allocation6 + $0x76c] sm:$0xf0]  ;;  %v6078_v41 = vor.u32 %v8295_v30, %v6075_v32  ;;  %v6235_v30 = vld [vmem:[#allocation6 + $0x530] sm:$0xf0] }
  0xfe   :  { %v8203_v48 = vld [vmem:[#allocation6 + $0xec] sm:$0xf0]  ;;  %v8399_v32 = vld [vmem:[#allocation6 + $0x714] sm:$0xf] }
  0xff   :  { %2119 = vmatpush.bf16.msra.mxu2 %v6166_v53  ;;  %v5945_v51 = vld [vmem:[#allocation6 + $0x2d0] sm:$0xf]  ;;  %v6522_v53 = vor.u32 %v8411_v45, %v6521_v44  ;;  %v5690_v57 = vor.u32 %v8203_v48, %v5689_v47  ;;  %v8287_v44 = vld [vmem:[#allocation6 + $0x394] sm:$0xf] }
 0x100   :  { %2132 = vmatpush.bf16.msra.mxu3 %v6422_v58  ;;  %2095 = vmatpush.bf16.msra.mxu0 %v5590_v61  ;;  %v8267_v52 = vld [vmem:[#allocation6 + $0x2ec] sm:$0xf0]  ;;  %v6043_v45 = vld [vmem:[#allocation6 + $0x3b0] sm:$0xf0] }
 0x101   :  { %2108 = vmatpush.bf16.msra.mxu1 %v5846_v62  ;;  %v6233_v55 = vld [vmem:[#allocation6 + $0x510] sm:$0xf]  ;;  %v5946_v60 = vor.u32 %v8267_v52, %v5945_v51  ;;  %v8359_v52 = vld [vmem:[#allocation6 + $0x5d4] sm:$0xf] }
 0x102   :  { %v8339_v56 = vld [vmem:[#allocation6 + $0x52c] sm:$0xf0] }
 0x103   :  { %2120 = vmatpush.bf16.msra.mxu2 %v6134_v4  ;;  %2096 = vmatmul.bf16.vlgmr.msra.gmra.mxu0 %v9077_v49  ;;  %v6489_v58 = vld [vmem:[#allocation6 + $0x710] sm:$0xf]  ;;  %v6234_v63 = vor.u32 %v8339_v56, %v6233_v55  ;;  %v8423_v56 = vld [vmem:[#allocation6 + $0x7d4] sm:$0xf] }
 0x104   :  { %2140 = vmatpush.bf16.msrb.mxu0 %v5818_v1  ;;  %2133 = vmatpush.bf16.msra.mxu3 %v6390_v8  ;;  %v8403_v59 = vld [vmem:[#allocation6 + $0x72c] sm:$0xf0] }
 0x105   :  { %2153 = vmatpush.bf16.msrb.mxu1 %v6074_v2  ;;  %v5657_v61 = vld [vmem:[#allocation6 + $0x90] sm:$0xf]  ;;  %v6490_v2 = vor.u32 %v8403_v59, %v6489_v58  ;;  %v6046_v58 = vor.u32 %v8287_v44, %v6043_v45  ;;  %v8391_v44 = vld [vmem:[#allocation6 + $0x6d4] sm:$0xf] }
 0x106   :  { %2109 = vmatmul.bf16.vlgmr.msra.gmra.mxu1 %v9079_v54  ;;  %v8195_v62 = vld [vmem:[#allocation6 + $0xac] sm:$0xf0]  ;;  %v6459_v45 = vld [vmem:[#allocation6 + $0x6f0] sm:$0xf0] }
 0x107   :  { %2121 = vmatpush.bf16.msra.mxu2 %v6102_v21  ;;  %v5913_v0 = vld [vmem:[#allocation6 + $0x290] sm:$0xf]  ;;  %v5658_v5 = vor.u32 %v8195_v62, %v5657_v61  ;;  %v5755_v61 = vld [vmem:[#allocation6 + $0x170] sm:$0xf0] }
 0x108   :  { %2141 = vmatpush.bf16.msrb.mxu0 %v5786_v16  ;;  %2134 = vmatpush.bf16.msra.mxu3 %v6358_v24  ;;  %v8259_v1 = vld [vmem:[#allocation6 + $0x2ac] sm:$0xf0] }
 0x109   :  { %2154 = vmatpush.bf16.msrb.mxu1 %v6042_v17  ;;  %v6201_v3 = vld [vmem:[#allocation6 + $0x4d0] sm:$0xf]  ;;  %v5914_v8 = vor.u32 %v8259_v1, %v5913_v0  ;;  %v8279_v0 = vld [vmem:[#allocation6 + $0x354] sm:$0xf] }
 0x10a   :  { %2122 = vmatmul.bf16.vlgmr.msra.gmra.mxu2 %v9083_v12  ;;  %v8331_v4 = vld [vmem:[#allocation6 + $0x4ec] sm:$0xf0]  ;;  %v6011_v1 = vld [vmem:[#allocation6 + $0x370] sm:$0xf0] }
 0x10b   :  { %2166 = vmatpush.bf16.msrb.mxu2 %v6330_v25  ;;  %2135 = vmatmul.bf16.vlgmr.msra.gmra.mxu3 %v9085_v18  ;;  %v6457_v6 = vld [vmem:[#allocation6 + $0x6d0] sm:$0xf]  ;;  %v6202_v11 = vor.u32 %v8331_v4, %v6201_v3  ;;  %v8351_v3 = vld [vmem:[#allocation6 + $0x594] sm:$0xf] }
 0x10c   :  { %2179 = vmatpush.bf16.msrb.mxu3 %v6586_v28  ;;  %2142 = vmatpush.bf16.msrb.mxu0 %v5754_v31  ;;  %v8395_v7 = vld [vmem:[#allocation6 + $0x6ec] sm:$0xf0]  ;;  %v8231_v28 = vld [vmem:[#allocation6 + $0x1d4] sm:$0xf] }
 0x10d   :  { %2155 = vmatpush.bf16.msrb.mxu1 %v6010_v34  ;;  %v5625_v9 = vld [vmem:[#allocation6 + $0x50] sm:$0xf]  ;;  %v6458_v15 = vor.u32 %v8395_v7, %v6457_v6  ;;  %v5822_v39 = vor.u32 %v8231_v28, %v5819_v29  ;;  %v6299_v4 = vld [vmem:[#allocation6 + $0x5b0] sm:$0xf0] }
 0x10e   :  { %v8187_v10 = vld [vmem:[#allocation6 + $0x6c] sm:$0xf0]  ;;  %v8415_v6 = vld [vmem:[#allocation6 + $0x794] sm:$0xf] }
 0x10f   :  { %2167 = vmatpush.bf16.msrb.mxu2 %v6298_v37  ;;  %v5881_v13 = vld [vmem:[#allocation6 + $0x250] sm:$0xf]  ;;  %v5626_v19 = vor.u32 %v8187_v10, %v5625_v9  ;;  %v6555_v7 = vld [vmem:[#allocation6 + $0x7b0] sm:$0xf0] }
 0x110   :  { %2180 = vmatpush.bf16.msrb.mxu3 %v6554_v40  ;;  %2143 = vmatpush.bf16.msrb.mxu0 %v5722_v43  ;;  %v8251_v14 = vld [vmem:[#allocation6 + $0x26c] sm:$0xf0]  ;;  %v8223_v40 = vld [vmem:[#allocation6 + $0x194] sm:$0xf] }
 0x111   :  { %2156 = vmatpush.bf16.msrb.mxu1 %v5978_v46  ;;  %v6169_v16 = vld [vmem:[#allocation6 + $0x490] sm:$0xf]  ;;  %v5882_v23 = vor.u32 %v8251_v14, %v5881_v13  ;;  %v5787_v43 = vld [vmem:[#allocation6 + $0x1b0] sm:$0xf0] }
 0x112   :  { %v8323_v17 = vld [vmem:[#allocation6 + $0x4ac] sm:$0xf0]  ;;  %v5790_v55 = vor.u32 %v8223_v40, %v5787_v43  ;;  %v8207_v9 = vld [vmem:[#allocation6 + $0x114] sm:$0xf] }
 0x113   :  { %2168 = vmatpush.bf16.msrb.mxu2 %v6266_v50  ;;  %v6425_v20 = vld [vmem:[#allocation6 + $0x690] sm:$0xf]  ;;  %v6170_v27 = vor.u32 %v8323_v17, %v6169_v16  ;;  %v5723_v10 = vld [vmem:[#allocation6 + $0x130] sm:$0xf0] }
 0x114   :  { %2181 = vmatpush.bf16.msrb.mxu3 %v6522_v53  ;;  %2144 = vmatpush.bf16.msrb.mxu0 %v5690_v57  ;;  %v8387_v21 = vld [vmem:[#allocation6 + $0x6ac] sm:$0xf0]  ;;  %v6331_v53 = vld [vmem:[#allocation6 + $0x5f0] sm:$0xf0] }
 0x115   :  { %2157 = vmatpush.bf16.msrb.mxu1 %v5946_v60  ;;  %v5593_v22 = vld [vmem:[#allocation6 + $0x10] sm:$0xf]  ;;  %v6426_v31 = vor.u32 %v8387_v21, %v6425_v20  ;;  %v6587_v57 = vld [vmem:[#allocation6 + $0x7f0] sm:$0xf0] }
 0x116   :  { %v8179_v24 = vld [vmem:[#allocation6 + $0x2c] sm:$0xf0]  ;;  %v8215_v60 = vld [vmem:[#allocation6 + $0x154] sm:$0xf] }
 0x117   :  { %2169 = vmatpush.bf16.msrb.mxu2 %v6234_v63  ;;  %v5849_v25 = vld [vmem:[#allocation6 + $0x210] sm:$0xf]  ;;  %v5594_v35 = vor.u32 %v8179_v24, %v5593_v22  ;;  %v6334_v63 = vor.u32 %v8359_v52, %v6331_v53  ;;  %v8271_v13 = vld [vmem:[#allocation6 + $0x314] sm:$0xf]  ;;  %v6462_v53 = vor.u32 %v8391_v44, %v6459_v45 }
 0x118   :  { %2182 = vmatpush.bf16.msrb.mxu3 %v6490_v2  ;;  %2145 = vmatpush.bf16.msrb.mxu0 %v5658_v5  ;;  %v8243_v26 = vld [vmem:[#allocation6 + $0x22c] sm:$0xf0]  ;;  %v6590_v2 = vor.u32 %v8423_v56, %v6587_v57  ;;  %v5758_v5 = vor.u32 %v8215_v60, %v5755_v61  ;;  %v5979_v14 = vld [vmem:[#allocation6 + $0x330] sm:$0xf0] }
 0x119   :  { %2158 = vmatpush.bf16.msrb.mxu1 %v5914_v8  ;;  %v6137_v33 = vld [vmem:[#allocation6 + $0x450] sm:$0xf]  ;;  %v5850_v38 = vor.u32 %v8243_v26, %v5849_v25  ;;  %v6014_v8 = vor.u32 %v8279_v0, %v6011_v1  ;;  %v8343_v16 = vld [vmem:[#allocation6 + $0x554] sm:$0xf]  ;;  %v5982_v22 = vor.u32 %v8271_v13, %v5979_v14 }
 0x11a   :  { %v8315_v34 = vld [vmem:[#allocation6 + $0x46c] sm:$0xf0]  ;;  %v6267_v17 = vld [vmem:[#allocation6 + $0x570] sm:$0xf0] }
 0x11b   :  { %2170 = vmatpush.bf16.msrb.mxu2 %v6202_v11  ;;  %v6393_v36 = vld [vmem:[#allocation6 + $0x650] sm:$0xf]  ;;  %v6138_v42 = vor.u32 %v8315_v34, %v6137_v33  ;;  %v6302_v11 = vor.u32 %v8351_v3, %v6299_v4  ;;  %v8407_v20 = vld [vmem:[#allocation6 + $0x754] sm:$0xf]  ;;  %v6270_v25 = vor.u32 %v8343_v16, %v6267_v17  ;;  %v8236_v3 = vld [vmem:[#allocation6 + $0x1f4] sm:$0xf0] }
 0x11c   :  { %2183 = vmatpush.bf16.msrb.mxu3 %v6458_v15  ;;  %2146 = vmatpush.bf16.msrb.mxu0 %v5626_v19  ;;  %v8379_v37 = vld [vmem:[#allocation6 + $0x66c] sm:$0xf0]  ;;  %v6558_v15 = vor.u32 %v8415_v6, %v6555_v7  ;;  %v5726_v19 = vor.u32 %v8207_v9, %v5723_v10  ;;  %v6523_v21 = vld [vmem:[#allocation6 + $0x770] sm:$0xf0]  ;;  %v6081_v4 = vld [vmem:[#allocation6 + $0x3d8] sm:$0xf] }
 0x11d   :  { %2159 = vmatpush.bf16.msrb.mxu1 %v5882_v23  ;;  %v6394_v46 = vor.u32 %v8379_v37, %v6393_v36  ;;  %v6105_v47 = vld [vmem:[#allocation6 + $0x410] sm:$0xf]  ;;  %v8199_v23 = vld [vmem:[#allocation6 + $0xd4] sm:$0xf]  ;;  %v6526_v28 = vor.u32 %v8407_v20, %v6523_v21  ;;  %v8300_v6 = vld [vmem:[#allocation6 + $0x3f4] sm:$0xf0] }
 0x11e   :  { %v8307_v48 = vld [vmem:[#allocation6 + $0x42c] sm:$0xf0]  ;;  %v5691_v24 = vld [vmem:[#allocation6 + $0xf0] sm:$0xf0]  ;;  %v6082_v16 = vor.u32 %v8300_v6, %v6081_v4  ;;  %v6049_v20 = vld [vmem:[#allocation6 + $0x398] sm:$0xf] }
 0x11f   :  { %2171 = vmatpush.bf16.msrb.mxu2 %v6170_v27  ;;  %v6361_v50 = vld [vmem:[#allocation6 + $0x610] sm:$0xf]  ;;  %v6106_v59 = vor.u32 %v8307_v48, %v6105_v47  ;;  %v8263_v26 = vld [vmem:[#allocation6 + $0x2d4] sm:$0xf]  ;;  %v8292_v21 = vld [vmem:[#allocation6 + $0x3b4] sm:$0xf0] }
 0x120   :  { %2184 = vmatpush.bf16.msrb.mxu3 %v6426_v31  ;;  %2147 = vmatpush.bf16.msrb.mxu0 %v5594_v35  ;;  %v8371_v51 = vld [vmem:[#allocation6 + $0x62c] sm:$0xf0]  ;;  %v5947_v27 = vld [vmem:[#allocation6 + $0x2f0] sm:$0xf0]  ;;  %v5694_v31 = vor.u32 %v8199_v23, %v5691_v24  ;;  %v5953_v6 = vld [vmem:[#allocation6 + $0x2d8] sm:$0xf] }
 0x121   :  { %2160 = vmatpush.bf16.msrb.mxu1 %v5850_v38  ;;  %v6362_v62 = vor.u32 %v8371_v51, %v6361_v50  ;;  %v8335_v29 = vld [vmem:[#allocation6 + $0x514] sm:$0xf]  ;;  %v5950_v34 = vor.u32 %v8263_v26, %v5947_v27  ;;  %v6337_v27 = vld [vmem:[#allocation6 + $0x5d8] sm:$0xf] }
 0x122   :  { %v6491_v33 = vld [vmem:[#allocation6 + $0x730] sm:$0xf0]  ;;  %v6238_v37 = vor.u32 %v8335_v29, %v6235_v30  ;;  %v6593_v30 = vld [vmem:[#allocation6 + $0x7d8] sm:$0xf] }
 0x123   :  { %2172 = vmatpush.bf16.msrb.mxu2 %v6138_v42  ;;  %2148 = vmatmul.bf16.vlgmr.msrb.gmra.mxu0 %v9077_v49  ;;  %v8191_v35 = vld [vmem:[#allocation6 + $0x94] sm:$0xf]  ;;  %v6494_v40 = vor.u32 %v8399_v32, %v6491_v33  ;;  %v6050_v32 = vor.u32 %v8292_v21, %v6049_v20  ;;  %v5921_v20 = vld [vmem:[#allocation6 + $0x298] sm:$0xf] }
 0x124   :  { %2192 = vmatpush.bf16.msra.mxu0 %v5822_v39  ;;  %2185 = vmatpush.bf16.msrb.mxu3 %v6394_v46  ;;  %v5659_v36 = vld [vmem:[#allocation6 + $0xb0] sm:$0xf0]  ;;  %v8260_v21 = vld [vmem:[#allocation6 + $0x2b4] sm:$0xf0] }
 0x125   :  { %2205 = vmatpush.bf16.msra.mxu1 %v6078_v41  ;;  %v8255_v38 = vld [vmem:[#allocation6 + $0x294] sm:$0xf]  ;;  %v5662_v43 = vor.u32 %v8191_v35, %v5659_v36  ;;  %v8220_v35 = vld [vmem:[#allocation6 + $0x174] sm:$0xf0]  ;;  %v9105_v36 = vld [vmem:[#allocation7] sm:$0xff] }
 0x126   :  { %2161 = vmatmul.bf16.vlgmr.msrb.gmra.mxu1 %v9079_v54  ;;  %v5915_v39 = vld [vmem:[#allocation6 + $0x2b0] sm:$0xf0]  ;;  %v636_v45 = vperm.slane %v9105_v36, 0 }
 0x127   :  { %2173 = vmatpush.bf16.msrb.mxu2 %v6106_v59  ;;  %v8327_v41 = vld [vmem:[#allocation6 + $0x4d4] sm:$0xf]  ;;  %v5918_v46 = vor.u32 %v8255_v38, %v5915_v39  ;;  %v6017_v39 = vld [vmem:[#allocation6 + $0x358] sm:$0xf] }
 0x128   :  { %2193 = vmatpush.bf16.msra.mxu0 %v5790_v55  ;;  %2186 = vmatpush.bf16.msrb.mxu3 %v6362_v62  ;;  %v6203_v42 = vld [vmem:[#allocation6 + $0x4f0] sm:$0xf0] }
 0x129   :  { %2206 = vmatpush.bf16.msra.mxu1 %v6046_v58  ;;  %v8183_v47 = vld [vmem:[#allocation6 + $0x54] sm:$0xf]  ;;  %v6206_v50 = vor.u32 %v8327_v41, %v6203_v42  ;;  %v6305_v42 = vld [vmem:[#allocation6 + $0x598] sm:$0xf] }
 0x12a   :  { %2174 = vmatmul.bf16.vlgmr.msrb.gmra.mxu2 %v9083_v12  ;;  %v5627_v48 = vld [vmem:[#allocation6 + $0x70] sm:$0xf0] }
 0x12b   :  { %2218 = vmatpush.bf16.msra.mxu2 %v6334_v63  ;;  %2187 = vmatmul.bf16.vlgmr.msrb.gmra.mxu3 %v9085_v18  ;;  %v8247_v51 = vld [vmem:[#allocation6 + $0x254] sm:$0xf]  ;;  %v5630_v57 = vor.u32 %v8183_v47, %v5627_v48  ;;  %v8420_v47 = vld [vmem:[#allocation6 + $0x7b4] sm:$0xf0] }
 0x12c   :  { %2231 = vmatpush.bf16.msra.mxu3 %v6590_v2  ;;  %2194 = vmatpush.bf16.msra.mxu0 %v5758_v5  ;;  %v5883_v52 = vld [vmem:[#allocation6 + $0x270] sm:$0xf0]  ;;  %v5825_v2 = vld [vmem:[#allocation6 + $0x1d8] sm:$0xf] }
 0x12d   :  { %2207 = vmatpush.bf16.msra.mxu1 %v6014_v8  ;;  %v8319_v55 = vld [vmem:[#allocation6 + $0x494] sm:$0xf]  ;;  %v5886_v61 = vor.u32 %v8247_v51, %v5883_v52  ;;  %v5826_v14 = vor.u32 %v8236_v3, %v5825_v2  ;;  %v8212_v51 = vld [vmem:[#allocation6 + $0x134] sm:$0xf0] }
 0x12e   :  { %v6171_v56 = vld [vmem:[#allocation6 + $0x4b0] sm:$0xf0]  ;;  %v5697_v2 = vld [vmem:[#allocation6 + $0xd8] sm:$0xf] }
 0x12f   :  { %2219 = vmatpush.bf16.msra.mxu2 %v6302_v11  ;;  %v8383_v58 = vld [vmem:[#allocation6 + $0x694] sm:$0xf]  ;;  %v6174_v1 = vor.u32 %v8319_v55, %v6171_v56  ;;  %v8276_v55 = vld [vmem:[#allocation6 + $0x334] sm:$0xf0] }
 0x130   :  { %2232 = vmatpush.bf16.msra.mxu3 %v6558_v15  ;;  %2195 = vmatpush.bf16.msra.mxu0 %v5726_v19  ;;  %v6427_v59 = vld [vmem:[#allocation6 + $0x6b0] sm:$0xf0]  ;;  %v5793_v15 = vld [vmem:[#allocation6 + $0x198] sm:$0xf] }
 0x131   :  { %2208 = vmatpush.bf16.msra.mxu1 %v5982_v22  ;;  %v8175_v60 = vld [vmem:[#allocation6 + $0x14] sm:$0xf]  ;;  %v6430_v5 = vor.u32 %v8383_v58, %v6427_v59  ;;  %v8228_v19 = vld [vmem:[#allocation6 + $0x1b4] sm:$0xf0] }
 0x132   :  { %v5595_v62 = vld [vmem:[#allocation6 + $0x30] sm:$0xf0]  ;;  %v5794_v29 = vor.u32 %v8228_v19, %v5793_v15  ;;  %v6273_v58 = vld [vmem:[#allocation6 + $0x558] sm:$0xf] }
 0x133   :  { %2220 = vmatpush.bf16.msra.mxu2 %v6270_v25  ;;  %v8239_v63 = vld [vmem:[#allocation6 + $0x214] sm:$0xf]  ;;  %v5598_v9 = vor.u32 %v8175_v60, %v5595_v62  ;;  %v8348_v59 = vld [vmem:[#allocation6 + $0x574] sm:$0xf0] }
 0x134   :  { %2233 = vmatpush.bf16.msra.mxu3 %v6526_v28  ;;  %2196 = vmatpush.bf16.msra.mxu0 %v5694_v31  ;;  %v5851_v0 = vld [vmem:[#allocation6 + $0x230] sm:$0xf0]  ;;  %v8364_v28 = vld [vmem:[#allocation6 + $0x5f4] sm:$0xf0] }
 0x135   :  { %2209 = vmatpush.bf16.msra.mxu1 %v5950_v34  ;;  %v8311_v7 = vld [vmem:[#allocation6 + $0x454] sm:$0xf]  ;;  %v5854_v13 = vor.u32 %v8239_v63, %v5851_v0  ;;  %v8428_v31 = vld [vmem:[#allocation6 + $0x7f4] sm:$0xf0]  ;;  %v6338_v38 = vor.u32 %v8364_v28, %v6337_v27 }
 0x136   :  { %v6139_v8 = vld [vmem:[#allocation6 + $0x470] sm:$0xf0]  ;;  %v5761_v34 = vld [vmem:[#allocation6 + $0x158] sm:$0xf]  ;;  %v6594_v41 = vor.u32 %v8428_v31, %v6593_v30  ;;  %v5922_v30 = vor.u32 %v8260_v21, %v5921_v20 }
 0x137   :  { %2221 = vmatpush.bf16.msra.mxu2 %v6238_v37  ;;  %v8375_v10 = vld [vmem:[#allocation6 + $0x654] sm:$0xf]  ;;  %v6142_v17 = vor.u32 %v8311_v7, %v6139_v8  ;;  %v5762_v44 = vor.u32 %v8220_v35, %v5761_v34  ;;  %v6529_v63 = vld [vmem:[#allocation6 + $0x758] sm:$0xf] }
 0x138   :  { %2234 = vmatpush.bf16.msra.mxu3 %v6494_v40  ;;  %2197 = vmatpush.bf16.msra.mxu0 %v5662_v43  ;;  %v6395_v11 = vld [vmem:[#allocation6 + $0x670] sm:$0xf0]  ;;  %v8284_v40 = vld [vmem:[#allocation6 + $0x374] sm:$0xf0] }
 0x139   :  { %2210 = vmatpush.bf16.msra.mxu1 %v5918_v46  ;;  %v6398_v22 = vor.u32 %v8375_v10, %v6395_v11  ;;  %v8303_v23 = vld [vmem:[#allocation6 + $0x414] sm:$0xf]  ;;  %v8356_v43 = vld [vmem:[#allocation6 + $0x5b4] sm:$0xf0]  ;;  %v6018_v48 = vor.u32 %v8284_v40, %v6017_v39 }
 0x13a   :  { %v6107_v24 = vld [vmem:[#allocation6 + $0x430] sm:$0xf0]  ;;  %v6561_v46 = vld [vmem:[#allocation6 + $0x798] sm:$0xf]  ;;  %v6306_v52 = vor.u32 %v8356_v43, %v6305_v42 }
 0x13b   :  { %2222 = vmatpush.bf16.msra.mxu2 %v6206_v50  ;;  %v8367_v25 = vld [vmem:[#allocation6 + $0x614] sm:$0xf]  ;;  %v6110_v33 = vor.u32 %v8303_v23, %v6107_v24  ;;  %v5729_v50 = vld [vmem:[#allocation6 + $0x118] sm:$0xf] }
 0x13c   :  { %2235 = vmatpush.bf16.msra.mxu3 %v6462_v53  ;;  %2198 = vmatpush.bf16.msra.mxu0 %v5630_v57  ;;  %v6363_v26 = vld [vmem:[#allocation6 + $0x630] sm:$0xf0]  ;;  %v5985_v53 = vld [vmem:[#allocation6 + $0x318] sm:$0xf]  ;;  %v6562_v57 = vor.u32 %v8420_v47, %v6561_v46  ;;  %v5730_v62 = vor.u32 %v8212_v51, %v5729_v50 }
 0x13d   :  { %2211 = vmatpush.bf16.msra.mxu1 %v5886_v61  ;;  %v6366_v37 = vor.u32 %v8367_v25, %v6363_v26  ;;  %v8412_v0 = vld [vmem:[#allocation6 + $0x774] sm:$0xf0] }
 0x13e   :  { %v8204_v3 = vld [vmem:[#allocation6 + $0xf4] sm:$0xf0]  ;;  %v6530_v8 = vor.u32 %v8412_v0, %v6529_v63 }
 0x13f   :  { %2223 = vmatpush.bf16.msra.mxu2 %v6174_v1  ;;  %v1941_v56 = vpop.f32.mrf.mxu0  ;;  %v5986_v1 = vor.u32 %v8276_v55, %v5985_v53  ;;  %v8268_v7 = vld [vmem:[#allocation6 + $0x2f4] sm:$0xf0]  ;;  %v5698_v11 = vor.u32 %v8204_v3, %v5697_v2  ;;  %v5827_v53 = vld [vmem:[#allocation6 + $0x1f8] sm:$0xf0] }
 0x140   :  { %2236 = vmatpush.bf16.msra.mxu3 %v6430_v5  ;;  %2199 = vmatpush.bf16.msra.mxu0 %v5598_v9  ;;  %v1942_v60 = vadd.f32 %v1941_v56, %v636_v45  ;;  %v1954_v61 = vpop.f32.mrf.mxu1  ;;  %v6274_v5 = vor.u32 %v8348_v59, %v6273_v58  ;;  %v6241_v9 = vld [vmem:[#allocation6 + $0x518] sm:$0xf]  ;;  %v5954_v15 = vor.u32 %v8268_v7, %v5953_v6  ;;  %v8296_v55 = vld [vmem:[#allocation6 + $0x3dc] sm:$0xf] }
 0x141   :  { %2212 = vmatpush.bf16.msra.mxu1 %v5854_v13  ;;  %v8340_v10 = vld [vmem:[#allocation6 + $0x534] sm:$0xf0]  ;;  %v6083_v58 = vld [vmem:[#allocation6 + $0x3f8] sm:$0xf0] }
 0x142   :  { %v9112_v4 = vadd.f32 %v1954_v61, %v1942_v60  ;;  %v6497_v13 = vld [vmem:[#allocation6 + $0x718] sm:$0xf]  ;;  %v6242_v19 = vor.u32 %v8340_v10, %v6241_v9  ;;  %v8224_v3 = vld [vmem:[#allocation6 + $0x19c] sm:$0xf] }
 0x143   :  { %2224 = vmatpush.bf16.msra.mxu2 %v6142_v17  ;;  %2200 = vmatmul.bf16.vlgmr.msra.gmra.mxu0 %v9077_v49  ;;  %v8196_v17 = vld [vmem:[#allocation6 + $0xb4] sm:$0xf0]  ;;  %v5795_v7 = vld [vmem:[#allocation6 + $0x1b8] sm:$0xf0] }
 0x144   :  { %2244 = vmatpush.bf16.msrb.mxu0 %v5826_v14  ;;  %2237 = vmatpush.bf16.msra.mxu3 %v6398_v22  ;;  %v8404_v14 = vld [vmem:[#allocation6 + $0x734] sm:$0xf0]  ;;  %v6051_v9 = vld [vmem:[#allocation6 + $0x3b8] sm:$0xf0]  ;;  %v5798_v21 = vor.u32 %v8224_v3, %v5795_v7 }
 0x145   :  { %2257 = vmatpush.bf16.msrb.mxu1 %v6082_v16  ;;  %v5665_v16 = vld [vmem:[#allocation6 + $0x98] sm:$0xf]  ;;  %v6498_v23 = vor.u32 %v8404_v14, %v6497_v13  ;;  %v6243_v7 = vld [vmem:[#allocation6 + $0x538] sm:$0xf0] }
 0x146   :  { %2213 = vmatmul.bf16.vlgmr.msra.gmra.mxu1 %v9079_v54  ;;  %v6209_v24 = vld [vmem:[#allocation6 + $0x4d8] sm:$0xf]  ;;  %v5666_v27 = vor.u32 %v8196_v17, %v5665_v16  ;;  %v8360_v17 = vld [vmem:[#allocation6 + $0x5dc] sm:$0xf] }
 0x147   :  { %2225 = vmatpush.bf16.msra.mxu2 %v6110_v33  ;;  %v1943_v22 = vpop.f32.mrf.mxu0  ;;  %v8332_v25 = vld [vmem:[#allocation6 + $0x4f4] sm:$0xf0] }
 0x148   :  { %2245 = vmatpush.bf16.msrb.mxu0 %v5794_v29  ;;  %2238 = vmatpush.bf16.msra.mxu3 %v6366_v37  ;;  %v1956_v26 = vpop.f32.mrf.mxu1  ;;  %v6465_v28 = vld [vmem:[#allocation6 + $0x6d8] sm:$0xf]  ;;  %v6210_v33 = vor.u32 %v8332_v25, %v6209_v24  ;;  %v8424_v22 = vld [vmem:[#allocation6 + $0x7dc] sm:$0xf] }
 0x149   :  { %2258 = vmatpush.bf16.msrb.mxu1 %v6050_v32  ;;  %v8396_v29 = vld [vmem:[#allocation6 + $0x6f4] sm:$0xf0]  ;;  %v8216_v26 = vld [vmem:[#allocation6 + $0x15c] sm:$0xf] }
 0x14a   :  { %2226 = vmatmul.bf16.vlgmr.msra.gmra.mxu2 %v9083_v12  ;;  %v5633_v31 = vld [vmem:[#allocation6 + $0x58] sm:$0xf]  ;;  %v6466_v37 = vor.u32 %v8396_v29, %v6465_v28 }
 0x14b   :  { %2270 = vmatpush.bf16.msrb.mxu2 %v6338_v38  ;;  %2239 = vmatmul.bf16.vlgmr.msra.gmra.mxu3 %v9085_v18  ;;  %v8188_v32 = vld [vmem:[#allocation6 + $0x74] sm:$0xf0] }
 0x14c   :  { %2283 = vmatpush.bf16.msrb.mxu3 %v6594_v41  ;;  %2246 = vmatpush.bf16.msrb.mxu0 %v5762_v44  ;;  %v5889_v34 = vld [vmem:[#allocation6 + $0x258] sm:$0xf]  ;;  %v5634_v41 = vor.u32 %v8188_v32, %v5633_v31  ;;  %v8280_v31 = vld [vmem:[#allocation6 + $0x35c] sm:$0xf] }
 0x14d   :  { %2259 = vmatpush.bf16.msrb.mxu1 %v6018_v48  ;;  %v8252_v35 = vld [vmem:[#allocation6 + $0x274] sm:$0xf0]  ;;  %v9114_v40 = vpop.f32.mrf.mxu2  ;;  %v6019_v32 = vld [vmem:[#allocation6 + $0x378] sm:$0xf0] }
 0x14e   :  { %v6177_v38 = vld [vmem:[#allocation6 + $0x498] sm:$0xf]  ;;  %v9116_v45 = vpop.f32.mrf.mxu3  ;;  %v5890_v46 = vor.u32 %v8252_v35, %v5889_v34  ;;  %v8352_v35 = vld [vmem:[#allocation6 + $0x59c] sm:$0xf] }
 0x14f   :  { %2271 = vmatpush.bf16.msrb.mxu2 %v6306_v52  ;;  %v8324_v39 = vld [vmem:[#allocation6 + $0x4b4] sm:$0xf0]  ;;  %v8232_v52 = vld [vmem:[#allocation6 + $0x1dc] sm:$0xf]  ;;  %v9118_v56 = vpop.f32.mrf.mxu0 }
 0x150   :  { %2284 = vmatpush.bf16.msrb.mxu3 %v6562_v57  ;;  %2247 = vmatpush.bf16.msrb.mxu0 %v5730_v62  ;;  %v6433_v42 = vld [vmem:[#allocation6 + $0x698] sm:$0xf]  ;;  %v6178_v51 = vor.u32 %v8324_v39, %v6177_v38  ;;  %v9120_v61 = vpop.f32.mrf.mxu1  ;;  %v5830_v2 = vor.u32 %v8232_v52, %v5827_v53  ;;  %v8416_v39 = vld [vmem:[#allocation6 + $0x79c] sm:$0xf] }
 0x151   :  { %2260 = vmatpush.bf16.msrb.mxu1 %v5986_v1  ;;  %v8388_v43 = vld [vmem:[#allocation6 + $0x6b4] sm:$0xf0]  ;;  %v8344_v52 = vld [vmem:[#allocation6 + $0x55c] sm:$0xf] }
 0x152   :  { %v5601_v44 = vld [vmem:[#allocation6 + $0x18] sm:$0xf]  ;;  %v6434_v57 = vor.u32 %v8388_v43, %v6433_v42  ;;  %v6022_v42 = vor.u32 %v8280_v31, %v6019_v32  ;;  %v8208_v43 = vld [vmem:[#allocation6 + $0x11c] sm:$0xf] }
 0x153   :  { %2272 = vmatpush.bf16.msrb.mxu2 %v6274_v5  ;;  %v8180_v47 = vld [vmem:[#allocation6 + $0x34] sm:$0xf0]  ;;  %v6086_v5 = vor.u32 %v8296_v55, %v6083_v58  ;;  %v6275_v53 = vld [vmem:[#allocation6 + $0x578] sm:$0xf0] }
 0x154   :  { %2285 = vmatpush.bf16.msrb.mxu3 %v6530_v8  ;;  %2248 = vmatpush.bf16.msrb.mxu0 %v5698_v11  ;;  %v5857_v48 = vld [vmem:[#allocation6 + $0x218] sm:$0xf]  ;;  %v5602_v62 = vor.u32 %v8180_v47, %v5601_v44  ;;  %v8288_v8 = vld [vmem:[#allocation6 + $0x39c] sm:$0xf] }
 0x155   :  { %2261 = vmatpush.bf16.msrb.mxu1 %v5954_v15  ;;  %v8244_v50 = vld [vmem:[#allocation6 + $0x234] sm:$0xf0]  ;;  %v1969_v15 = vpop.f32.mrf.mxu2  ;;  %v6054_v24 = vor.u32 %v8288_v8, %v6051_v9  ;;  %v5731_v44 = vld [vmem:[#allocation6 + $0x138] sm:$0xf0] }
 0x156   :  { %v6145_v59 = vld [vmem:[#allocation6 + $0x458] sm:$0xf]  ;;  %v5858_v1 = vor.u32 %v8244_v50, %v5857_v48  ;;  %v1982_v20 = vpop.f32.mrf.mxu3  ;;  %v8272_v47 = vld [vmem:[#allocation6 + $0x31c] sm:$0xf] }
 0x157   :  { %2273 = vmatpush.bf16.msrb.mxu2 %v6242_v19  ;;  %v8316_v60 = vld [vmem:[#allocation6 + $0x474] sm:$0xf0]  ;;  %v6339_v19 = vld [vmem:[#allocation6 + $0x5f8] sm:$0xf0]  ;;  %v1995_v28 = vpop.f32.mrf.mxu0 }
 0x158   :  { %2286 = vmatpush.bf16.msrb.mxu3 %v6498_v23  ;;  %2249 = vmatpush.bf16.msrb.mxu0 %v5666_v27  ;;  %v6401_v63 = vld [vmem:[#allocation6 + $0x658] sm:$0xf]  ;;  %v6146_v6 = vor.u32 %v8316_v60, %v6145_v59  ;;  %v6595_v23 = vld [vmem:[#allocation6 + $0x7f8] sm:$0xf0] }
 0x159   :  { %2262 = vmatpush.bf16.msrb.mxu1 %v5922_v30  ;;  %v8380_v0 = vld [vmem:[#allocation6 + $0x674] sm:$0xf0]  ;;  %v5763_v27 = vld [vmem:[#allocation6 + $0x178] sm:$0xf0]  ;;  %v6342_v30 = vor.u32 %v8360_v17, %v6339_v19  ;;  %v6598_v34 = vor.u32 %v8424_v22, %v6595_v23 }
 0x15a   :  { %v6402_v10 = vor.u32 %v8380_v0, %v6401_v63  ;;  %v6113_v11 = vld [vmem:[#allocation6 + $0x418] sm:$0xf]  ;;  %v5766_v38 = vor.u32 %v8216_v26, %v5763_v27  ;;  %v5987_v48 = vld [vmem:[#allocation6 + $0x338] sm:$0xf0]  ;;  %v6278_v0 = vor.u32 %v8344_v52, %v6275_v53 }
 0x15b   :  { %2274 = vmatpush.bf16.msrb.mxu2 %v6210_v33  ;;  %v8308_v13 = vld [vmem:[#allocation6 + $0x434] sm:$0xf0]  ;;  %v2008_v33 = vpop.f32.mrf.mxu1  ;;  %v8408_v58 = vld [vmem:[#allocation6 + $0x75c] sm:$0xf]  ;;  %v5990_v60 = vor.u32 %v8272_v47, %v5987_v48 }
 0x15c   :  { %2287 = vmatpush.bf16.msrb.mxu3 %v6466_v37  ;;  %2250 = vmatpush.bf16.msrb.mxu0 %v5634_v41  ;;  %v6369_v14 = vld [vmem:[#allocation6 + $0x618] sm:$0xf]  ;;  %v6114_v25 = vor.u32 %v8308_v13, %v6113_v11  ;;  %v6307_v37 = vld [vmem:[#allocation6 + $0x5b8] sm:$0xf0] }
 0x15d   :  { %2263 = vmatpush.bf16.msrb.mxu1 %v5890_v46  ;;  %v8372_v16 = vld [vmem:[#allocation6 + $0x634] sm:$0xf0]  ;;  %v6563_v41 = vld [vmem:[#allocation6 + $0x7b8] sm:$0xf0]  ;;  %v6310_v46 = vor.u32 %v8352_v35, %v6307_v37  ;;  %v9124_v50 = vpop.f32.mrf.mxu2 }
 0x15e   :  { %v6370_v29 = vor.u32 %v8372_v16, %v6369_v14  ;;  %v9126_v55 = vpop.f32.mrf.mxu3  ;;  %v6531_v59 = vld [vmem:[#allocation6 + $0x778] sm:$0xf0]  ;;  %v6769_v53 = vld [vmem:[#allocation9 + $0x150] sm:$0xf] }
 0x15f   :  { %2275 = vmatpush.bf16.msrb.mxu2 %v6178_v51  ;;  %v6566_v51 = vor.u32 %v8416_v39, %v6563_v41  ;;  %v5699_v63 = vld [vmem:[#allocation6 + $0xf8] sm:$0xf0] }
 0x160   :  { %2288 = vmatpush.bf16.msrb.mxu3 %v6434_v57  ;;  %2251 = vmatpush.bf16.msrb.mxu0 %v5602_v62  ;;  %v5734_v57 = vor.u32 %v8208_v43, %v5731_v44  ;;  %v8200_v62 = vld [vmem:[#allocation6 + $0xdc] sm:$0xf]  ;;  %v9130_v3 = vpop.f32.mrf.mxu0 }
 0x161   :  { %2264 = vmatpush.bf16.msrb.mxu1 %v5858_v1  ;;  %v8264_v1 = vld [vmem:[#allocation6 + $0x2dc] sm:$0xf]  ;;  %v5702_v9 = vor.u32 %v8200_v62, %v5699_v63 }
 0x162   :  { %v6499_v11 = vld [vmem:[#allocation6 + $0x738] sm:$0xf0] }
 0x163   :  { %2276 = vmatpush.bf16.msrb.mxu2 %v6146_v6  ;;  %2252 = vmatmul.bf16.vlgmr.msrb.gmra.mxu0 %v9077_v49  ;;  %v8336_v6 = vld [vmem:[#allocation6 + $0x51c] sm:$0xf]  ;;  %v9132_v8 = vpop.f32.mrf.mxu1 }
 0x164   :  { %2296 = vmatpush.bf16.msra.mxu0 %v5830_v2  ;;  %2289 = vmatpush.bf16.msrb.mxu3 %v6402_v10  ;;  %v5955_v2 = vld [vmem:[#allocation6 + $0x2f8] sm:$0xf0]  ;;  %v6246_v16 = vor.u32 %v8336_v6, %v6243_v7 }
 0x165   :  { %2309 = vmatpush.bf16.msra.mxu1 %v6086_v5  ;;  %v6534_v5 = vor.u32 %v8408_v58, %v6531_v59  ;;  %v8400_v10 = vld [vmem:[#allocation6 + $0x71c] sm:$0xf]  ;;  %v5958_v13 = vor.u32 %v8264_v1, %v5955_v2  ;;  %v2021_v20 = vpop.f32.mrf.mxu2  ;;  %v6961_v58 = vld [vmem:[#allocation9 + $0x2d0] sm:$0xf] }
 0x166   :  { %2265 = vmatmul.bf16.vlgmr.msrb.gmra.mxu1 %v9079_v54  ;;  %v8192_v14 = vld [vmem:[#allocation6 + $0x9c] sm:$0xf] }
 0x167   :  { %2277 = vmatpush.bf16.msrb.mxu2 %v6114_v25  ;;  %v5667_v15 = vld [vmem:[#allocation6 + $0xb8] sm:$0xf0] }
 0x168   :  { %2297 = vmatpush.bf16.msra.mxu0 %v5798_v21  ;;  %2290 = vmatpush.bf16.msrb.mxu3 %v6370_v29  ;;  %v8256_v17 = vld [vmem:[#allocation6 + $0x29c] sm:$0xf]  ;;  %v6502_v21 = vor.u32 %v8400_v10, %v6499_v11  ;;  %v5670_v25 = vor.u32 %v8192_v14, %v5667_v15  ;;  %v6745_v10 = vld [vmem:[#allocation9 + $0x120] sm:$0xf]  ;;  %v8468_v14 = vld [vmem:[#allocation9 + $0x134] sm:$0xf0] }
 0x169   :  { %2310 = vmatpush.bf16.msra.mxu1 %v6054_v24  ;;  %v5923_v19 = vld [vmem:[#allocation6 + $0x2b8] sm:$0xf0]  ;;  %v2034_v24 = vpop.f32.mrf.mxu3  ;;  %v6937_v15 = vld [vmem:[#allocation9 + $0x2a0] sm:$0xf] }
 0x16a   :  { %2278 = vmatmul.bf16.vlgmr.msrb.gmra.mxu2 %v9083_v12  ;;  %v8328_v22 = vld [vmem:[#allocation6 + $0x4dc] sm:$0xf]  ;;  %v5926_v28 = vor.u32 %v8256_v17, %v5923_v19  ;;  %v8570_v24 = vld [vmem:[#allocation9 + $0x464] sm:$0xf0] }
 0x16b   :  { %2322 = vmatpush.bf16.msra.mxu2 %v6342_v30  ;;  %2291 = vmatmul.bf16.vlgmr.msrb.gmra.mxu3 %v9085_v18  ;;  %v6211_v23 = vld [vmem:[#allocation6 + $0x4f8] sm:$0xf0]  ;;  %v2060_v39 = vpop.f32.mrf.mxu1 }
 0x16c   :  { %2335 = vmatpush.bf16.msra.mxu3 %v6598_v34  ;;  %2298 = vmatpush.bf16.msra.mxu0 %v5766_v38  ;;  %v8392_v26 = vld [vmem:[#allocation6 + $0x6dc] sm:$0xf]  ;;  %v6214_v31 = vor.u32 %v8328_v22, %v6211_v23  ;;  %v2047_v34 = vpop.f32.mrf.mxu0  ;;  %v7153_v23 = vld [vmem:[#allocation9 + $0x450] sm:$0xf] }
 0x16d   :  { %2311 = vmatpush.bf16.msra.mxu1 %v6022_v42  ;;  %v6467_v27 = vld [vmem:[#allocation6 + $0x6f8] sm:$0xf0]  ;;  %v6913_v34 = vld [vmem:[#allocation9 + $0x270] sm:$0xf] }
 0x16e   :  { %v8184_v29 = vld [vmem:[#allocation6 + $0x5c] sm:$0xf]  ;;  %v6470_v35 = vor.u32 %v8392_v26, %v6467_v27  ;;  %v7345_v26 = vld [vmem:[#allocation9 + $0x5d0] sm:$0xf]  ;;  %v8618_v27 = vld [vmem:[#allocation9 + $0x5e4] sm:$0xf0] }
 0x16f   :  { %2323 = vmatpush.bf16.msra.mxu2 %v6310_v46  ;;  %v5635_v30 = vld [vmem:[#allocation6 + $0x78] sm:$0xf0]  ;;  %v7346_v39 = vor.u32 %v8618_v27, %v7345_v26  ;;  %v8492_v26 = vld [vmem:[#allocation9 + $0x1f4] sm:$0xf0] }
 0x170   :  { %2336 = vmatpush.bf16.msra.mxu3 %v6566_v51  ;;  %2299 = vmatpush.bf16.msra.mxu0 %v5734_v57  ;;  %v8248_v32 = vld [vmem:[#allocation6 + $0x25c] sm:$0xf]  ;;  %v5638_v41 = vor.u32 %v8184_v29, %v5635_v30  ;;  %v8474_v57 = vld [vmem:[#allocation9 + $0x164] sm:$0xf0]  ;;  %v6721_v30 = vld [vmem:[#allocation9 + $0xf0] sm:$0xf] }
 0x171   :  { %2312 = vmatpush.bf16.msra.mxu1 %v5990_v60  ;;  %v5891_v33 = vld [vmem:[#allocation6 + $0x278] sm:$0xf0]  ;;  %v8522_v60 = vld [vmem:[#allocation9 + $0x2e4] sm:$0xf0]  ;;  %v9136_v1 = vpop.f32.mrf.mxu3 }
 0x172   :  { %v8320_v37 = vld [vmem:[#allocation6 + $0x49c] sm:$0xf]  ;;  %v5894_v46 = vor.u32 %v8248_v32, %v5891_v33  ;;  %v6962_v11 = vor.u32 %v8522_v60, %v6961_v58  ;;  %v7154_v33 = vor.u32 %v8570_v24, %v7153_v23  ;;  %v7105_v58 = vld [vmem:[#allocation9 + $0x3f0] sm:$0xf]  ;;  %v8444_v23 = vld [vmem:[#allocation9 + $0x74] sm:$0xf0] }
 0x173   :  { %2324 = vmatpush.bf16.msra.mxu2 %v6278_v0  ;;  %v6179_v38 = vld [vmem:[#allocation6 + $0x4b8] sm:$0xf0]  ;;  %v9134_v0 = vpop.f32.mrf.mxu2  ;;  %v639_v24 = vperm.slane %v9105_v36, 3 }
 0x174   :  { %2337 = vmatpush.bf16.msra.mxu3 %v6534_v5  ;;  %2300 = vmatpush.bf16.msra.mxu0 %v5702_v9  ;;  %v8384_v42 = vld [vmem:[#allocation6 + $0x69c] sm:$0xf]  ;;  %v6182_v52 = vor.u32 %v8320_v37, %v6179_v38  ;;  %v6770_v9 = vor.u32 %v8474_v57, %v6769_v53  ;;  %v8504_v53 = vld [vmem:[#allocation9 + $0x254] sm:$0xf0] }
 0x175   :  { %2313 = vmatpush.bf16.msra.mxu1 %v5958_v13  ;;  %v6435_v43 = vld [vmem:[#allocation6 + $0x6b8] sm:$0xf0] }
 0x176   :  { %v8176_v44 = vld [vmem:[#allocation6 + $0x1c] sm:$0xf]  ;;  %v6438_v59 = vor.u32 %v8384_v42, %v6435_v43  ;;  %v8564_v42 = vld [vmem:[#allocation9 + $0x434] sm:$0xf0] }
 0x177   :  { %2325 = vmatpush.bf16.msra.mxu2 %v6246_v16  ;;  %v5603_v47 = vld [vmem:[#allocation6 + $0x38] sm:$0xf0]  ;;  %v8516_v16 = vld [vmem:[#allocation9 + $0x2b4] sm:$0xf0] }
 0x178   :  { %2338 = vmatpush.bf16.msra.mxu3 %v6502_v21  ;;  %2301 = vmatpush.bf16.msra.mxu0 %v5670_v25  ;;  %v8240_v48 = vld [vmem:[#allocation6 + $0x21c] sm:$0xf]  ;;  %v5606_v2 = vor.u32 %v8176_v44, %v5603_v47  ;;  %v6746_v25 = vor.u32 %v8468_v14, %v6745_v10  ;;  %v7321_v44 = vld [vmem:[#allocation9 + $0x5a0] sm:$0xf]  ;;  %v8498_v10 = vld [vmem:[#allocation9 + $0x224] sm:$0xf0] }
 0x179   :  { %2314 = vmatpush.bf16.msra.mxu1 %v5926_v28  ;;  %v5859_v51 = vld [vmem:[#allocation6 + $0x238] sm:$0xf0]  ;;  %v6938_v28 = vor.u32 %v8516_v16, %v6937_v15  ;;  %v2086_v38 = vpop.f32.mrf.mxu3  ;;  %v8552_v15 = vld [vmem:[#allocation9 + $0x3d4] sm:$0xf0] }
 0x17a   :  { %v8312_v62 = vld [vmem:[#allocation6 + $0x45c] sm:$0xf]  ;;  %v5862_v7 = vor.u32 %v8240_v48, %v5859_v51  ;;  %v6697_v48 = vld [vmem:[#allocation9 + $0xc0] sm:$0xf] }
 0x17b   :  { %2326 = vmatpush.bf16.msra.mxu2 %v6214_v31  ;;  %v6147_v63 = vld [vmem:[#allocation6 + $0x478] sm:$0xf0]  ;;  %v8462_v31 = vld [vmem:[#allocation9 + $0x104] sm:$0xf0]  ;;  %v2073_v37 = vpop.f32.mrf.mxu2 }
 0x17c   :  { %2339 = vmatpush.bf16.msra.mxu3 %v6470_v35  ;;  %2302 = vmatpush.bf16.msra.mxu0 %v5638_v41  ;;  %v8376_v5 = vld [vmem:[#allocation6 + $0x65c] sm:$0xf]  ;;  %v6150_v13 = vor.u32 %v8312_v62, %v6147_v63  ;;  %v8510_v35 = vld [vmem:[#allocation9 + $0x284] sm:$0xf0]  ;;  %v7129_v41 = vld [vmem:[#allocation9 + $0x420] sm:$0xf]  ;;  %v6722_v43 = vor.u32 %v8462_v31, %v6721_v30 }
 0x17d   :  { %v6403_v6 = vld [vmem:[#allocation6 + $0x678] sm:$0xf0]  ;;  %2315 = vmatpush.bf16.msra.mxu1 %v5894_v46  ;;  %v8612_v46 = vld [vmem:[#allocation9 + $0x5b4] sm:$0xf0]  ;;  %v6914_v47 = vor.u32 %v8510_v35, %v6913_v34  ;;  %v7130_v51 = vor.u32 %v8564_v42, %v7129_v41  ;;  %v7297_v62 = vld [vmem:[#allocation9 + $0x570] sm:$0xf]  ;;  %v1968_v34 = vadd.f32 %v9114_v40, %v9112_v4 }
 0x17e   :  { %v6406_v17 = vor.u32 %v8376_v5, %v6403_v6  ;;  %v8304_v19 = vld [vmem:[#allocation6 + $0x41c] sm:$0xf]  ;;  %v7322_v57 = vor.u32 %v8612_v46, %v7321_v44  ;;  %v8606_v63 = vld [vmem:[#allocation9 + $0x584] sm:$0xf0]  ;;  %v6673_v5 = vld [vmem:[#allocation9 + $0x90] sm:$0xf] }
 0x17f   :  { %2327 = vmatpush.bf16.msra.mxu2 %v6182_v52  ;;  %v6115_v20 = vld [vmem:[#allocation6 + $0x438] sm:$0xf0]  ;;  %v6889_v52 = vld [vmem:[#allocation9 + $0x240] sm:$0xf]  ;;  %v8450_v6 = vld [vmem:[#allocation9 + $0xa4] sm:$0xf0]  ;;  %v7298_v14 = vor.u32 %v8606_v63, %v7297_v62 }
 0x180   :  { %2340 = vmatpush.bf16.msra.mxu3 %v6438_v59  ;;  %v8368_v21 = vld [vmem:[#allocation6 + $0x61c] sm:$0xf]  ;;  %2303 = vmatpush.bf16.msra.mxu0 %v5606_v2  ;;  %v6118_v29 = vor.u32 %v8304_v19, %v6115_v20  ;;  %v8558_v59 = vld [vmem:[#allocation9 + $0x404] sm:$0xf0]  ;;  %v6890_v2 = vor.u32 %v8504_v53, %v6889_v52  ;;  %v7273_v19 = vld [vmem:[#allocation9 + $0x540] sm:$0xf]  ;;  %v1981_v52 = vadd.f32 %v9116_v45, %v1968_v34 }
 0x181   :  { %v6371_v22 = vld [vmem:[#allocation6 + $0x638] sm:$0xf0]  ;;  %2316 = vmatpush.bf16.msra.mxu1 %v5862_v7  ;;  %v7106_v7 = vor.u32 %v8558_v59, %v7105_v58  ;;  %v638_v20 = vperm.slane %v9105_v36, 2  ;;  %v8546_v30 = vld [vmem:[#allocation9 + $0x3a4] sm:$0xf0] }
 0x182   :  { %v6374_v32 = vor.u32 %v8368_v21, %v6371_v22  ;;  %v6649_v22 = vld [vmem:[#allocation9 + $0x60] sm:$0xf]  ;;  %v8438_v41 = vld [vmem:[#allocation9 + $0x44] sm:$0xf0]  ;;  %v8432_v58 = vld [vmem:[#allocation9 + $0x14] sm:$0xf0] }
 0x183   :  { %2328 = vmatpush.bf16.msra.mxu2 %v6150_v13  ;;  %2304 = vmatmul.bf16.vlgmr.msra.gmra.mxu0 %v9077_v49  ;;  %v8456_v49 = vld [vmem:[#allocation9 + $0xd4] sm:$0xf0]  ;;  %v2097_v13 = vpop.f32.mrf.mxu0  ;;  %v2110_v16 = vpop.f32.mrf.mxu1  ;;  %v6650_v31 = vor.u32 %v8444_v23, %v6649_v22  ;;  %v2046_v37 = vadd.f32 %v9130_v3, %v638_v20  ;;  %v8486_v44 = vld [vmem:[#allocation9 + $0x1c4] sm:$0xf0]  ;;  %v7225_v40 = vld [vmem:[#allocation9 + $0x4e0] sm:$0xf] }
 0x184   :  { %4682 = vmatpush.bf16.msrb.mxu0 %v6770_v9  ;;  %2341 = vmatpush.bf16.msra.mxu3 %v6406_v17  ;;  %v6698_v60 = vor.u32 %v8456_v49, %v6697_v48  ;;  %v6865_v9 = vld [vmem:[#allocation9 + $0x210] sm:$0xf]  ;;  %v6674_v17 = vor.u32 %v8450_v6, %v6673_v5  ;;  %v7033_v48 = vld [vmem:[#allocation9 + $0x360] sm:$0xf]  ;;  %v8540_v49 = vld [vmem:[#allocation9 + $0x374] sm:$0xf0] }
 0x185   :  { %4695 = vmatpush.bf16.msrb.mxu1 %v6962_v11  ;;  %v6866_v21 = vor.u32 %v8498_v10, %v6865_v9  ;;  %v6601_v3 = vld [vmem:[#allocation9] sm:$0xf]  ;;  %v7034_v63 = vor.u32 %v8540_v49, %v7033_v48  ;;  %v8666_v5 = vld [vmem:[#allocation9 + $0x764] sm:$0xf0]  ;;  %v7009_v6 = vld [vmem:[#allocation9 + $0x330] sm:$0xf] }
 0x186   :  { %2317 = vmatmul.bf16.vlgmr.msra.gmra.mxu1 %v9079_v54  ;;  %v637_v54 = vperm.slane %v9105_v36, 1  ;;  %v6793_v59 = vld [vmem:[#allocation9 + $0x180] sm:$0xf]  ;;  %v8534_v10 = vld [vmem:[#allocation9 + $0x344] sm:$0xf0] }
 0x187   :  { %2329 = vmatpush.bf16.msra.mxu2 %v6118_v29  ;;  %v7057_v29 = vld [vmem:[#allocation9 + $0x390] sm:$0xf]  ;;  %v7513_v20 = vld [vmem:[#allocation9 + $0x720] sm:$0xf]  ;;  %v8660_v22 = vld [vmem:[#allocation9 + $0x734] sm:$0xf0] }
 0x188   :  { %4683 = vmatpush.bf16.msrb.mxu0 %v6746_v25  ;;  %2342 = vmatpush.bf16.msra.mxu3 %v6374_v32  ;;  %v1994_v11 = vadd.f32 %v9118_v56, %v637_v54  ;;  %v6841_v25 = vld [vmem:[#allocation9 + $0x1e0] sm:$0xf]  ;;  %v7249_v32 = vld [vmem:[#allocation9 + $0x510] sm:$0xf]  ;;  %v7058_v42 = vor.u32 %v8546_v30, %v7057_v29  ;;  %v2059_v54 = vadd.f32 %v9132_v8, %v2046_v37  ;;  %v8576_v30 = vld [vmem:[#allocation9 + $0x494] sm:$0xf0] }
 0x189   :  { %4696 = vmatpush.bf16.msrb.mxu1 %v6938_v28  ;;  %v6842_v38 = vor.u32 %v8492_v26, %v6841_v25  ;;  %v6985_v23 = vld [vmem:[#allocation9 + $0x300] sm:$0xf]  ;;  %v7514_v34 = vor.u32 %v8660_v22, %v7513_v20  ;;  %v8738_v20 = vld [vmem:[#allocation9 + $0x9a4] sm:$0xf0]  ;;  %v7393_v22 = vld [vmem:[#allocation9 + $0x630] sm:$0xf] }
 0x18a   :  { %2330 = vmatmul.bf16.vlgmr.msra.gmra.mxu2 %v9083_v12  ;;  %v7081_v12 = vld [vmem:[#allocation9 + $0x3c0] sm:$0xf]  ;;  %v2007_v27 = vadd.f32 %v9120_v61, %v1994_v11  ;;  %v2098_v61 = vadd.f32 %v2097_v13, %v639_v24  ;;  %v8714_v11 = vld [vmem:[#allocation9 + $0x8e4] sm:$0xf0]  ;;  %v8528_v24 = vld [vmem:[#allocation9 + $0x314] sm:$0xf0] }
 0x18b   :  { %4708 = vmatpush.bf16.msrb.mxu2 %v7154_v33  ;;  %2343 = vmatmul.bf16.vlgmr.msra.gmra.mxu3 %v9085_v18  ;;  %v8600_v18 = vld [vmem:[#allocation9 + $0x554] sm:$0xf0]  ;;  %v7082_v56 = vor.u32 %v8552_v15, %v7081_v12  ;;  %v8594_v33 = vld [vmem:[#allocation9 + $0x524] sm:$0xf0]  ;;  %v2099_v46 = vpop.f32.mrf.mxu0  ;;  %v7201_v12 = vld [vmem:[#allocation9 + $0x4b0] sm:$0xf] }
 0x18c   :  { %4721 = vmatpush.bf16.msrb.mxu3 %v7346_v39  ;;  %4684 = vmatpush.bf16.msrb.mxu0 %v6722_v43  ;;  %v7274_v28 = vor.u32 %v8600_v18, %v7273_v19  ;;  %v2020_v35 = vadd.f32 %v9124_v50, %v2007_v27  ;;  %v6625_v39 = vld [vmem:[#allocation9 + $0x30] sm:$0xf]  ;;  %v8588_v50 = vld [vmem:[#allocation9 + $0x4f4] sm:$0xf0]  ;;  %v2111_v62 = vadd.f32 %v2110_v16, %v2098_v61  ;;  %v8582_v15 = vld [vmem:[#allocation9 + $0x4c4] sm:$0xf0] }
 0x18d   :  { %4697 = vmatpush.bf16.msrb.mxu1 %v6914_v47  ;;  %v6817_v43 = vld [vmem:[#allocation9 + $0x1b0] sm:$0xf]  ;;  %v7250_v47 = vor.u32 %v8594_v33, %v7249_v32  ;;  %v6626_v4 = vor.u32 %v8438_v41, %v6625_v39  ;;  %v2123_v9 = vpop.f32.mrf.mxu2  ;;  %v7226_v45 = vor.u32 %v8588_v50, %v7225_v40  ;;  %v2348_v16 = vmax.f32 %v1981_v52, 0.0  ;;  %v7177_v26 = vld [vmem:[#allocation9 + $0x480] sm:$0xf] }
 0x18e   :  { %v2033_v53 = vadd.f32 %v9126_v55, %v2020_v35  ;;  %v7729_v55 = vld [vmem:[#allocation9 + $0x8d0] sm:$0xf]  ;;  %v2124_v8 = vadd.f32 %v2123_v9, %v2111_v62  ;;  %v2136_v13 = vpop.f32.mrf.mxu3  ;;  %v7202_v25 = vor.u32 %v8582_v15, %v7201_v12  ;;  %v7705_v27 = vld [vmem:[#allocation9 + $0x8a0] sm:$0xf]  ;;  %v8762_v32 = vld [vmem:[#allocation9 + $0xa64] sm:$0xf0] }
 0x18f   :  { %4709 = vmatpush.bf16.msrb.mxu2 %v7130_v51  ;;  %v2112_v51 = vpop.f32.mrf.mxu1  ;;  %v9156_v33 = vpack.c.bf16 %v2348_v16, %v2348_v16  ;;  %v8654_v39 = vld [vmem:[#allocation9 + $0x704] sm:$0xf0]  ;;  %v7897_v49 = vld [vmem:[#allocation9 + $0xa20] sm:$0xf]  ;;  %v8636_v12 = vld [vmem:[#allocation9 + $0x674] sm:$0xf0] }
 0x190   :  { %4722 = vmatpush.bf16.msrb.mxu3 %v7322_v57  ;;  %4685 = vmatpush.bf16.msrb.mxu0 %v6698_v60  ;;  %v6818_v57 = vor.u32 %v8486_v44, %v6817_v43  ;;  %v8480_v60 = vld [vmem:[#allocation9 + $0x194] sm:$0xf0]  ;;  %v2137_v29 = vadd.f32 %v2136_v13, %v2124_v8  ;;  %v7681_v43 = vld [vmem:[#allocation9 + $0x870] sm:$0xf]  ;;  %v8702_v44 = vld [vmem:[#allocation9 + $0x884] sm:$0xf0] }
 0x191   :  { %4698 = vmatpush.bf16.msrb.mxu1 %v6890_v2  ;;  %v7537_v2 = vld [vmem:[#allocation9 + $0x750] sm:$0xf]  ;;  %v6794_v19 = vor.u32 %v8480_v60, %v6793_v59  ;;  %v8756_v51 = vld [vmem:[#allocation9 + $0xa34] sm:$0xf0]  ;;  %v7682_v40 = vor.u32 %v8702_v44, %v7681_v43  ;;  %v7465_v50 = vld [vmem:[#allocation9 + $0x6c0] sm:$0xf] }
 0x192   :  { %v7538_v18 = vor.u32 %v8666_v5, %v7537_v2  ;;  %v7873_v59 = vld [vmem:[#allocation9 + $0x9f0] sm:$0xf]  ;;  %v8750_v60 = vld [vmem:[#allocation9 + $0xa04] sm:$0xf0]  ;;  %v640_v15 = vperm.slane %v9105_v36, 4 }
 0x193   :  { %4710 = vmatpush.bf16.msrb.mxu2 %v7106_v7  ;;  %v2072_v7 = vadd.f32 %v9134_v0, %v2059_v54  ;;  %v7010_v0 = vor.u32 %v8534_v10, %v7009_v6  ;;  %v8696_v54 = vld [vmem:[#allocation9 + $0x854] sm:$0xf0]  ;;  %v7441_v2 = vld [vmem:[#allocation9 + $0x690] sm:$0xf]  ;;  %v8642_v5 = vld [vmem:[#allocation9 + $0x6a4] sm:$0xf0]  ;;  %v7874_v9 = vor.u32 %v8750_v60, %v7873_v59 }
 0x194   :  { %4723 = vmatpush.bf16.msrb.mxu3 %v7298_v14  ;;  %4686 = vmatpush.bf16.msrb.mxu0 %v6674_v17  ;;  %v6602_v14 = vor.u32 %v8432_v58, %v6601_v3  ;;  %v2349_v17 = vmax.f32 %v2033_v53, 0.0  ;;  %v8648_v3 = vld [vmem:[#allocation9 + $0x6d4] sm:$0xf0]  ;;  %v7657_v53 = vld [vmem:[#allocation9 + $0x840] sm:$0xf]  ;;  %v7442_v8 = vor.u32 %v8642_v5, %v7441_v2 }
 0x195   :  { %4699 = vmatpush.bf16.msrb.mxu1 %v6866_v21  ;;  %v7730_v21 = vor.u32 %v8714_v11, %v7729_v55  ;;  %v2125_v61 = vpop.f32.mrf.mxu2  ;;  %v7466_v62 = vor.u32 %v8648_v3, %v7465_v50  ;;  %v7633_v6 = vld [vmem:[#allocation9 + $0x810] sm:$0xf]  ;;  %v7849_v10 = vld [vmem:[#allocation9 + $0x9c0] sm:$0xf]  ;;  %v8744_v55 = vld [vmem:[#allocation9 + $0x9d4] sm:$0xf0] }
 0x196   :  { %v9158_v35 = vpack.c.bf16 %v2349_v17, %v2349_v17  ;;  %v2138_v48 = vpop.f32.mrf.mxu3  ;;  %v7609_v16 = vld [vmem:[#allocation9 + $0x7e0] sm:$0xf]  ;;  %v8684_v17 = vld [vmem:[#allocation9 + $0x7f4] sm:$0xf0]  ;;  %v8519_v61 = vld [vmem:[#allocation9 + $0x2d4] sm:$0xf] }
 0x197   :  { %4711 = vmatpush.bf16.msrb.mxu2 %v7082_v56  ;;  %v2085_v56 = vadd.f32 %v9136_v1, %v2072_v7  ;;  %v6986_v1 = vor.u32 %v8528_v24, %v6985_v23  ;;  %v8690_v7 = vld [vmem:[#allocation9 + $0x824] sm:$0xf0]  ;;  %v8732_v36 = vld [vmem:[#allocation9 + $0x974] sm:$0xf0]  ;;  %v6963_v44 = vld [vmem:[#allocation9 + $0x2e8] sm:$0xf0] }
 0x198   :  { %4724 = vmatpush.bf16.msrb.mxu3 %v7274_v28  ;;  %4687 = vmatpush.bf16.msrb.mxu0 %v6650_v31  ;;  %v8708_v28 = vld [vmem:[#allocation9 + $0x8b4] sm:$0xf0]  ;;  %v7921_v31 = vld [vmem:[#allocation9 + $0xa50] sm:$0xf]  ;;  %v7634_v13 = vor.u32 %v8690_v7, %v7633_v6  ;;  %v8630_v23 = vld [vmem:[#allocation9 + $0x644] sm:$0xf0] }
 0x199   :  { %4700 = vmatpush.bf16.msrb.mxu1 %v6842_v38  ;;  %v7706_v37 = vor.u32 %v8708_v28, %v7705_v27  ;;  %v7489_v38 = vld [vmem:[#allocation9 + $0x6f0] sm:$0xf]  ;;  %v2350_v41 = vmax.f32 %v2085_v56, 0.0  ;;  %v7922_v46 = vor.u32 %v8762_v32, %v7921_v31  ;;  %v7801_v28 = vld [vmem:[#allocation9 + $0x960] sm:$0xf] }
 0x19a   :  { %v7585_v56 = vld [vmem:[#allocation9 + $0x7b0] sm:$0xf]  ;;  %v7369_v31 = vld [vmem:[#allocation9 + $0x600] sm:$0xf]  ;;  %v8465_v50 = vld [vmem:[#allocation9 + $0x124] sm:$0xf] }
 0x19b   :  { %4712 = vmatpush.bf16.msrb.mxu2 %v7058_v42  ;;  %v7178_v42 = vor.u32 %v8576_v30, %v7177_v26  ;;  %v9162_v52 = vpack.c.bf16 %v2350_v41, %v2350_v41  ;;  %v7394_v30 = vor.u32 %v8630_v23, %v7393_v22  ;;  %v8672_v41 = vld [vmem:[#allocation9 + $0x794] sm:$0xf0]  ;;  %v6747_v3 = vld [vmem:[#allocation9 + $0x138] sm:$0xf0]  ;;  %v8113_v2 = vld [vmem:[#allocation9 + $0xbd0] sm:$0xf] }
 0x19c   :  { %4725 = vmatpush.bf16.msrb.mxu3 %v7250_v47  ;;  %4688 = vmatpush.bf16.msrb.mxu0 %v6626_v4  ;;  %v2351_v47 = vmax.f32 %v2137_v29, 0.0  ;;  %v7490_v4 = vor.u32 %v8654_v39, %v7489_v38  ;;  %v7561_v39 = vld [vmem:[#allocation9 + $0x780] sm:$0xf]  ;;  %v6939_v59 = vld [vmem:[#allocation9 + $0x2b8] sm:$0xf0] }
 0x19d   :  { %4701 = vmatpush.bf16.msrb.mxu1 %v6818_v57  ;;  %v7898_v57 = vor.u32 %v8756_v51, %v7897_v49  ;;  %v8810_v5 = vld [vmem:[#allocation9 + $0xbe4] sm:$0xf0]  ;;  %v7131_v22 = vld [vmem:[#allocation9 + $0x438] sm:$0xf0] }
 0x19e   :  { %v9164_v58 = vpack.c.bf16 %v2351_v47, %v2351_v47  ;;  %v8726_v47 = vld [vmem:[#allocation9 + $0x944] sm:$0xf0]  ;;  %v8114_v7 = vor.u32 %v8810_v5, %v8113_v2  ;;  %v8543_v2 = vld [vmem:[#allocation9 + $0x394] sm:$0xf]  ;;  %v7059_v5 = vld [vmem:[#allocation9 + $0x3a8] sm:$0xf0] }
 0x19f   :  { %4713 = vmatpush.bf16.msrb.mxu2 %v7034_v63  ;;  %v7658_v63 = vor.u32 %v8696_v54, %v7657_v53  ;;  %v6966_v54 = vor.u32 %v8519_v61, %v6963_v44 }
 0x1a0   :  { %4726 = vmatpush.bf16.msrb.mxu3 %v7226_v45  ;;  %4689 = vmatpush.bf16.msrb.mxu0 %v6602_v14  ;;  %v2149_v45 = vpop.f32.mrf.mxu0  ;;  %v7417_v14 = vld [vmem:[#allocation9 + $0x660] sm:$0xf] }
 0x1a1   :  { %4702 = vmatpush.bf16.msrb.mxu1 %v6794_v19  ;;  %v7850_v19 = vor.u32 %v8744_v55, %v7849_v10  ;;  %v2150_v24 = vadd.f32 %v2149_v45, %v640_v15  ;;  %v7155_v45 = vld [vmem:[#allocation9 + $0x468] sm:$0xf0]  ;;  %v6750_v10 = vor.u32 %v8465_v50, %v6747_v3  ;;  %v8459_v55 = vld [vmem:[#allocation9 + $0xf4] sm:$0xf]  ;;  %v8804_v15 = vld [vmem:[#allocation9 + $0xbb4] sm:$0xf0] }
 0x1a2   :  { %v8441_v3 = vld [vmem:[#allocation9 + $0x64] sm:$0xf] }
 0x1a3   :  { %4714 = vmatpush.bf16.msrb.mxu2 %v7010_v0  ;;  %4690 = vmatmul.bf16.vlgmr.msrb.gmra.mxu0 %v9156_v33  ;;  %v2162_v11 = vpop.f32.mrf.mxu1  ;;  %v7418_v0 = vor.u32 %v8636_v12, %v7417_v14  ;;  %v8089_v12 = vld [vmem:[#allocation9 + $0xba0] sm:$0xf] }
 0x1a4   :  { %4734 = vmatpush.bf16.msra.mxu0 %v7538_v18  ;;  %4727 = vmatpush.bf16.msrb.mxu3 %v7202_v25  ;;  %v7825_v18 = vld [vmem:[#allocation9 + $0x990] sm:$0xf]  ;;  %v8678_v25 = vld [vmem:[#allocation9 + $0x7c4] sm:$0xf0]  ;;  %v2163_v38 = vadd.f32 %v2162_v11, %v2150_v24 }
 0x1a5   :  { %4747 = vmatpush.bf16.msra.mxu1 %v7730_v21  ;;  %v7610_v21 = vor.u32 %v8684_v17, %v7609_v16  ;;  %v7826_v26 = vor.u32 %v8738_v20, %v7825_v18  ;;  %v7586_v32 = vor.u32 %v8678_v25, %v7585_v56  ;;  %v8507_v17 = vld [vmem:[#allocation9 + $0x274] sm:$0xf]  ;;  %v8090_v20 = vor.u32 %v8804_v15, %v8089_v12  ;;  %v8453_v56 = vld [vmem:[#allocation9 + $0xc4] sm:$0xf]  ;;  %v6699_v25 = vld [vmem:[#allocation9 + $0xd8] sm:$0xf0] }
 0x1a6   :  { %4703 = vmatmul.bf16.vlgmr.msrb.gmra.mxu1 %v9158_v35  ;;  %v8780_v12 = vld [vmem:[#allocation9 + $0xaf4] sm:$0xf0] }
 0x1a7   :  { %4715 = vmatpush.bf16.msrb.mxu2 %v6986_v1  ;;  %v8471_v1 = vld [vmem:[#allocation9 + $0x154] sm:$0xf] }
 0x1a8   :  { %4735 = vmatpush.bf16.msra.mxu0 %v7514_v34  ;;  %4728 = vmatpush.bf16.msrb.mxu3 %v7178_v42  ;;  %v2151_v27 = vpop.f32.mrf.mxu0  ;;  %v8624_v34 = vld [vmem:[#allocation9 + $0x614] sm:$0xf0]  ;;  %v7802_v42 = vor.u32 %v8732_v36, %v7801_v28  ;;  %v8065_v36 = vld [vmem:[#allocation9 + $0xb70] sm:$0xf] }
 0x1a9   :  { %4748 = vmatpush.bf16.msra.mxu1 %v7706_v37  ;;  %v6771_v37 = vld [vmem:[#allocation9 + $0x168] sm:$0xf0]  ;;  %v7370_v51 = vor.u32 %v8624_v34, %v7369_v31  ;;  %v6891_v27 = vld [vmem:[#allocation9 + $0x258] sm:$0xf0]  ;;  %v8555_v31 = vld [vmem:[#allocation9 + $0x3f4] sm:$0xf]  ;;  %v6702_v34 = vor.u32 %v8453_v56, %v6699_v25 }
 0x1aa   :  { %4716 = vmatmul.bf16.vlgmr.msrb.gmra.mxu2 %v9162_v52  ;;  %v8477_v56 = vld [vmem:[#allocation9 + $0x184] sm:$0xf] }
 0x1ab   :  { %4760 = vmatpush.bf16.msra.mxu2 %v7922_v46  ;;  %4729 = vmatmul.bf16.vlgmr.msrb.gmra.mxu3 %v9164_v58  ;;  %v2164_v29 = vpop.f32.mrf.mxu1  ;;  %v7777_v46 = vld [vmem:[#allocation9 + $0x930] sm:$0xf] }
 0x1ac   :  { %4736 = vmatpush.bf16.msra.mxu0 %v7490_v4  ;;  %v6774_v4 = vor.u32 %v8471_v1, %v6771_v37  ;;  %v7778_v60 = vor.u32 %v8726_v47, %v7777_v46  ;;  %4773 = vmatpush.bf16.msra.mxu3 %v8114_v7  ;;  %v8798_v29 = vld [vmem:[#allocation9 + $0xb84] sm:$0xf0]  ;;  %v8447_v37 = vld [vmem:[#allocation9 + $0x94] sm:$0xf]  ;;  %v8549_v47 = vld [vmem:[#allocation9 + $0x3c4] sm:$0xf] }
 0x1ad   :  { %4749 = vmatpush.bf16.msra.mxu1 %v7682_v40  ;;  %v2175_v43 = vpop.f32.mrf.mxu2  ;;  %v7562_v40 = vor.u32 %v8672_v41, %v7561_v39  ;;  %v8495_v39 = vld [vmem:[#allocation9 + $0x214] sm:$0xf]  ;;  %v6867_v41 = vld [vmem:[#allocation9 + $0x228] sm:$0xf0] }
 0x1ae   :  { %v2176_v48 = vadd.f32 %v2175_v43, %v2163_v38  ;;  %v2188_v49 = vpop.f32.mrf.mxu3  ;;  %v6675_v38 = vld [vmem:[#allocation9 + $0xa8] sm:$0xf0]  ;;  %v8792_v43 = vld [vmem:[#allocation9 + $0xb54] sm:$0xf0]  ;;  %v6870_v50 = vor.u32 %v8495_v39, %v6867_v41  ;;  %v8711_v41 = vld [vmem:[#allocation9 + $0x8d4] sm:$0xf] }
 0x1af   :  { %4761 = vmatpush.bf16.msra.mxu2 %v7898_v57  ;;  %v8513_v57 = vld [vmem:[#allocation9 + $0x2a4] sm:$0xf] }
 0x1b0   :  { %4737 = vmatpush.bf16.msra.mxu0 %v7466_v62  ;;  %v2189_v53 = vadd.f32 %v2188_v49, %v2176_v48  ;;  %v7753_v62 = vld [vmem:[#allocation9 + $0x900] sm:$0xf]  ;;  %4774 = vmatpush.bf16.msra.mxu3 %v8090_v20  ;;  %v7083_v48 = vld [vmem:[#allocation9 + $0x3d8] sm:$0xf0] }
 0x1b1   :  { %4750 = vmatpush.bf16.msra.mxu1 %v7658_v63  ;;  %v8720_v63 = vld [vmem:[#allocation9 + $0x914] sm:$0xf0] }
 0x1b2   :  { %v2352_v6 = vmax.f32 %v2189_v53, 0.0  ;;  %v7754_v14 = vor.u32 %v8720_v63, %v7753_v62  ;;  %v9172_v49 = vld [vmem:[#allocation7] sm:$0xff]  ;;  %v8786_v62 = vld [vmem:[#allocation9 + $0xb24] sm:$0xf0] }
 0x1b3   :  { %4762 = vmatpush.bf16.msra.mxu2 %v7874_v9  ;;  %v8567_v9 = vld [vmem:[#allocation9 + $0x454] sm:$0xf]  ;;  %v6651_v53 = vld [vmem:[#allocation9 + $0x78] sm:$0xf0] }
 0x1b4   :  { %4738 = vmatpush.bf16.msra.mxu0 %v7442_v8  ;;  %v9169_v11 = vpack.c.bf16 %v2352_v6, %v2352_v6  ;;  %v6942_v8 = vor.u32 %v8513_v57, %v6939_v59  ;;  %v7158_v18 = vor.u32 %v8567_v9, %v7155_v45  ;;  %v6843_v57 = vld [vmem:[#allocation9 + $0x1f8] sm:$0xf0]  ;;  %v7086_v59 = vor.u32 %v8549_v47, %v7083_v48  ;;  %v8435_v9 = vld [vmem:[#allocation9 + $0x34] sm:$0xf]  ;;  %v6627_v45 = vld [vmem:[#allocation9 + $0x48] sm:$0xf0] }
 0x1b5   :  { %4751 = vmatpush.bf16.msra.mxu1 %v7634_v13  ;;  %v6723_v13 = vld [vmem:[#allocation9 + $0x108] sm:$0xf0]  ;;  %v2177_v16 = vpop.f32.mrf.mxu2  ;;  %v6654_v6 = vor.u32 %v8441_v3, %v6651_v53  ;;  %v6630_v20 = vor.u32 %v8435_v9, %v6627_v45  ;;  %v7945_v47 = vld [vmem:[#allocation9 + $0xa80] sm:$0xf]  ;;  %v8768_v48 = vld [vmem:[#allocation9 + $0xa94] sm:$0xf0] }
 0x1b6   :  { %v6726_v23 = vor.u32 %v8459_v55, %v6723_v13  ;;  %v7062_v13 = vor.u32 %v8543_v2, %v7059_v5  ;;  %v8615_v3 = vld [vmem:[#allocation9 + $0x5d4] sm:$0xf]  ;;  %v7347_v53 = vld [vmem:[#allocation9 + $0x5e8] sm:$0xf0]  ;;  %v8609_v9 = vld [vmem:[#allocation9 + $0x5a4] sm:$0xf] }
 0x1b7   :  { %4763 = vmatpush.bf16.msra.mxu2 %v7850_v19  ;;  %v6915_v19 = vld [vmem:[#allocation9 + $0x288] sm:$0xf0]  ;;  %v8651_v2 = vld [vmem:[#allocation9 + $0x6f4] sm:$0xf]  ;;  %v7323_v45 = vld [vmem:[#allocation9 + $0x5b8] sm:$0xf0] }
 0x1b8   :  { %4739 = vmatpush.bf16.msra.mxu0 %v7418_v0  ;;  %v2190_v0 = vpop.f32.mrf.mxu3  ;;  %v6918_v24 = vor.u32 %v8507_v17, %v6915_v19  ;;  %v8537_v17 = vld [vmem:[#allocation9 + $0x364] sm:$0xf]  ;;  %v7035_v19 = vld [vmem:[#allocation9 + $0x378] sm:$0xf0]  ;;  %v7491_v5 = vld [vmem:[#allocation9 + $0x708] sm:$0xf0] }
 0x1b9   :  { %4752 = vmatpush.bf16.msra.mxu1 %v7610_v21  ;;  %v8561_v21 = vld [vmem:[#allocation9 + $0x424] sm:$0xf] }
 0x1ba   :  { %v7134_v28 = vor.u32 %v8561_v21, %v7131_v22  ;;  %v8429_v0 = vld [vmem:[#allocation9 + $0x4] sm:$0xf]  ;;  %v6603_v21 = vld [vmem:[#allocation9 + $0x18] sm:$0xf0] }
 0x1bb   :  { %4764 = vmatpush.bf16.msra.mxu2 %v7826_v26  ;;  %v8501_v26 = vld [vmem:[#allocation9 + $0x244] sm:$0xf] }
 0x1bc   :  { %4740 = vmatpush.bf16.msra.mxu0 %v7394_v30  ;;  %v8066_v30 = vor.u32 %v8798_v29, %v8065_v36  ;;  %v6894_v1 = vor.u32 %v8501_v26, %v6891_v27  ;;  %v6795_v26 = vld [vmem:[#allocation9 + $0x198] sm:$0xf0]  ;;  %v7038_v27 = vor.u32 %v8537_v17, %v7035_v19  ;;  %v8774_v36 = vld [vmem:[#allocation9 + $0xac4] sm:$0xf0]  ;;  %v8603_v17 = vld [vmem:[#allocation9 + $0x574] sm:$0xf] }
 0x1bd   :  { %4753 = vmatpush.bf16.msra.mxu1 %v7586_v32  ;;  %v7107_v32 = vld [vmem:[#allocation9 + $0x408] sm:$0xf0]  ;;  %v6798_v39 = vor.u32 %v8477_v56, %v6795_v26  ;;  %v8597_v56 = vld [vmem:[#allocation9 + $0x544] sm:$0xf] }
 0x1be   :  { %4775 = vmatpush.bf16.msra.mxu3 %v8066_v30  ;;  %v7110_v61 = vor.u32 %v8555_v31, %v7107_v32  ;;  %v8531_v31 = vld [vmem:[#allocation9 + $0x334] sm:$0xf]  ;;  %v7011_v32 = vld [vmem:[#allocation9 + $0x348] sm:$0xf0] }
 0x1bf   :  { %4765 = vmatpush.bf16.msra.mxu2 %v7802_v42  ;;  %v8041_v42 = vld [vmem:[#allocation9 + $0xb40] sm:$0xf]  ;;  %v7299_v19 = vld [vmem:[#allocation9 + $0x588] sm:$0xf0] }
 0x1c0   :  { %4741 = vmatpush.bf16.msra.mxu0 %v7370_v51  ;;  %v2201_v44 = vpop.f32.mrf.mxu0  ;;  %v8042_v46 = vor.u32 %v8792_v43, %v8041_v42  ;;  %v641_v51 = vperm.slane %v9172_v49, 5  ;;  %v8657_v42 = vld [vmem:[#allocation9 + $0x724] sm:$0xf] }
 0x1c1   :  { %4754 = vmatpush.bf16.msra.mxu1 %v7562_v40  ;;  %v6678_v40 = vor.u32 %v8447_v37, %v6675_v38  ;;  %v6606_v37 = vor.u32 %v8429_v0, %v6603_v21  ;;  %v8693_v21 = vld [vmem:[#allocation9 + $0x844] sm:$0xf] }
 0x1c2   :  { %4776 = vmatpush.bf16.msra.mxu3 %v8042_v46  ;;  %v2202_v55 = vadd.f32 %v2201_v44, %v641_v51  ;;  %v7515_v44 = vld [vmem:[#allocation9 + $0x738] sm:$0xf0]  ;;  %v7014_v46 = vor.u32 %v8531_v31, %v7011_v32  ;;  %v7946_v51 = vor.u32 %v8768_v48, %v7945_v47  ;;  %v7635_v31 = vld [vmem:[#allocation9 + $0x828] sm:$0xf0]  ;;  %v8633_v32 = vld [vmem:[#allocation9 + $0x664] sm:$0xf] }
 0x1c3   :  { %4766 = vmatpush.bf16.msra.mxu2 %v7778_v60  ;;  %4742 = vmatmul.bf16.vlgmr.msra.gmra.mxu0 %v9169_v11  ;;  %v8017_v60 = vld [vmem:[#allocation9 + $0xb10] sm:$0xf]  ;;  %v8585_v48 = vld [vmem:[#allocation9 + $0x4e4] sm:$0xf] }
 0x1c4   :  { %4786 = vmatpush.bf16.msrb.mxu0 %v6774_v4  ;;  %v2214_v4 = vpop.f32.mrf.mxu1  ;;  %v8018_v63 = vor.u32 %v8786_v62, %v8017_v60  ;;  %v7350_v60 = vor.u32 %v8615_v3, %v7347_v53 }
 0x1c5   :  { %4799 = vmatpush.bf16.msrb.mxu1 %v6966_v54  ;;  %v8489_v54 = vld [vmem:[#allocation9 + $0x1e4] sm:$0xf]  ;;  %v2215_v25 = vadd.f32 %v2214_v4, %v2202_v55  ;;  %v7326_v55 = vor.u32 %v8609_v9, %v7323_v45 }
 0x1c6   :  { %v6846_v7 = vor.u32 %v8489_v54, %v6843_v57  ;;  %4777 = vmatpush.bf16.msra.mxu3 %v8018_v63  ;;  %v8525_v4 = vld [vmem:[#allocation9 + $0x304] sm:$0xf]  ;;  %v7518_v57 = vor.u32 %v8657_v42, %v7515_v44  ;;  %v7707_v63 = vld [vmem:[#allocation9 + $0x8b8] sm:$0xf0]  ;;  %v8627_v44 = vld [vmem:[#allocation9 + $0x634] sm:$0xf] }
 0x1c7   :  { %4767 = vmatpush.bf16.msra.mxu2 %v7754_v14  ;;  %v7993_v14 = vld [vmem:[#allocation9 + $0xae0] sm:$0xf]  ;;  %v8681_v42 = vld [vmem:[#allocation9 + $0x7e4] sm:$0xf] }
 0x1c8   :  { %4787 = vmatpush.bf16.msrb.mxu0 %v6750_v10  ;;  %v8483_v10 = vld [vmem:[#allocation9 + $0x1b4] sm:$0xf]  ;;  %v2203_v15 = vpop.f32.mrf.mxu0  ;;  %v7994_v16 = vor.u32 %v8780_v12, %v7993_v14  ;;  %v7683_v12 = vld [vmem:[#allocation9 + $0x888] sm:$0xf0] }
 0x1c9   :  { %4800 = vmatpush.bf16.msrb.mxu1 %v6942_v8  ;;  %v6819_v8 = vld [vmem:[#allocation9 + $0x1c8] sm:$0xf0]  ;;  %v8699_v14 = vld [vmem:[#allocation9 + $0x874] sm:$0xf]  ;;  %v8645_v15 = vld [vmem:[#allocation9 + $0x6c4] sm:$0xf] }
 0x1ca   :  { %v6822_v22 = vor.u32 %v8483_v10, %v6819_v8  ;;  %4778 = vmatpush.bf16.msra.mxu3 %v7994_v16  ;;  %v7467_v16 = vld [vmem:[#allocation9 + $0x6d8] sm:$0xf0] }
 0x1cb   :  { %4812 = vmatpush.bf16.msrb.mxu2 %v7158_v18  ;;  %v7470_v0 = vor.u32 %v8645_v15, %v7467_v16  ;;  %v8759_v16 = vld [vmem:[#allocation9 + $0xa54] sm:$0xf] }
 0x1cc   :  { %4788 = vmatpush.bf16.msrb.mxu0 %v6726_v23  ;;  %v2216_v18 = vpop.f32.mrf.mxu1  ;;  %v8663_v23 = vld [vmem:[#allocation9 + $0x754] sm:$0xf] }
 0x1cd   :  { %4801 = vmatpush.bf16.msrb.mxu1 %v6918_v24  ;;  %v7539_v24 = vld [vmem:[#allocation9 + $0x768] sm:$0xf0]  ;;  %v2227_v29 = vpop.f32.mrf.mxu2  ;;  %v7302_v18 = vor.u32 %v8603_v17, %v7299_v19  ;;  %v6969_v19 = vld [vmem:[#allocation9 + $0x2d8] sm:$0xf] }
 0x1ce   :  { %v7542_v38 = vor.u32 %v8663_v23, %v7539_v24  ;;  %v8639_v23 = vld [vmem:[#allocation9 + $0x694] sm:$0xf]  ;;  %v7443_v24 = vld [vmem:[#allocation9 + $0x6a8] sm:$0xf0] }
 0x1cf   :  { %4813 = vmatpush.bf16.msrb.mxu2 %v7134_v28  ;;  %v7969_v28 = vld [vmem:[#allocation9 + $0xab0] sm:$0xf]  ;;  %v7923_v17 = vld [vmem:[#allocation9 + $0xa68] sm:$0xf0] }
 0x1d0   :  { %4789 = vmatpush.bf16.msrb.mxu0 %v6702_v34  ;;  %v7970_v30 = vor.u32 %v8774_v36, %v7969_v28  ;;  %v2228_v34 = vadd.f32 %v2227_v29, %v2215_v25  ;;  %v7275_v25 = vld [vmem:[#allocation9 + $0x558] sm:$0xf0]  ;;  %v7446_v29 = vor.u32 %v8639_v23, %v7443_v24  ;;  %v8469_v23 = vld [vmem:[#allocation9 + $0x13c] sm:$0xf0] }
 0x1d1   :  { %4802 = vmatpush.bf16.msrb.mxu1 %v6894_v1  ;;  %v2240_v1 = vpop.f32.mrf.mxu3 }
 0x1d2   :  { %v2241_v43 = vadd.f32 %v2240_v1, %v2228_v34  ;;  %4779 = vmatpush.bf16.msra.mxu3 %v7970_v30  ;;  %v8687_v30 = vld [vmem:[#allocation9 + $0x814] sm:$0xf]  ;;  %v7419_v34 = vld [vmem:[#allocation9 + $0x678] sm:$0xf0]  ;;  %v642_v1 = vperm.slane %v9172_v49, 6 }
 0x1d3   :  { %4814 = vmatpush.bf16.msrb.mxu2 %v7110_v61  ;;  %v7731_v61 = vld [vmem:[#allocation9 + $0x8e8] sm:$0xf0] }
 0x1d4   :  { %4790 = vmatpush.bf16.msrb.mxu0 %v6678_v40  ;;  %v6987_v40 = vld [vmem:[#allocation9 + $0x318] sm:$0xf0]  ;;  %v7734_v54 = vor.u32 %v8711_v41, %v7731_v61  ;;  %v7638_v41 = vor.u32 %v8687_v30, %v7635_v31  ;;  %v7422_v61 = vor.u32 %v8633_v32, %v7419_v34  ;;  %v6945_v31 = vld [vmem:[#allocation9 + $0x2a8] sm:$0xf]  ;;  %v8517_v32 = vld [vmem:[#allocation9 + $0x2bc] sm:$0xf0] }
 0x1d5   :  { %4803 = vmatpush.bf16.msrb.mxu1 %v6870_v50  ;;  %v2353_v50 = vmax.f32 %v2241_v43, 0.0  ;;  %v7611_v43 = vld [vmem:[#allocation9 + $0x7f8] sm:$0xf0] }
 0x1d6   :  { %4780 = vmatpush.bf16.msra.mxu3 %v7946_v51  ;;  %v7227_v51 = vld [vmem:[#allocation9 + $0x4f8] sm:$0xf0]  ;;  %v7614_v3 = vor.u32 %v8681_v42, %v7611_v43  ;;  %v7875_v43 = vld [vmem:[#allocation9 + $0xa08] sm:$0xf0] }
 0x1d7   :  { %4815 = vmatpush.bf16.msrb.mxu2 %v7086_v59  ;;  %v8705_v59 = vld [vmem:[#allocation9 + $0x8a4] sm:$0xf]  ;;  %v9175_v62 = vpack.c.bf16 %v2353_v50, %v2353_v50  ;;  %v7899_v30 = vld [vmem:[#allocation9 + $0xa38] sm:$0xf0] }
 0x1d8   :  { %4791 = vmatpush.bf16.msrb.mxu0 %v6654_v6  ;;  %v6990_v6 = vor.u32 %v8525_v4, %v6987_v40  ;;  %v7710_v8 = vor.u32 %v8705_v59, %v7707_v63  ;;  %v7230_v40 = vor.u32 %v8585_v48, %v7227_v51  ;;  %v8621_v59 = vld [vmem:[#allocation9 + $0x604] sm:$0xf]  ;;  %v6777_v63 = vld [vmem:[#allocation9 + $0x158] sm:$0xf]  ;;  %v8457_v48 = vld [vmem:[#allocation9 + $0xdc] sm:$0xf0] }
 0x1d9   :  { %4804 = vmatpush.bf16.msrb.mxu1 %v6846_v7  ;;  %v2229_v7 = vpop.f32.mrf.mxu2  ;;  %v2242_v10 = vpop.f32.mrf.mxu3 }
 0x1da   :  { %4825 = vmatpush.bf16.msrb.mxu3 %v7350_v60  ;;  %4755 = vmatmul.bf16.vlgmr.msra.gmra.mxu1 %v9175_v62  ;;  %v7371_v60 = vld [vmem:[#allocation9 + $0x618] sm:$0xf0]  ;;  %v7203_v7 = vld [vmem:[#allocation9 + $0x4c8] sm:$0xf0] }
 0x1db   :  { %4816 = vmatpush.bf16.msrb.mxu2 %v7062_v13  ;;  %v7494_v13 = vor.u32 %v8651_v2, %v7491_v5  ;;  %v8475_v5 = vld [vmem:[#allocation9 + $0x16c] sm:$0xf0] }
 0x1dc   :  { %4792 = vmatpush.bf16.msrb.mxu0 %v6630_v20  ;;  %v7686_v20 = vor.u32 %v8699_v14, %v7683_v12  ;;  %v8669_v14 = vld [vmem:[#allocation9 + $0x784] sm:$0xf]  ;;  %v7563_v12 = vld [vmem:[#allocation9 + $0x798] sm:$0xf0]  ;;  %v6778_v15 = vor.u32 %v8475_v5, %v6777_v63 }
 0x1dd   :  { %4805 = vmatpush.bf16.msrb.mxu1 %v6822_v22  ;;  %v7659_v22 = vld [vmem:[#allocation9 + $0x858] sm:$0xf0] }
 0x1de   :  { %4826 = vmatpush.bf16.msrb.mxu3 %v7326_v55  ;;  %v7662_v36 = vor.u32 %v8693_v21, %v7659_v22  ;;  %v7179_v21 = vld [vmem:[#allocation9 + $0x498] sm:$0xf0]  ;;  %v6753_v22 = vld [vmem:[#allocation9 + $0x128] sm:$0xf] }
 0x1df   :  { %4817 = vmatpush.bf16.msrb.mxu2 %v7038_v27  ;;  %v7278_v27 = vor.u32 %v8597_v56, %v7275_v25  ;;  %v7566_v25 = vor.u32 %v8669_v14, %v7563_v12 }
 0x1e0   :  { %4793 = vmatpush.bf16.msrb.mxu0 %v6606_v37  ;;  %v2253_v26 = vpop.f32.mrf.mxu0  ;;  %v8591_v37 = vld [vmem:[#allocation9 + $0x514] sm:$0xf] }
 0x1e1   :  { %4806 = vmatpush.bf16.msrb.mxu1 %v6798_v39  ;;  %v2254_v47 = vadd.f32 %v2253_v26, %v642_v1  ;;  %v7926_v26 = vor.u32 %v8759_v16, %v7923_v17  ;;  %v6729_v1 = vld [vmem:[#allocation9 + $0xf8] sm:$0xf]  ;;  %v7803_v17 = vld [vmem:[#allocation9 + $0x978] sm:$0xf0] }
 0x1e2   :  { %4827 = vmatpush.bf16.msrb.mxu3 %v7302_v18 }
 0x1e3   :  { %4818 = vmatpush.bf16.msrb.mxu2 %v7014_v46  ;;  %4794 = vmatmul.bf16.vlgmr.msrb.gmra.mxu0 %v9156_v33  ;;  %v2266_v28 = vpop.f32.mrf.mxu1  ;;  %v7395_v46 = vld [vmem:[#allocation9 + $0x648] sm:$0xf0] }
 0x1e4   :  { %4838 = vmatpush.bf16.msra.mxu0 %v7542_v38  ;;  %v7251_v38 = vld [vmem:[#allocation9 + $0x528] sm:$0xf0]  ;;  %v7398_v53 = vor.u32 %v8627_v44, %v7395_v46  ;;  %v2267_v2 = vadd.f32 %v2266_v28, %v2254_v47  ;;  %v8753_v28 = vld [vmem:[#allocation9 + $0xa24] sm:$0xf]  ;;  %v6921_v44 = vld [vmem:[#allocation9 + $0x278] sm:$0xf] }
 0x1e5   :  { %4851 = vmatpush.bf16.msra.mxu1 %v7734_v54  ;;  %v7254_v39 = vor.u32 %v8591_v37, %v7251_v38  ;;  %v8675_v54 = vld [vmem:[#allocation9 + $0x7b4] sm:$0xf]  ;;  %v8463_v37 = vld [vmem:[#allocation9 + $0x10c] sm:$0xf0]  ;;  %v6705_v47 = vld [vmem:[#allocation9 + $0xc8] sm:$0xf] }
 0x1e6   :  { %4828 = vmatpush.bf16.msrb.mxu3 %v7278_v27  ;;  %v6730_v42 = vor.u32 %v8463_v37, %v6729_v1  ;;  %v8511_v46 = vld [vmem:[#allocation9 + $0x28c] sm:$0xf0] }
 0x1e7   :  { %4819 = vmatpush.bf16.msrb.mxu2 %v6990_v6  ;;  %v8579_v6 = vld [vmem:[#allocation9 + $0x4b4] sm:$0xf]  ;;  %v8667_v1 = vld [vmem:[#allocation9 + $0x76c] sm:$0xf0] }
 0x1e8   :  { %4839 = vmatpush.bf16.msra.mxu0 %v7518_v57  ;;  %v2255_v4 = vpop.f32.mrf.mxu0  ;;  %v7587_v57 = vld [vmem:[#allocation9 + $0x7c8] sm:$0xf0]  ;;  %v7206_v45 = vor.u32 %v8579_v6, %v7203_v7  ;;  %v8735_v6 = vld [vmem:[#allocation9 + $0x994] sm:$0xf] }
 0x1e9   :  { %4852 = vmatpush.bf16.msra.mxu1 %v7710_v8  ;;  %v7590_v8 = vor.u32 %v8675_v54, %v7587_v57  ;;  %v6922_v4 = vor.u32 %v8511_v46, %v6921_v44  ;;  %v8505_v54 = vld [vmem:[#allocation9 + $0x25c] sm:$0xf0]  ;;  %v6681_v57 = vld [vmem:[#allocation9 + $0x98] sm:$0xf]  ;;  %v6801_v44 = vld [vmem:[#allocation9 + $0x188] sm:$0xf] }
 0x1ea   :  { %4829 = vmatpush.bf16.msrb.mxu3 %v7254_v39  ;;  %4807 = vmatmul.bf16.vlgmr.msrb.gmra.mxu1 %v9158_v35  ;;  %v7902_v39 = vor.u32 %v8753_v28, %v7899_v30  ;;  %v8487_v28 = vld [vmem:[#allocation9 + $0x1cc] sm:$0xf0]  ;;  %v6609_v30 = vld [vmem:[#allocation9 + $0x8] sm:$0xf]  ;;  %v8481_v46 = vld [vmem:[#allocation9 + $0x19c] sm:$0xf0] }
 0x1eb   :  { %v2268_v50 = vpop.f32.mrf.mxu1 }
 0x1ec   :  { %4840 = vmatpush.bf16.msra.mxu0 %v7494_v13  ;;  %v7374_v13 = vor.u32 %v8621_v59, %v7371_v60  ;;  %v6706_v50 = vor.u32 %v8457_v48, %v6705_v47  ;;  %v8451_v59 = vld [vmem:[#allocation9 + $0xac] sm:$0xf0] }
 0x1ed   :  { %4853 = vmatpush.bf16.msra.mxu1 %v7686_v20  ;;  %v2279_v9 = vpop.f32.mrf.mxu2  ;;  %v8523_v20 = vld [vmem:[#allocation9 + $0x2ec] sm:$0xf0]  ;;  %v6682_v7 = vor.u32 %v8451_v59, %v6681_v57  ;;  %v7521_v59 = vld [vmem:[#allocation9 + $0x728] sm:$0xf] }
 0x1ee   :  { %4830 = vmatpush.bf16.msrb.mxu3 %v7230_v40  ;;  %v2280_v10 = vadd.f32 %v2279_v9, %v2267_v2  ;;  %v2292_v55 = vpop.f32.mrf.mxu3  ;;  %v6970_v27 = vor.u32 %v8523_v20, %v6969_v19  ;;  %v8741_v40 = vld [vmem:[#allocation9 + $0x9c4] sm:$0xf]  ;;  %v7827_v9 = vld [vmem:[#allocation9 + $0x9a8] sm:$0xf0]  ;;  %v6849_v19 = vld [vmem:[#allocation9 + $0x1e8] sm:$0xf] }
 0x1ef   :  { %v7830_v14 = vor.u32 %v8735_v6, %v7827_v9  ;;  %v8091_v9 = vld [vmem:[#allocation9 + $0xbb8] sm:$0xf0] }
 0x1f0   :  { %4841 = vmatpush.bf16.msra.mxu0 %v7470_v0  ;;  %v2293_v18 = vadd.f32 %v2292_v55, %v2280_v10  ;;  %v8573_v0 = vld [vmem:[#allocation9 + $0x484] sm:$0xf]  ;;  %v8499_v10 = vld [vmem:[#allocation9 + $0x22c] sm:$0xf0]  ;;  %v643_v55 = vperm.slane %v9172_v49, 7 }
 0x1f1   :  { %4854 = vmatpush.bf16.msra.mxu1 %v7662_v36  ;;  %v7182_v24 = vor.u32 %v8573_v0, %v7179_v21  ;;  %v6633_v0 = vld [vmem:[#allocation9 + $0x38] sm:$0xf]  ;;  %v8439_v21 = vld [vmem:[#allocation9 + $0x4c] sm:$0xf0] }
 0x1f2   :  { %4831 = vmatpush.bf16.msrb.mxu3 %v7206_v45  ;;  %v2354_v56 = vmax.f32 %v2293_v18, 0.0  ;;  %v6873_v45 = vld [vmem:[#allocation9 + $0x218] sm:$0xf]  ;;  %v8493_v18 = vld [vmem:[#allocation9 + $0x1fc] sm:$0xf0] }
 0x1f3   :  { %v6874_v12 = vor.u32 %v8499_v10, %v6873_v45 }
 0x1f4   :  { %4842 = vmatpush.bf16.msra.mxu0 %v7446_v29  ;;  %v9181_v36 = vpack.c.bf16 %v2354_v56, %v2354_v56  ;;  %v6754_v29 = vor.u32 %v8469_v23, %v6753_v22  ;;  %v8723_v56 = vld [vmem:[#allocation9 + $0x934] sm:$0xf] }
 0x1f5   :  { %4855 = vmatpush.bf16.msra.mxu1 %v7638_v41  ;;  %v2281_v34 = vpop.f32.mrf.mxu2  ;;  %v6946_v41 = vor.u32 %v8517_v32, %v6945_v31  ;;  %v8433_v31 = vld [vmem:[#allocation9 + $0x1c] sm:$0xf0] }
 0x1f6   :  { %4832 = vmatpush.bf16.msrb.mxu3 %v7182_v24  ;;  %v2294_v38 = vpop.f32.mrf.mxu3  ;;  %4768 = vmatmul.bf16.vlgmr.msra.gmra.mxu2 %v9181_v36  ;;  %v6850_v24 = vor.u32 %v8493_v18, %v6849_v19  ;;  %v7545_v34 = vld [vmem:[#allocation9 + $0x758] sm:$0xf] }
 0x1f7   :  { %4864 = vmatpush.bf16.msra.mxu2 %v7926_v26  ;;  %v7779_v26 = vld [vmem:[#allocation9 + $0x948] sm:$0xf0]  ;;  %v7546_v48 = vor.u32 %v8667_v1, %v7545_v34 }
 0x1f8   :  { %4843 = vmatpush.bf16.msra.mxu0 %v7422_v61  ;;  %v8747_v61 = vld [vmem:[#allocation9 + $0x9f4] sm:$0xf] }
 0x1f9   :  { %4856 = vmatpush.bf16.msra.mxu1 %v7614_v3  ;;  %v7878_v51 = vor.u32 %v8747_v61, %v7875_v43  ;;  %v7851_v3 = vld [vmem:[#allocation9 + $0x9d8] sm:$0xf0]  ;;  %v8717_v61 = vld [vmem:[#allocation9 + $0x904] sm:$0xf] }
 0x1fa   :  { %v7854_v2 = vor.u32 %v8741_v40, %v7851_v3  ;;  %v7755_v43 = vld [vmem:[#allocation9 + $0x918] sm:$0xf0]  ;;  %v7161_v40 = vld [vmem:[#allocation9 + $0x458] sm:$0xf] }
 0x1fb   :  { %4865 = vmatpush.bf16.msra.mxu2 %v7902_v39  ;;  %v7782_v39 = vor.u32 %v8723_v56, %v7779_v26  ;;  %v7737_v3 = vld [vmem:[#allocation9 + $0x8d8] sm:$0xf]  ;;  %v7758_v57 = vor.u32 %v8717_v61, %v7755_v43  ;;  %v7473_v26 = vld [vmem:[#allocation9 + $0x6c8] sm:$0xf]  ;;  %v8697_v61 = vld [vmem:[#allocation9 + $0x85c] sm:$0xf0] }
 0x1fc   :  { %4844 = vmatpush.bf16.msra.mxu0 %v7398_v53  ;;  %v6897_v53 = vld [vmem:[#allocation9 + $0x248] sm:$0xf]  ;;  %v7689_v56 = vld [vmem:[#allocation9 + $0x878] sm:$0xf]  ;;  %v8643_v43 = vld [vmem:[#allocation9 + $0x6ac] sm:$0xf0] }
 0x1fd   :  { %4857 = vmatpush.bf16.msra.mxu1 %v7590_v8  ;;  %v6898_v5 = vor.u32 %v8505_v54, %v6897_v53  ;;  %v6657_v8 = vld [vmem:[#allocation9 + $0x68] sm:$0xf]  ;;  %v8715_v53 = vld [vmem:[#allocation9 + $0x8ec] sm:$0xf0] }
 0x1fe   :  { %v7738_v10 = vor.u32 %v8715_v53, %v7737_v3  ;;  %v7065_v53 = vld [vmem:[#allocation9 + $0x398] sm:$0xf] }
 0x1ff   :  { %4866 = vmatpush.bf16.msra.mxu2 %v7878_v51  ;;  %v8807_v51 = vld [vmem:[#allocation9 + $0xbd4] sm:$0xf] }
 0x200   :  { %4845 = vmatpush.bf16.msra.mxu0 %v7374_v13  ;;  %v2305_v60 = vpop.f32.mrf.mxu0  ;;  %v8445_v13 = vld [vmem:[#allocation9 + $0x7c] sm:$0xf0] }
 0x201   :  { %4858 = vmatpush.bf16.msra.mxu1 %v7566_v25  ;;  %v6658_v16 = vor.u32 %v8445_v13, %v6657_v8  ;;  %v2306_v20 = vadd.f32 %v2305_v60, %v643_v55  ;;  %v6634_v25 = vor.u32 %v8439_v21, %v6633_v0  ;;  %v8661_v60 = vld [vmem:[#allocation9 + $0x73c] sm:$0xf0]  ;;  %v7137_v8 = vld [vmem:[#allocation9 + $0x428] sm:$0xf]  ;;  %v8795_v0 = vld [vmem:[#allocation9 + $0xb74] sm:$0xf] }
 0x202   :  { %v7522_v55 = vor.u32 %v8661_v60, %v7521_v59  ;;  %v8565_v13 = vld [vmem:[#allocation9 + $0x43c] sm:$0xf0]  ;;  %v8067_v21 = vld [vmem:[#allocation9 + $0xb88] sm:$0xf0]  ;;  %v8691_v59 = vld [vmem:[#allocation9 + $0x82c] sm:$0xf0] }
 0x203   :  { %4846 = vmatmul.bf16.vlgmr.msra.gmra.mxu0 %v9169_v11  ;;  %v2318_v63 = vpop.f32.mrf.mxu1  ;;  %4867 = vmatpush.bf16.msra.mxu2 %v7854_v2  ;;  %v7138_v18 = vor.u32 %v8565_v13, %v7137_v8  ;;  %v7425_v60 = vld [vmem:[#allocation9 + $0x668] sm:$0xf]  ;;  %v8541_v8 = vld [vmem:[#allocation9 + $0x37c] sm:$0xf0] }
 0x204   :  { %4890 = vmatpush.bf16.msrb.mxu0 %v6778_v15  ;;  %4859 = vmatmul.bf16.vlgmr.msra.gmra.mxu1 %v9175_v62  ;;  %v8729_v15 = vld [vmem:[#allocation9 + $0x964] sm:$0xf]  ;;  %v7617_v13 = vld [vmem:[#allocation9 + $0x7e8] sm:$0xf] }
 0x205   :  { %4903 = vmatpush.bf16.msrb.mxu1 %v6970_v27  ;;  %v7806_v49 = vor.u32 %v8729_v15, %v7803_v17  ;;  %v6825_v27 = vld [vmem:[#allocation9 + $0x1b8] sm:$0xf]  ;;  %v8709_v15 = vld [vmem:[#allocation9 + $0x8bc] sm:$0xf0]  ;;  %v8655_v17 = vld [vmem:[#allocation9 + $0x70c] sm:$0xf0] }
 0x206   :  { %4820 = vmatmul.bf16.vlgmr.msrb.gmra.mxu2 %v9162_v52 }
 0x207   :  { %4868 = vmatpush.bf16.msra.mxu2 %v7830_v14  ;;  %v7713_v14 = vld [vmem:[#allocation9 + $0x8a8] sm:$0xf] }
 0x208   :  { %4891 = vmatpush.bf16.msrb.mxu0 %v6754_v29  ;;  %v2307_v22 = vpop.f32.mrf.mxu0  ;;  %v2319_v29 = vadd.f32 %v2318_v63, %v2306_v20  ;;  %v6802_v63 = vor.u32 %v8481_v46, %v6801_v44  ;;  %v9192_v20 = vld [vmem:[#allocation10] sm:$0x3f] }
 0x209   :  { %4904 = vmatpush.bf16.msrb.mxu1 %v6946_v41  ;;  %v6826_v41 = vor.u32 %v8487_v28, %v6825_v27  ;;  %v7714_v22 = vor.u32 %v8709_v15, %v7713_v14  ;;  %v8649_v27 = vld [vmem:[#allocation9 + $0x6dc] sm:$0xf0]  ;;  %v2750_v28 = vperm.slane %v9192_v20, 0  ;;  %v7401_v15 = vld [vmem:[#allocation9 + $0x638] sm:$0xf] }
 0x20a   :  { %v7474_v1 = vor.u32 %v8649_v27, %v7473_v26  ;;  %v8679_v26 = vld [vmem:[#allocation9 + $0x7cc] sm:$0xf0]  ;;  %v7377_v27 = vld [vmem:[#allocation9 + $0x608] sm:$0xf] }
 0x20b   :  { %v2320_v23 = vpop.f32.mrf.mxu1  ;;  %4869 = vmatpush.bf16.msra.mxu2 %v7806_v49  ;;  %v7113_v49 = vld [vmem:[#allocation9 + $0x3f8] sm:$0xf] }
 0x20c   :  { %4892 = vmatpush.bf16.msrb.mxu0 %v6730_v42  ;;  %v6610_v42 = vor.u32 %v8433_v31, %v6609_v30  ;;  %v8789_v31 = vld [vmem:[#allocation9 + $0xb44] sm:$0xf] }
 0x20d   :  { %4905 = vmatpush.bf16.msrb.mxu1 %v6922_v4  ;;  %v2331_v32 = vpop.f32.mrf.mxu2  ;;  %v8115_v4 = vld [vmem:[#allocation9 + $0xbe8] sm:$0xf0] }
 0x20e   :  { %v2332_v37 = vadd.f32 %v2331_v32, %v2319_v29  ;;  %v2344_v38 = vpop.f32.mrf.mxu3  ;;  %v8070_v29 = vor.u32 %v8795_v0, %v8067_v21  ;;  %v8043_v32 = vld [vmem:[#allocation9 + $0xb58] sm:$0xf0]  ;;  %v8771_v0 = vld [vmem:[#allocation9 + $0xab4] sm:$0xf]  ;;  %v7971_v21 = vld [vmem:[#allocation9 + $0xac8] sm:$0xf0] }
 0x20f   :  { %4870 = vmatpush.bf16.msra.mxu2 %v7782_v39  ;;  %v7665_v39 = vld [vmem:[#allocation9 + $0x848] sm:$0xf] }
 0x210   :  { %4893 = vmatpush.bf16.msrb.mxu0 %v6706_v50  ;;  %v2345_v47 = vadd.f32 %v2344_v38, %v2332_v37  ;;  %v8571_v50 = vld [vmem:[#allocation9 + $0x46c] sm:$0xf0]  ;;  %v7089_v37 = vld [vmem:[#allocation9 + $0x3c8] sm:$0xf]  ;;  %v8553_v38 = vld [vmem:[#allocation9 + $0x3dc] sm:$0xf0] }
 0x211   :  { %4906 = vmatpush.bf16.msrb.mxu1 %v6898_v5  ;;  %v8118_v5 = vor.u32 %v8807_v51, %v8115_v4  ;;  %v7162_v6 = vor.u32 %v8571_v50, %v7161_v40  ;;  %v8783_v51 = vld [vmem:[#allocation9 + $0xb14] sm:$0xf]  ;;  %v8019_v4 = vld [vmem:[#allocation9 + $0xb28] sm:$0xf0]  ;;  %v7666_v50 = vor.u32 %v8697_v61, %v7665_v39 }
 0x212   :  { %v2355_v54 = vmax.f32 %v2345_v47, 0.0  ;;  %v8046_v47 = vor.u32 %v8789_v31, %v8043_v32  ;;  %v8472_v31 = vld [vmem:[#allocation9 + $0x15c] sm:$0xf]  ;;  %v6779_v32 = vld [vmem:[#allocation9 + $0x170] sm:$0xf0] }
 0x213   :  { %4871 = vmatpush.bf16.msra.mxu2 %v7758_v57  ;;  %v7641_v57 = vld [vmem:[#allocation9 + $0x818] sm:$0xf] }
 0x214   :  { %4894 = vmatpush.bf16.msrb.mxu0 %v6682_v7  ;;  %v9188_v2 = vpack.c.bf16 %v2355_v54, %v2355_v54  ;;  %v8801_v7 = vld [vmem:[#allocation9 + $0xba4] sm:$0xf]  ;;  %v8547_v54 = vld [vmem:[#allocation9 + $0x3ac] sm:$0xf0] }
 0x215   :  { %4907 = vmatpush.bf16.msrb.mxu1 %v6874_v12  ;;  %v2333_v45 = vpop.f32.mrf.mxu2  ;;  %v8094_v19 = vor.u32 %v8801_v7, %v8091_v9  ;;  %v8777_v7 = vld [vmem:[#allocation9 + $0xae4] sm:$0xf]  ;;  %v7995_v9 = vld [vmem:[#allocation9 + $0xaf8] sm:$0xf0] }
 0x216   :  { %v2346_v12 = vpop.f32.mrf.mxu3  ;;  %4781 = vmatmul.bf16.vlgmr.msra.gmra.mxu3 %v9188_v2  ;;  %4872 = vmatmul.bf16.vlgmr.msra.gmra.mxu2 %v9181_v36  ;;  %v7642_v45 = vor.u32 %v8691_v59, %v7641_v57  ;;  %v8466_v57 = vld [vmem:[#allocation9 + $0x12c] sm:$0xf]  ;;  %v6755_v59 = vld [vmem:[#allocation9 + $0x140] sm:$0xf0] }
 0x217   :  { %4877 = vmatpush.bf16.msra.mxu3 %v8118_v5  ;;  %4916 = vmatpush.bf16.msrb.mxu2 %v7162_v6  ;;  %v8022_v5 = vor.u32 %v8783_v51, %v8019_v4  ;;  %v7066_v6 = vor.u32 %v8547_v54, %v7065_v53  ;;  %v8685_v12 = vld [vmem:[#allocation9 + $0x7fc] sm:$0xf0]  ;;  %v8619_v51 = vld [vmem:[#allocation9 + $0x5ec] sm:$0xf0]  ;;  %v7929_v4 = vld [vmem:[#allocation9 + $0xa58] sm:$0xf] }
 0x218   :  { %4895 = vmatpush.bf16.msrb.mxu0 %v6658_v16  ;;  %v7497_v16 = vld [vmem:[#allocation9 + $0x6f8] sm:$0xf]  ;;  %v6971_v54 = vld [vmem:[#allocation9 + $0x2f0] sm:$0xf0] }
 0x219   :  { %4908 = vmatpush.bf16.msrb.mxu1 %v6850_v24  ;;  %v7498_v23 = vor.u32 %v8655_v17, %v7497_v16  ;;  %v8559_v24 = vld [vmem:[#allocation9 + $0x40c] sm:$0xf0] }
 0x21a   :  { %v7114_v30 = vor.u32 %v8559_v24, %v7113_v49  ;;  %v8631_v16 = vld [vmem:[#allocation9 + $0x64c] sm:$0xf0]  ;;  %v7017_v49 = vld [vmem:[#allocation9 + $0x338] sm:$0xf] }
 0x21b   :  { %4878 = vmatpush.bf16.msra.mxu3 %v8094_v19  ;;  %4917 = vmatpush.bf16.msrb.mxu2 %v7138_v18  ;;  %v7998_v19 = vor.u32 %v8777_v7, %v7995_v9  ;;  %v8535_v24 = vld [vmem:[#allocation9 + $0x34c] sm:$0xf0]  ;;  %v7329_v7 = vld [vmem:[#allocation9 + $0x5a8] sm:$0xf]  ;;  %v8613_v9 = vld [vmem:[#allocation9 + $0x5bc] sm:$0xf0] }
 0x21c   :  { %4896 = vmatpush.bf16.msrb.mxu0 %v6634_v25  ;;  %v8703_v25 = vld [vmem:[#allocation9 + $0x88c] sm:$0xf0] }
 0x21d   :  { %4909 = vmatpush.bf16.msrb.mxu1 %v6826_v41  ;;  %v7690_v34 = vor.u32 %v8703_v25, %v7689_v56  ;;  %v7593_v56 = vld [vmem:[#allocation9 + $0x7b8] sm:$0xf] }
 0x21f   :  { %4879 = vmatpush.bf16.msra.mxu3 %v8070_v29  ;;  %4918 = vmatpush.bf16.msrb.mxu2 %v7114_v30 }
 0x220   :  { %4897 = vmatpush.bf16.msrb.mxu0 %v6610_v42  ;;  %v4691_v41 = vpop.f32.mrf.mxu0  ;;  %v7449_v42 = vld [vmem:[#allocation9 + $0x698] sm:$0xf] }
 0x221   :  { %4910 = vmatpush.bf16.msrb.mxu1 %v6802_v63  ;;  %v4692_v44 = vadd.f32 %v4691_v41, %v2750_v28  ;;  %v7450_v3 = vor.u32 %v8643_v43, %v7449_v42  ;;  %v8637_v63 = vld [vmem:[#allocation9 + $0x67c] sm:$0xf0]  ;;  %v7594_v41 = vor.u32 %v8679_v26, %v7593_v56  ;;  %v6993_v42 = vld [vmem:[#allocation9 + $0x308] sm:$0xf]  ;;  %v6923_v56 = vld [vmem:[#allocation9 + $0x290] sm:$0xf0] }
 0x222   :  { %v8625_v28 = vld [vmem:[#allocation9 + $0x61c] sm:$0xf0]  ;;  %v6707_v26 = vld [vmem:[#allocation9 + $0xe0] sm:$0xf0] }
 0x223   :  { %4898 = vmatmul.bf16.vlgmr.msrb.gmra.mxu0 %v9156_v33  ;;  %v4704_v46 = vpop.f32.mrf.mxu1  ;;  %4880 = vmatpush.bf16.msra.mxu3 %v8046_v47  ;;  %v7378_v61 = vor.u32 %v8625_v28, %v7377_v27  ;;  %v8529_v43 = vld [vmem:[#allocation9 + $0x31c] sm:$0xf0] }
 0x224   :  { %4942 = vmatpush.bf16.msra.mxu0 %v7546_v48  ;;  %4911 = vmatmul.bf16.vlgmr.msrb.gmra.mxu1 %v9158_v35  ;;  %v7090_v48 = vor.u32 %v8553_v38, %v7089_v37  ;;  %v4705_v40 = vadd.f32 %v4704_v46, %v4692_v44  ;;  %v8765_v37 = vld [vmem:[#allocation9 + $0xa84] sm:$0xf]  ;;  %v7947_v38 = vld [vmem:[#allocation9 + $0xa98] sm:$0xf0]  ;;  %v7569_v44 = vld [vmem:[#allocation9 + $0x788] sm:$0xf]  ;;  %v6782_v46 = vor.u32 %v8472_v31, %v6779_v32 }
 0x225   :  { %4955 = vmatpush.bf16.msra.mxu1 %v7738_v10  ;;  %v7426_v10 = vor.u32 %v8637_v63, %v7425_v60  ;;  %v8673_v47 = vld [vmem:[#allocation9 + $0x79c] sm:$0xf0]  ;;  %v6994_v53 = vor.u32 %v8529_v43, %v6993_v42  ;;  %v6683_v42 = vld [vmem:[#allocation9 + $0xb0] sm:$0xf0] }
 0x226   :  { %4919 = vmatpush.bf16.msrb.mxu2 %v7090_v48  ;;  %4833 = vmatmul.bf16.vlgmr.msrb.gmra.mxu3 %v9164_v58  ;;  %v7353_v48 = vld [vmem:[#allocation9 + $0x5d8] sm:$0xf]  ;;  %v7570_v60 = vor.u32 %v8673_v47, %v7569_v44 }
 0x227   :  { %4881 = vmatpush.bf16.msra.mxu3 %v8022_v5  ;;  %v7354_v5 = vor.u32 %v8619_v51, %v7353_v48  ;;  %v7257_v47 = vld [vmem:[#allocation9 + $0x518] sm:$0xf]  ;;  %v8595_v48 = vld [vmem:[#allocation9 + $0x52c] sm:$0xf0] }
 0x228   :  { %4943 = vmatpush.bf16.msra.mxu0 %v7522_v55  ;;  %v7041_v55 = vld [vmem:[#allocation9 + $0x368] sm:$0xf]  ;;  %v4693_v14 = vpop.f32.mrf.mxu0 }
 0x229   :  { %4956 = vmatpush.bf16.msra.mxu1 %v7714_v22  ;;  %v7042_v18 = vor.u32 %v8541_v8, %v7041_v55  ;;  %v7618_v22 = vor.u32 %v8685_v12, %v7617_v13  ;;  %v6758_v55 = vor.u32 %v8466_v57, %v6755_v59  ;;  %v7905_v8 = vld [vmem:[#allocation9 + $0xa28] sm:$0xf]  ;;  %v8757_v13 = vld [vmem:[#allocation9 + $0xa3c] sm:$0xf0]  ;;  %v8514_v14 = vld [vmem:[#allocation9 + $0x2ac] sm:$0xf] }
 0x22a   :  { %4920 = vmatpush.bf16.msrb.mxu2 %v7066_v6  ;;  %v6947_v12 = vld [vmem:[#allocation9 + $0x2c0] sm:$0xf0] }
 0x22b   :  { %v4706_v17 = vpop.f32.mrf.mxu1  ;;  %4882 = vmatpush.bf16.msra.mxu3 %v7998_v19  ;;  %v7906_v19 = vor.u32 %v8757_v13, %v7905_v8  ;;  %v6659_v57 = vld [vmem:[#allocation9 + $0x80] sm:$0xf0]  ;;  %v8436_v8 = vld [vmem:[#allocation9 + $0x3c] sm:$0xf]  ;;  %v6635_v13 = vld [vmem:[#allocation9 + $0x50] sm:$0xf0] }
 0x22c   :  { %4944 = vmatpush.bf16.msra.mxu0 %v7498_v23  ;;  %v7402_v23 = vor.u32 %v8631_v16, %v7401_v15  ;;  %v8460_v15 = vld [vmem:[#allocation9 + $0xfc] sm:$0xf]  ;;  %v6731_v16 = vld [vmem:[#allocation9 + $0x110] sm:$0xf0]  ;;  %v7330_v17 = vor.u32 %v8613_v9, %v7329_v7  ;;  %v7809_v7 = vld [vmem:[#allocation9 + $0x968] sm:$0xf] }
 0x22d   :  { %4957 = vmatpush.bf16.msra.mxu1 %v7690_v34  ;;  %v4717_v25 = vpop.f32.mrf.mxu2  ;;  %v7974_v34 = vor.u32 %v8771_v0, %v7971_v21  ;;  %v8607_v0 = vld [vmem:[#allocation9 + $0x58c] sm:$0xf0]  ;;  %v6950_v21 = vor.u32 %v8514_v14, %v6947_v12  ;;  %v8733_v9 = vld [vmem:[#allocation9 + $0x97c] sm:$0xf0] }
 0x22e   :  { %v4718_v29 = vadd.f32 %v4717_v25, %v4705_v40  ;;  %v4730_v30 = vpop.f32.mrf.mxu3  ;;  %4921 = vmatpush.bf16.msrb.mxu2 %v7042_v18  ;;  %v8763_v40 = vld [vmem:[#allocation9 + $0xa6c] sm:$0xf0]  ;;  %v7305_v18 = vld [vmem:[#allocation9 + $0x578] sm:$0xf]  ;;  %v8454_v25 = vld [vmem:[#allocation9 + $0xcc] sm:$0xf]  ;;  %v7810_v12 = vor.u32 %v8733_v9, %v7809_v7 }
 0x22f   :  { %4883 = vmatpush.bf16.msra.mxu3 %v7974_v34  ;;  %v7930_v6 = vor.u32 %v8763_v40, %v7929_v4  ;;  %v7306_v27 = vor.u32 %v8607_v0, %v7305_v18  ;;  %v6710_v32 = vor.u32 %v8454_v25, %v6707_v26  ;;  %v7857_v34 = vld [vmem:[#allocation9 + $0x9c8] sm:$0xf]  ;;  %v7833_v40 = vld [vmem:[#allocation9 + $0x998] sm:$0xf]  ;;  %v8727_v0 = vld [vmem:[#allocation9 + $0x94c] sm:$0xf0] }
 0x230   :  { %4945 = vmatpush.bf16.msra.mxu0 %v7474_v1  ;;  %v7018_v1 = vor.u32 %v8535_v24, %v7017_v49  ;;  %v9198_v39 = vadd.f32 %v4730_v30, %v4718_v29  ;;  %v8751_v49 = vld [vmem:[#allocation9 + $0xa0c] sm:$0xf0]  ;;  %v8508_v24 = vld [vmem:[#allocation9 + $0x27c] sm:$0xf]  ;;  %v7281_v29 = vld [vmem:[#allocation9 + $0x548] sm:$0xf] }
 0x231   :  { %4958 = vmatpush.bf16.msra.mxu1 %v7666_v50  ;;  %v8520_v50 = vld [vmem:[#allocation9 + $0x2dc] sm:$0xf]  ;;  %v8601_v30 = vld [vmem:[#allocation9 + $0x55c] sm:$0xf0]  ;;  %v6926_v31 = vor.u32 %v8508_v24, %v6923_v56  ;;  %v7785_v18 = vld [vmem:[#allocation9 + $0x938] sm:$0xf] }
 0x232   :  { %4922 = vmatpush.bf16.msrb.mxu2 %v7018_v1  ;;  %v8745_v1 = vld [vmem:[#allocation9 + $0x9dc] sm:$0xf0]  ;;  %v7282_v44 = vor.u32 %v8601_v30, %v7281_v29  ;;  %v8664_v24 = vld [vmem:[#allocation9 + $0x75c] sm:$0xf]  ;;  %v7547_v56 = vld [vmem:[#allocation9 + $0x770] sm:$0xf0]  ;;  %v7786_v26 = vor.u32 %v8727_v0, %v7785_v18 }
 0x233   :  { %v7499_v7 = vld [vmem:[#allocation9 + $0x710] sm:$0xf0] }
 0x234   :  { %4946 = vmatpush.bf16.msra.mxu0 %v7450_v3  ;;  %v7950_v3 = vor.u32 %v8765_v37, %v7947_v38  ;;  %v8502_v37 = vld [vmem:[#allocation9 + $0x24c] sm:$0xf] }
 0x235   :  { %4959 = vmatpush.bf16.msra.mxu1 %v7642_v45  ;;  %v4719_v63 = vpop.f32.mrf.mxu2 }
 0x236   :  { %v4732_v45 = vpop.f32.mrf.mxu3  ;;  %4884 = vmatpush.bf16.msra.mxu3 %v7950_v3  ;;  %4923 = vmatpush.bf16.msrb.mxu2 %v6994_v53  ;;  %v8496_v3 = vld [vmem:[#allocation9 + $0x21c] sm:$0xf]  ;;  %v6875_v53 = vld [vmem:[#allocation9 + $0x230] sm:$0xf0]  ;;  %v8589_v63 = vld [vmem:[#allocation9 + $0x4fc] sm:$0xf0] }
 0x237   :  { %v8490_v45 = vld [vmem:[#allocation9 + $0x1ec] sm:$0xf] }
 0x238   :  { %4947 = vmatpush.bf16.msra.mxu0 %v7426_v10  ;;  %v6974_v10 = vor.u32 %v8520_v50, %v6971_v54  ;;  %v8739_v50 = vld [vmem:[#allocation9 + $0x9ac] sm:$0xf0]  ;;  %v8442_v54 = vld [vmem:[#allocation9 + $0x6c] sm:$0xf] }
 0x239   :  { %4960 = vmatpush.bf16.msra.mxu1 %v7618_v22  ;;  %v6734_v22 = vor.u32 %v8460_v15, %v6731_v16  ;;  %4924 = vmatmul.bf16.vlgmr.msrb.gmra.mxu2 %v9162_v52  ;;  %v7834_v59 = vor.u32 %v8739_v50, %v7833_v40  ;;  %v7209_v15 = vld [vmem:[#allocation9 + $0x4b8] sm:$0xf]  ;;  %v8583_v16 = vld [vmem:[#allocation9 + $0x4cc] sm:$0xf0] }
 0x23a   :  { %4929 = vmatpush.bf16.msrb.mxu3 %v7354_v5  ;;  %4968 = vmatpush.bf16.msra.mxu2 %v7930_v6  ;;  %v6878_v5 = vor.u32 %v8496_v3, %v6875_v53  ;;  %v6662_v6 = vor.u32 %v8442_v54, %v6659_v57  ;;  %v7210_v25 = vor.u32 %v8583_v16, %v7209_v15  ;;  %v8097_v53 = vld [vmem:[#allocation9 + $0xba8] sm:$0xf]  ;;  %v8805_v54 = vld [vmem:[#allocation9 + $0xbbc] sm:$0xf0]  ;;  %v8700_v15 = vld [vmem:[#allocation9 + $0x87c] sm:$0xf] }
 0x23b   :  { %4885 = vmatmul.bf16.vlgmr.msra.gmra.mxu3 %v9188_v2  ;;  %v8098_v9 = vor.u32 %v8805_v54, %v8097_v53  ;;  %v7691_v16 = vld [vmem:[#allocation9 + $0x890] sm:$0xf0] }
 0x23c   :  { %4948 = vmatpush.bf16.msra.mxu0 %v7402_v23  ;;  %v7881_v23 = vld [vmem:[#allocation9 + $0x9f8] sm:$0xf] }
 0x23d   :  { %4961 = vmatpush.bf16.msra.mxu1 %v7594_v41  ;;  %v7882_v28 = vor.u32 %v8751_v49, %v7881_v23  ;;  %v6899_v41 = vld [vmem:[#allocation9 + $0x260] sm:$0xf0]  ;;  %v8430_v23 = vld [vmem:[#allocation9 + $0xc] sm:$0xf] }
 0x23e   :  { %4930 = vmatpush.bf16.msrb.mxu3 %v7330_v17  ;;  %4969 = vmatpush.bf16.msra.mxu2 %v7906_v19  ;;  %v6902_v51 = vor.u32 %v8502_v37, %v6899_v41  ;;  %v6638_v19 = vor.u32 %v8436_v8, %v6635_v13  ;;  %v6611_v49 = vld [vmem:[#allocation9 + $0x20] sm:$0xf0]  ;;  %v8811_v41 = vld [vmem:[#allocation9 + $0xbec] sm:$0xf0] }
 0x23f   :  { %v6614_v30 = vor.u32 %v8430_v23, %v6611_v49  ;;  %v6803_v37 = vld [vmem:[#allocation9 + $0x1a0] sm:$0xf0]  ;;  %v8793_v23 = vld [vmem:[#allocation9 + $0xb5c] sm:$0xf0]  ;;  %v7694_v49 = vor.u32 %v8700_v15, %v7691_v16  ;;  %v7595_v15 = vld [vmem:[#allocation9 + $0x7d0] sm:$0xf0] }
 0x240   :  { %4949 = vmatpush.bf16.msra.mxu0 %v7378_v61  ;;  %v4743_v38 = vpop.f32.mrf.mxu0  ;;  %v8448_v61 = vld [vmem:[#allocation9 + $0x9c] sm:$0xf]  ;;  %v8622_v16 = vld [vmem:[#allocation9 + $0x60c] sm:$0xf] }
 0x241   :  { %4962 = vmatpush.bf16.msra.mxu1 %v7570_v60  ;;  %v9205_v43 = vadd.f32 %v4743_v38, %v9198_v39  ;;  %v6686_v4 = vor.u32 %v8448_v61, %v6683_v42  ;;  %v7258_v39 = vor.u32 %v8595_v48, %v7257_v47  ;;  %v7233_v60 = vld [vmem:[#allocation9 + $0x4e8] sm:$0xf]  ;;  %v8121_v38 = vld [vmem:[#allocation9 + $0xbd8] sm:$0xf]  ;;  %v8568_v61 = vld [vmem:[#allocation9 + $0x45c] sm:$0xf] }
 0x242   :  { %4931 = vmatpush.bf16.msrb.mxu3 %v7306_v27  ;;  %4970 = vmatpush.bf16.msra.mxu2 %v7882_v28  ;;  %v7234_v14 = vor.u32 %v8589_v63, %v7233_v60  ;;  %v7185_v27 = vld [vmem:[#allocation9 + $0x488] sm:$0xf]  ;;  %v8577_v28 = vld [vmem:[#allocation9 + $0x49c] sm:$0xf0]  ;;  %v7163_v42 = vld [vmem:[#allocation9 + $0x470] sm:$0xf0]  ;;  %v8122_v50 = vor.u32 %v8811_v41, %v8121_v38 }
 0x243   :  { %4950 = vmatmul.bf16.vlgmr.msra.gmra.mxu0 %v9169_v11  ;;  %v7739_v48 = vld [vmem:[#allocation9 + $0x8f0] sm:$0xf0]  ;;  %v7166_v3 = vor.u32 %v8568_v61, %v7163_v42  ;;  %v7139_v60 = vld [vmem:[#allocation9 + $0x440] sm:$0xf0]  ;;  %v8706_v63 = vld [vmem:[#allocation9 + $0x8ac] sm:$0xf] }
 0x244   :  { %4994 = vmatpush.bf16.msrb.mxu0 %v6782_v46  ;;  %4963 = vmatmul.bf16.vlgmr.msra.gmra.mxu1 %v9175_v62  ;;  %v7858_v46 = vor.u32 %v8745_v1, %v7857_v34  ;;  %v8478_v34 = vld [vmem:[#allocation9 + $0x18c] sm:$0xf]  ;;  %v7550_v1 = vor.u32 %v8664_v24, %v7547_v56  ;;  %v8544_v61 = vld [vmem:[#allocation9 + $0x39c] sm:$0xf]  ;;  %v7067_v42 = vld [vmem:[#allocation9 + $0x3b0] sm:$0xf0] }
 0x245   :  { %5007 = vmatpush.bf16.msrb.mxu1 %v6974_v10  ;;  %v6806_v40 = vor.u32 %v8478_v34, %v6803_v37  ;;  %v8787_v37 = vld [vmem:[#allocation9 + $0xb2c] sm:$0xf0] }
 0x246   :  { %4932 = vmatpush.bf16.msrb.mxu3 %v7282_v44  ;;  %4971 = vmatpush.bf16.msra.mxu2 %v7858_v46  ;;  %v8712_v44 = vld [vmem:[#allocation9 + $0x8dc] sm:$0xf]  ;;  %v7186_v46 = vor.u32 %v8577_v28, %v7185_v27  ;;  %v8694_v27 = vld [vmem:[#allocation9 + $0x84c] sm:$0xf] }
 0x247   :  { %v7742_v57 = vor.u32 %v8712_v44, %v7739_v48  ;;  %v8688_v44 = vld [vmem:[#allocation9 + $0x81c] sm:$0xf] }
 0x248   :  { %4995 = vmatpush.bf16.msrb.mxu0 %v6758_v55  ;;  %v4745_v10 = vpop.f32.mrf.mxu0  ;;  %v6851_v55 = vld [vmem:[#allocation9 + $0x200] sm:$0xf0] }
 0x249   :  { %5008 = vmatpush.bf16.msrb.mxu1 %v6950_v21  ;;  %v6854_v17 = vor.u32 %v8490_v45, %v6851_v55  ;;  %v8484_v21 = vld [vmem:[#allocation9 + $0x1bc] sm:$0xf]  ;;  %v8073_v10 = vld [vmem:[#allocation9 + $0xb78] sm:$0xf]  ;;  %v8799_v55 = vld [vmem:[#allocation9 + $0xb8c] sm:$0xf0] }
 0x24a   :  { %4933 = vmatpush.bf16.msrb.mxu3 %v7258_v39  ;;  %4972 = vmatpush.bf16.msra.mxu2 %v7834_v59  ;;  %v8562_v59 = vld [vmem:[#allocation9 + $0x42c] sm:$0xf]  ;;  %v8074_v0 = vor.u32 %v8799_v55, %v8073_v10  ;;  %v8775_v10 = vld [vmem:[#allocation9 + $0xacc] sm:$0xf0] }
 0x24b   :  { %v7142_v45 = vor.u32 %v8562_v59, %v7139_v60  ;;  %v8682_v59 = vld [vmem:[#allocation9 + $0x7ec] sm:$0xf]  ;;  %v7619_v60 = vld [vmem:[#allocation9 + $0x800] sm:$0xf0] }
 0x24c   :  { %4996 = vmatpush.bf16.msrb.mxu0 %v6734_v22  ;;  %v6827_v22 = vld [vmem:[#allocation9 + $0x1d0] sm:$0xf0]  ;;  %v7622_v55 = vor.u32 %v8682_v59, %v7619_v60  ;;  %v8464_v59 = vld [vmem:[#allocation9 + $0x114] sm:$0xf0] }
 0x24d   :  { %5009 = vmatpush.bf16.msrb.mxu1 %v6926_v31  ;;  %v6830_v29 = vor.u32 %v8484_v21, %v6827_v22  ;;  %v7761_v31 = vld [vmem:[#allocation9 + $0x908] sm:$0xf] }
 0x24e   :  { %4934 = vmatpush.bf16.msrb.mxu3 %v7234_v14  ;;  %4973 = vmatpush.bf16.msra.mxu2 %v7810_v12  ;;  %v8556_v14 = vld [vmem:[#allocation9 + $0x3fc] sm:$0xf]  ;;  %v7115_v12 = vld [vmem:[#allocation9 + $0x410] sm:$0xf0]  ;;  %v8049_v22 = vld [vmem:[#allocation9 + $0xb48] sm:$0xf] }
 0x24f   :  { %v7118_v21 = vor.u32 %v8556_v14, %v7115_v12  ;;  %v7019_v14 = vld [vmem:[#allocation9 + $0x350] sm:$0xf0]  ;;  %v8676_v12 = vld [vmem:[#allocation9 + $0x7bc] sm:$0xf] }
 0x250   :  { %4997 = vmatpush.bf16.msrb.mxu0 %v6710_v32  ;;  %v8721_v32 = vld [vmem:[#allocation9 + $0x91c] sm:$0xf0] }
 0x251   :  { %5010 = vmatpush.bf16.msrb.mxu1 %v6902_v51  ;;  %v7762_v47 = vor.u32 %v8721_v32, %v7761_v31  ;;  %v8658_v51 = vld [vmem:[#allocation9 + $0x72c] sm:$0xf]  ;;  %v7451_v31 = vld [vmem:[#allocation9 + $0x6b0] sm:$0xf0]  ;;  %v8050_v32 = vor.u32 %v8793_v23, %v8049_v22  ;;  %v7953_v23 = vld [vmem:[#allocation9 + $0xa88] sm:$0xf] }
 0x252   :  { %4935 = vmatpush.bf16.msrb.mxu3 %v7210_v25  ;;  %4974 = vmatpush.bf16.msra.mxu2 %v7786_v26  ;;  %v8550_v25 = vld [vmem:[#allocation9 + $0x3cc] sm:$0xf]  ;;  %v7091_v26 = vld [vmem:[#allocation9 + $0x3e0] sm:$0xf0] }
 0x253   :  { %v7094_v34 = vor.u32 %v8550_v25, %v7091_v26  ;;  %v8526_v26 = vld [vmem:[#allocation9 + $0x30c] sm:$0xf] }
 0x254   :  { %4998 = vmatpush.bf16.msrb.mxu0 %v6686_v4  ;;  %v7523_v4 = vld [vmem:[#allocation9 + $0x740] sm:$0xf0] }
 0x255   :  { %5011 = vmatpush.bf16.msrb.mxu1 %v6878_v5  ;;  %v7526_v39 = vor.u32 %v8658_v51, %v7523_v4  ;;  %v7715_v5 = vld [vmem:[#allocation9 + $0x8c0] sm:$0xf0]  ;;  %v7070_v4 = vor.u32 %v8544_v61, %v7067_v42  ;;  %v8524_v42 = vld [vmem:[#allocation9 + $0x2f4] sm:$0xf0] }
 0x256   :  { %4936 = vmatpush.bf16.msrb.mxu3 %v7186_v46  ;;  %4975 = vmatpush.bf16.msra.mxu2 %v7762_v47  ;;  %v7718_v8 = vor.u32 %v8706_v63, %v7715_v5  ;;  %v7643_v46 = vld [vmem:[#allocation9 + $0x830] sm:$0xf0]  ;;  %v8634_v47 = vld [vmem:[#allocation9 + $0x66c] sm:$0xf]  ;;  %v8628_v63 = vld [vmem:[#allocation9 + $0x63c] sm:$0xf] }
 0x257   :  { %v4756_v24 = vpop.f32.mrf.mxu1  ;;  %v7403_v5 = vld [vmem:[#allocation9 + $0x650] sm:$0xf0] }
 0x258   :  { %4999 = vmatpush.bf16.msrb.mxu0 %v6662_v6  ;;  %v8652_v6 = vld [vmem:[#allocation9 + $0x6fc] sm:$0xf]  ;;  %v9214_v28 = vadd.f32 %v4756_v24, %v9205_v43  ;;  %v7427_v43 = vld [vmem:[#allocation9 + $0x680] sm:$0xf0]  ;;  %v7598_v24 = vor.u32 %v8676_v12, %v7595_v15  ;;  %v8458_v12 = vld [vmem:[#allocation9 + $0xe4] sm:$0xf0] }
 0x259   :  { %5012 = vmatpush.bf16.msrb.mxu1 %v6854_v17  ;;  %v7502_v13 = vor.u32 %v8652_v6, %v7499_v7  ;;  %4937 = vmatmul.bf16.vlgmr.msrb.gmra.mxu3 %v9164_v58  ;;  %v8646_v17 = vld [vmem:[#allocation9 + $0x6cc] sm:$0xf]  ;;  %v7430_v54 = vor.u32 %v8634_v47, %v7427_v43  ;;  %v2751_v6 = vperm.slane %v9192_v20, 1 }
 0x25a   :  { %4981 = vmatpush.bf16.msra.mxu3 %v8122_v50  ;;  %5020 = vmatpush.bf16.msrb.mxu2 %v7166_v3  ;;  %v8781_v50 = vld [vmem:[#allocation9 + $0xafc] sm:$0xf0]  ;;  %v7646_v3 = vor.u32 %v8688_v44, %v7643_v46  ;;  %v6761_v44 = vld [vmem:[#allocation9 + $0x130] sm:$0xf]  ;;  %v8470_v46 = vld [vmem:[#allocation9 + $0x144] sm:$0xf0] }
 0x25b   :  { %4976 = vmatmul.bf16.vlgmr.msra.gmra.mxu2 %v9181_v36 }
 0x25c   :  { %5000 = vmatpush.bf16.msrb.mxu0 %v6638_v19  ;;  %v7475_v19 = vld [vmem:[#allocation9 + $0x6e0] sm:$0xf0] }
 0x25d   :  { %5013 = vmatpush.bf16.msrb.mxu1 %v6830_v29  ;;  %v7478_v56 = vor.u32 %v8646_v17, %v7475_v19  ;;  %v7667_v29 = vld [vmem:[#allocation9 + $0x860] sm:$0xf0]  ;;  %v6785_v19 = vld [vmem:[#allocation9 + $0x160] sm:$0xf] }
 0x25e   :  { %4982 = vmatpush.bf16.msra.mxu3 %v8098_v9  ;;  %5021 = vmatpush.bf16.msrb.mxu2 %v7142_v45  ;;  %v7670_v38 = vor.u32 %v8694_v27, %v7667_v29  ;;  %v7977_v45 = vld [vmem:[#allocation9 + $0xab8] sm:$0xf]  ;;  %v7379_v17 = vld [vmem:[#allocation9 + $0x620] sm:$0xf0]  ;;  %v8670_v29 = vld [vmem:[#allocation9 + $0x78c] sm:$0xf] }
 0x25f   :  { %v4758_v53 = vpop.f32.mrf.mxu1  ;;  %v7382_v25 = vor.u32 %v8622_v16, %v7379_v17  ;;  %v6995_v27 = vld [vmem:[#allocation9 + $0x320] sm:$0xf0] }
 0x260   :  { %5001 = vmatpush.bf16.msrb.mxu0 %v6614_v30  ;;  %v9211_v18 = vpop.f32.mrf.mxu0  ;;  %v8640_v30 = vld [vmem:[#allocation9 + $0x69c] sm:$0xf]  ;;  %v6998_v61 = vor.u32 %v8526_v26, %v6995_v27  ;;  %v7907_v53 = vld [vmem:[#allocation9 + $0xa40] sm:$0xf0] }
 0x261   :  { %5014 = vmatpush.bf16.msrb.mxu1 %v6806_v40  ;;  %v7454_v41 = vor.u32 %v8640_v30, %v7451_v31  ;;  %v8001_v40 = vld [vmem:[#allocation9 + $0xae8] sm:$0xf]  ;;  %v4796_v20 = vadd.f32 %v9211_v18, %v2751_v6  ;;  %v7355_v18 = vld [vmem:[#allocation9 + $0x5f0] sm:$0xf0]  ;;  %v8604_v6 = vld [vmem:[#allocation9 + $0x57c] sm:$0xf] }
 0x262   :  { %4983 = vmatpush.bf16.msra.mxu3 %v8074_v0  ;;  %5022 = vmatpush.bf16.msrb.mxu2 %v7118_v21  ;;  %v8002_v7 = vor.u32 %v8781_v50, %v8001_v40  ;;  %v8476_v0 = vld [vmem:[#allocation9 + $0x174] sm:$0xf0]  ;;  %v7978_v21 = vor.u32 %v8775_v10, %v7977_v45  ;;  %v6762_v50 = vor.u32 %v8470_v46, %v6761_v44  ;;  %v8748_v10 = vld [vmem:[#allocation9 + $0x9fc] sm:$0xf]  ;;  %v8446_v44 = vld [vmem:[#allocation9 + $0x84] sm:$0xf0] }
 0x263   :  { %5002 = vmatmul.bf16.vlgmr.msrb.gmra.mxu0 %v9156_v33  ;;  %v6786_v31 = vor.u32 %v8476_v0, %v6785_v19  ;;  %v8598_v19 = vld [vmem:[#allocation9 + $0x54c] sm:$0xf]  ;;  %v7283_v0 = vld [vmem:[#allocation9 + $0x560] sm:$0xf0] }
 0x264   :  { %5046 = vmatpush.bf16.msra.mxu0 %v7550_v1  ;;  %5015 = vmatmul.bf16.vlgmr.msrb.gmra.mxu1 %v9158_v35  ;;  %v8025_v1 = vld [vmem:[#allocation9 + $0xb18] sm:$0xf]  ;;  %v7286_v27 = vor.u32 %v8598_v19, %v7283_v0 }
 0x265   :  { %5059 = vmatpush.bf16.msra.mxu1 %v7742_v57  ;;  %v8026_v51 = vor.u32 %v8787_v37, %v8025_v1  ;;  %v8538_v57 = vld [vmem:[#allocation9 + $0x36c] sm:$0xf]  ;;  %v8760_v1 = vld [vmem:[#allocation9 + $0xa5c] sm:$0xf]  ;;  %v7931_v37 = vld [vmem:[#allocation9 + $0xa70] sm:$0xf0] }
 0x266   :  { %4984 = vmatpush.bf16.msra.mxu3 %v8050_v32  ;;  %5023 = vmatpush.bf16.msrb.mxu2 %v7094_v34  ;;  %v7571_v32 = vld [vmem:[#allocation9 + $0x7a0] sm:$0xf0]  ;;  %v8616_v34 = vld [vmem:[#allocation9 + $0x5dc] sm:$0xf] }
 0x267   :  { %v7574_v47 = vor.u32 %v8670_v29, %v7571_v32  ;;  %v7358_v43 = vor.u32 %v8616_v34, %v7355_v18  ;;  %v7259_v32 = vld [vmem:[#allocation9 + $0x530] sm:$0xf0] }
 0x268   :  { %5047 = vmatpush.bf16.msra.mxu0 %v7526_v39  ;;  %v4797_v48 = vpop.f32.mrf.mxu0  ;;  %v7043_v39 = vld [vmem:[#allocation9 + $0x380] sm:$0xf0] }
 0x269   :  { %5060 = vmatpush.bf16.msra.mxu1 %v7718_v8  ;;  %v7046_v9 = vor.u32 %v8538_v57, %v7043_v39  ;;  %v7406_v8 = vor.u32 %v8628_v63, %v7403_v5  ;;  %v7934_v48 = vor.u32 %v8760_v1, %v7931_v37  ;;  %v8518_v57 = vld [vmem:[#allocation9 + $0x2c4] sm:$0xf0]  ;;  %v6737_v39 = vld [vmem:[#allocation9 + $0x100] sm:$0xf]  ;;  %v8736_v1 = vld [vmem:[#allocation9 + $0x99c] sm:$0xf] }
 0x26a   :  { %4985 = vmatpush.bf16.msra.mxu3 %v8026_v51  ;;  %5024 = vmatpush.bf16.msrb.mxu2 %v7070_v4  ;;  %v8610_v51 = vld [vmem:[#allocation9 + $0x5ac] sm:$0xf]  ;;  %v7331_v4 = vld [vmem:[#allocation9 + $0x5c0] sm:$0xf0]  ;;  %v6738_v45 = vor.u32 %v8464_v59, %v6737_v39  ;;  %v7835_v37 = vld [vmem:[#allocation9 + $0x9b0] sm:$0xf0] }
 0x26b   :  { %v7334_v63 = vor.u32 %v8610_v51, %v7331_v4  ;;  %v8586_v51 = vld [vmem:[#allocation9 + $0x4ec] sm:$0xf]  ;;  %v7235_v4 = vld [vmem:[#allocation9 + $0x500] sm:$0xf0]  ;;  %v6641_v39 = vld [vmem:[#allocation9 + $0x40] sm:$0xf] }
 0x26c   :  { %5048 = vmatpush.bf16.msra.mxu0 %v7502_v13  ;;  %v8532_v13 = vld [vmem:[#allocation9 + $0x33c] sm:$0xf]  ;;  %v8440_v59 = vld [vmem:[#allocation9 + $0x54] sm:$0xf0] }
 0x26d   :  { %5061 = vmatpush.bf16.msra.mxu1 %v7694_v49  ;;  %v7022_v22 = vor.u32 %v8532_v13, %v7019_v14  ;;  %v8769_v49 = vld [vmem:[#allocation9 + $0xa9c] sm:$0xf0]  ;;  %v8512_v13 = vld [vmem:[#allocation9 + $0x294] sm:$0xf0]  ;;  %v6713_v14 = vld [vmem:[#allocation9 + $0xd0] sm:$0xf] }
 0x26e   :  { %4986 = vmatpush.bf16.msra.mxu3 %v8002_v7  ;;  %5025 = vmatpush.bf16.msrb.mxu2 %v7046_v9  ;;  %v7307_v7 = vld [vmem:[#allocation9 + $0x590] sm:$0xf0] }
 0x26f   :  { %v7310_v16 = vor.u32 %v8604_v6, %v7307_v7  ;;  %v7211_v6 = vld [vmem:[#allocation9 + $0x4d0] sm:$0xf0] }
 0x270   :  { %5049 = vmatpush.bf16.msra.mxu0 %v7478_v56  ;;  %v4808_v56 = vpop.f32.mrf.mxu1 }
 0x271   :  { %5062 = vmatpush.bf16.msra.mxu1 %v7670_v38  ;;  %v9218_v30 = vadd.f32 %v4808_v56, %v4796_v20  ;;  %v6977_v38 = vld [vmem:[#allocation9 + $0x2e0] sm:$0xf] }
 0x272   :  { %4987 = vmatpush.bf16.msra.mxu3 %v7978_v21  ;;  %5026 = vmatpush.bf16.msrb.mxu2 %v7022_v22  ;;  %v6978_v40 = vor.u32 %v8524_v42, %v6977_v38  ;;  %v6714_v21 = vor.u32 %v8458_v12, %v6713_v14  ;;  %v8742_v22 = vld [vmem:[#allocation9 + $0x9cc] sm:$0xf]  ;;  %v6689_v56 = vld [vmem:[#allocation9 + $0xa0] sm:$0xf]  ;;  %v6665_v42 = vld [vmem:[#allocation9 + $0x70] sm:$0xf] }
 0x273   :  { %v6881_v38 = vld [vmem:[#allocation9 + $0x220] sm:$0xf]  ;;  %v6617_v14 = vld [vmem:[#allocation9 + $0x10] sm:$0xf]  ;;  %v8434_v12 = vld [vmem:[#allocation9 + $0x24] sm:$0xf0] }
 0x274   :  { %5050 = vmatpush.bf16.msra.mxu0 %v7454_v41  ;;  %v7954_v41 = vor.u32 %v8769_v49, %v7953_v23  ;;  %v7859_v23 = vld [vmem:[#allocation9 + $0x9e0] sm:$0xf0]  ;;  %v6905_v49 = vld [vmem:[#allocation9 + $0x250] sm:$0xf] }
 0x275   :  { %5063 = vmatpush.bf16.msra.mxu1 %v7646_v3  ;;  %v8754_v3 = vld [vmem:[#allocation9 + $0xa2c] sm:$0xf]  ;;  %v7862_v29 = vor.u32 %v8742_v22, %v7859_v23  ;;  %v6618_v23 = vor.u32 %v8434_v12, %v6617_v14  ;;  %v8650_v14 = vld [vmem:[#allocation9 + $0x6e4] sm:$0xf0] }
 0x276   :  { %4988 = vmatpush.bf16.msra.mxu3 %v7954_v41  ;;  %5027 = vmatpush.bf16.msrb.mxu2 %v6998_v61  ;;  %v7910_v5 = vor.u32 %v8754_v3, %v7907_v53  ;;  %v8500_v61 = vld [vmem:[#allocation9 + $0x234] sm:$0xf0]  ;;  %v8730_v3 = vld [vmem:[#allocation9 + $0x96c] sm:$0xf]  ;;  %v7811_v53 = vld [vmem:[#allocation9 + $0x980] sm:$0xf0] }
 0x278   :  { %5051 = vmatpush.bf16.msra.mxu0 %v7430_v54  ;;  %v6953_v54 = vld [vmem:[#allocation9 + $0x2b0] sm:$0xf]  ;;  %v4810_v60 = vpop.f32.mrf.mxu1 }
 0x279   :  { %5064 = vmatpush.bf16.msra.mxu1 %v7622_v55  ;;  %v6954_v9 = vor.u32 %v8518_v57, %v6953_v54  ;;  %v7883_v55 = vld [vmem:[#allocation9 + $0xa10] sm:$0xf0]  ;;  %4989 = vmatmul.bf16.vlgmr.msra.gmra.mxu3 %v9188_v2  ;;  %v4769_v41 = vpop.f32.mrf.mxu2  ;;  %v6857_v54 = vld [vmem:[#allocation9 + $0x1f0] sm:$0xf]  ;;  %v8494_v57 = vld [vmem:[#allocation9 + $0x204] sm:$0xf0] }
 0x27a   :  { %5033 = vmatpush.bf16.msrb.mxu3 %v7358_v43  ;;  %5072 = vmatpush.bf16.msra.mxu2 %v7934_v48  ;;  %v7886_v17 = vor.u32 %v8748_v10, %v7883_v55  ;;  %v9229_v46 = vadd.f32 %v4769_v41, %v9214_v28  ;;  %v7838_v48 = vor.u32 %v8736_v1, %v7835_v37  ;;  %v7787_v10 = vld [vmem:[#allocation9 + $0x950] sm:$0xf0]  ;;  %v6833_v55 = vld [vmem:[#allocation9 + $0x1c0] sm:$0xf]  ;;  %v7529_v41 = vld [vmem:[#allocation9 + $0x730] sm:$0xf] }
 0x27b   :  { %5028 = vmatmul.bf16.vlgmr.msrb.gmra.mxu2 %v9162_v52  ;;  %v7238_v28 = vor.u32 %v8586_v51, %v7235_v4  ;;  %v6858_v7 = vor.u32 %v8494_v57, %v6857_v54  ;;  %v8099_v51 = vld [vmem:[#allocation9 + $0xbc0] sm:$0xf0]  ;;  %v8710_v54 = vld [vmem:[#allocation9 + $0x8c4] sm:$0xf0]  ;;  %v7505_v57 = vld [vmem:[#allocation9 + $0x700] sm:$0xf] }
 0x27c   :  { %5052 = vmatpush.bf16.msra.mxu0 %v7406_v8  ;;  %v6929_v8 = vld [vmem:[#allocation9 + $0x280] sm:$0xf] }
 0x27d   :  { %5065 = vmatpush.bf16.msra.mxu1 %v7598_v24  ;;  %v6930_v20 = vor.u32 %v8512_v13, %v6929_v8  ;;  %v8506_v24 = vld [vmem:[#allocation9 + $0x264] sm:$0xf0]  ;;  %v8488_v13 = vld [vmem:[#allocation9 + $0x1d4] sm:$0xf0] }
 0x27e   :  { %5034 = vmatpush.bf16.msrb.mxu3 %v7334_v63  ;;  %5073 = vmatpush.bf16.msra.mxu2 %v7910_v5  ;;  %v6906_v34 = vor.u32 %v8506_v24, %v6905_v49  ;;  %v7814_v63 = vor.u32 %v8730_v3, %v7811_v53  ;;  %v8580_v5 = vld [vmem:[#allocation9 + $0x4bc] sm:$0xf]  ;;  %v6834_v22 = vor.u32 %v8488_v13, %v6833_v55  ;;  %v8718_v49 = vld [vmem:[#allocation9 + $0x90c] sm:$0xf]  ;;  %v7763_v24 = vld [vmem:[#allocation9 + $0x920] sm:$0xf0] }
 0x27f   :  { %v7214_v19 = vor.u32 %v8580_v5, %v7211_v6  ;;  %v7766_v37 = vor.u32 %v8718_v49, %v7763_v24  ;;  %v8566_v3 = vld [vmem:[#allocation9 + $0x444] sm:$0xf0]  ;;  %v7721_v53 = vld [vmem:[#allocation9 + $0x8b0] sm:$0xf]  ;;  %v8796_v5 = vld [vmem:[#allocation9 + $0xb7c] sm:$0xf] }
 0x280   :  { %5053 = vmatpush.bf16.msra.mxu0 %v7382_v25  ;;  %v9224_v15 = vpop.f32.mrf.mxu0  ;;  %v8452_v25 = vld [vmem:[#allocation9 + $0xb4] sm:$0xf0]  ;;  %v8075_v6 = vld [vmem:[#allocation9 + $0xb90] sm:$0xf0]  ;;  %v7697_v55 = vld [vmem:[#allocation9 + $0x880] sm:$0xf] }
 0x281   :  { %5066 = vmatpush.bf16.msra.mxu1 %v7574_v47  ;;  %v9226_v26 = vpop.f32.mrf.mxu1  ;;  %v6690_v18 = vor.u32 %v8452_v25, %v6689_v56  ;;  %v4771_v8 = vpop.f32.mrf.mxu2  ;;  %v6809_v56 = vld [vmem:[#allocation9 + $0x190] sm:$0xf]  ;;  %v8554_v24 = vld [vmem:[#allocation9 + $0x3e4] sm:$0xf0] }
 0x282   :  { %5035 = vmatpush.bf16.msrb.mxu3 %v7310_v16  ;;  %5074 = vmatpush.bf16.msra.mxu2 %v7886_v17  ;;  %v7553_v16 = vld [vmem:[#allocation9 + $0x760] sm:$0xf]  ;;  %v8668_v17 = vld [vmem:[#allocation9 + $0x774] sm:$0xf0]  ;;  %v7481_v13 = vld [vmem:[#allocation9 + $0x6d0] sm:$0xf] }
 0x283   :  { %5054 = vmatmul.bf16.vlgmr.msra.gmra.mxu0 %v9169_v11  ;;  %v7554_v25 = vor.u32 %v8668_v17, %v7553_v16  ;;  %v8704_v8 = vld [vmem:[#allocation9 + $0x894] sm:$0xf0]  ;;  %v8078_v17 = vor.u32 %v8796_v5, %v8075_v6  ;;  %v7097_v49 = vld [vmem:[#allocation9 + $0x3d0] sm:$0xf]  ;;  %v8686_v6 = vld [vmem:[#allocation9 + $0x804] sm:$0xf0] }
 0x284   :  { %5098 = vmatpush.bf16.msrb.mxu0 %v6786_v31  ;;  %5067 = vmatmul.bf16.vlgmr.msra.gmra.mxu1 %v9175_v62  ;;  %v8592_v31 = vld [vmem:[#allocation9 + $0x51c] sm:$0xf]  ;;  %v7625_v5 = vld [vmem:[#allocation9 + $0x7f0] sm:$0xf] }
 0x285   :  { %5111 = vmatpush.bf16.msrb.mxu1 %v6978_v40  ;;  %v7262_v43 = vor.u32 %v8592_v31, %v7259_v32  ;;  %v6882_v40 = vor.u32 %v8500_v61, %v6881_v38  ;;  %v8123_v31 = vld [vmem:[#allocation9 + $0xbf0] sm:$0xf0]  ;;  %v7169_v32 = vld [vmem:[#allocation9 + $0x460] sm:$0xf]  ;;  %v8716_v38 = vld [vmem:[#allocation9 + $0x8f4] sm:$0xf0] }
 0x286   :  { %5036 = vmatpush.bf16.msrb.mxu3 %v7286_v27  ;;  %5075 = vmatpush.bf16.msra.mxu2 %v7862_v29  ;;  %v8482_v27 = vld [vmem:[#allocation9 + $0x1a4] sm:$0xf0]  ;;  %v8808_v29 = vld [vmem:[#allocation9 + $0xbdc] sm:$0xf] }
 0x287   :  { %v8662_v61 = vld [vmem:[#allocation9 + $0x744] sm:$0xf0] }
 0x288   :  { %5099 = vmatpush.bf16.msrb.mxu0 %v6762_v50  ;;  %v4849_v47 = vpop.f32.mrf.mxu0  ;;  %v6666_v50 = vor.u32 %v8446_v44, %v6665_v42  ;;  %v6810_v42 = vor.u32 %v8482_v27, %v6809_v56  ;;  %v8126_v44 = vor.u32 %v8808_v29, %v8123_v31  ;;  %v7673_v56 = vld [vmem:[#allocation9 + $0x850] sm:$0xf]  ;;  %v7457_v27 = vld [vmem:[#allocation9 + $0x6a0] sm:$0xf]  ;;  %v8644_v29 = vld [vmem:[#allocation9 + $0x6b4] sm:$0xf0] }
 0x289   :  { %5112 = vmatpush.bf16.msrb.mxu1 %v6954_v9  ;;  %v4862_v60 = vpop.f32.mrf.mxu1  ;;  %v6642_v9 = vor.u32 %v8440_v59, %v6641_v39  ;;  %v8656_v39 = vld [vmem:[#allocation9 + $0x714] sm:$0xf0] }
 0x28a   :  { %5037 = vmatpush.bf16.msrb.mxu3 %v7262_v43  ;;  %5076 = vmatpush.bf16.msra.mxu2 %v7838_v48  ;;  %v9231_v43 = vpop.f32.mrf.mxu2  ;;  %v8802_v48 = vld [vmem:[#allocation9 + $0xbac] sm:$0xf] }
 0x28b   :  { %v8102_v59 = vor.u32 %v8802_v48, %v8099_v51  ;;  %v8692_v48 = vld [vmem:[#allocation9 + $0x834] sm:$0xf0]  ;;  %v7433_v51 = vld [vmem:[#allocation9 + $0x670] sm:$0xf] }
 0x28c   :  { %5100 = vmatpush.bf16.msrb.mxu0 %v6738_v45  ;;  %v8724_v45 = vld [vmem:[#allocation9 + $0x93c] sm:$0xf] }
 0x28d   :  { %5113 = vmatpush.bf16.msrb.mxu1 %v6930_v20  ;;  %v7790_v0 = vor.u32 %v8724_v45, %v7787_v10  ;;  %v8574_v20 = vld [vmem:[#allocation9 + $0x48c] sm:$0xf]  ;;  %v7121_v45 = vld [vmem:[#allocation9 + $0x400] sm:$0xf]  ;;  %v8560_v10 = vld [vmem:[#allocation9 + $0x414] sm:$0xf0] }
 0x28e   :  { %5038 = vmatpush.bf16.msrb.mxu3 %v7238_v28  ;;  %5077 = vmatpush.bf16.msra.mxu2 %v7814_v63  ;;  %v9234_v28 = vld [vmem:[#allocation10] sm:$0x3f] }
 0x28f   :  { %v2752_v63 = vperm.slane %v9234_v28, 2 }
 0x290   :  { %5101 = vmatpush.bf16.msrb.mxu0 %v6714_v21  ;;  %v7187_v21 = vld [vmem:[#allocation9 + $0x4a0] sm:$0xf0] }
 0x291   :  { %5114 = vmatpush.bf16.msrb.mxu1 %v6906_v34  ;;  %v8572_v34 = vld [vmem:[#allocation9 + $0x474] sm:$0xf0]  ;;  %v7190_v1 = vor.u32 %v8574_v20, %v7187_v21  ;;  %v8790_v20 = vld [vmem:[#allocation9 + $0xb4c] sm:$0xf]  ;;  %v8051_v21 = vld [vmem:[#allocation9 + $0xb60] sm:$0xf0] }
 0x292   :  { %5039 = vmatpush.bf16.msrb.mxu3 %v7214_v19  ;;  %5078 = vmatpush.bf16.msra.mxu2 %v7790_v0  ;;  %v7170_v47 = vor.u32 %v8572_v34, %v7169_v32  ;;  %v7122_v19 = vor.u32 %v8560_v10, %v7121_v45  ;;  %v4823_v0 = vpop.f32.mrf.mxu2  ;;  %v8054_v34 = vor.u32 %v8790_v20, %v8051_v21  ;;  %v8680_v20 = vld [vmem:[#allocation9 + $0x7d4] sm:$0xf0]  ;;  %v7385_v21 = vld [vmem:[#allocation9 + $0x610] sm:$0xf] }
 0x294   :  { %5102 = vmatpush.bf16.msrb.mxu0 %v6690_v18  ;;  %v7745_v18 = vld [vmem:[#allocation9 + $0x8e0] sm:$0xf] }
 0x295   :  { %5115 = vmatpush.bf16.msrb.mxu1 %v6882_v40  ;;  %v7746_v4 = vor.u32 %v8716_v38, %v7745_v18  ;;  %v7530_v40 = vor.u32 %v8662_v61, %v7529_v41  ;;  %v7098_v18 = vor.u32 %v8554_v24, %v7097_v49  ;;  %v7458_v41 = vor.u32 %v8644_v29, %v7457_v27  ;;  %v7073_v61 = vld [vmem:[#allocation9 + $0x3a0] sm:$0xf]  ;;  %v6787_v49 = vld [vmem:[#allocation9 + $0x178] sm:$0xf0]  ;;  %v7955_v27 = vld [vmem:[#allocation9 + $0xaa0] sm:$0xf0] }
 0x296   :  { %5040 = vmatpush.bf16.msrb.mxu3 %v7190_v1  ;;  %5079 = vmatpush.bf16.msra.mxu2 %v7766_v37  ;;  %v8784_v1 = vld [vmem:[#allocation9 + $0xb1c] sm:$0xf]  ;;  %v8027_v37 = vld [vmem:[#allocation9 + $0xb30] sm:$0xf0] }
 0x298   :  { %5103 = vmatpush.bf16.msrb.mxu0 %v6666_v50  ;;  %v7145_v50 = vld [vmem:[#allocation9 + $0x430] sm:$0xf] }
 0x299   :  { %5116 = vmatpush.bf16.msrb.mxu1 %v6858_v7  ;;  %v7146_v60 = vor.u32 %v8566_v3, %v7145_v50  ;;  %v7722_v7 = vor.u32 %v8710_v54, %v7721_v53  ;;  %5041 = vmatmul.bf16.vlgmr.msrb.gmra.mxu3 %v9164_v58  ;;  %v8030_v50 = vor.u32 %v8784_v1, %v8027_v37  ;;  %v8778_v53 = vld [vmem:[#allocation9 + $0xaec] sm:$0xf]  ;;  %v8003_v54 = vld [vmem:[#allocation9 + $0xb00] sm:$0xf0]  ;;  %v8530_v1 = vld [vmem:[#allocation9 + $0x324] sm:$0xf0] }
 0x29a   :  { %5085 = vmatpush.bf16.msra.mxu3 %v8126_v44  ;;  %5124 = vmatpush.bf16.msrb.mxu2 %v7170_v47  ;;  %v7649_v44 = vld [vmem:[#allocation9 + $0x820] sm:$0xf]  ;;  %v9242_v47 = vpop.f32.mrf.mxu3  ;;  %v8006_v10 = vor.u32 %v8778_v53, %v8003_v54  ;;  %v7577_v37 = vld [vmem:[#allocation9 + $0x790] sm:$0xf]  ;;  %v6763_v53 = vld [vmem:[#allocation9 + $0x148] sm:$0xf0]  ;;  %v4822_v54 = vadd.f32 %v9231_v43, %v9218_v30 }
 0x29b   :  { %5080 = vmatmul.bf16.vlgmr.msra.gmra.mxu2 %v9181_v36  ;;  %v6955_v30 = vld [vmem:[#allocation9 + $0x2c8] sm:$0xf0]  ;;  %v8461_v43 = vld [vmem:[#allocation9 + $0x104] sm:$0xf] }
 0x29c   :  { %5104 = vmatpush.bf16.msrb.mxu0 %v6642_v9  ;;  %v7506_v9 = vor.u32 %v8656_v39, %v7505_v57  ;;  %v7650_v57 = vor.u32 %v8692_v48, %v7649_v44  ;;  %v7937_v44 = vld [vmem:[#allocation9 + $0xa60] sm:$0xf]  ;;  %v8764_v48 = vld [vmem:[#allocation9 + $0xa74] sm:$0xf0] }
 0x29d   :  { %5117 = vmatpush.bf16.msrb.mxu1 %v6834_v22  ;;  %v7698_v22 = vor.u32 %v8704_v8, %v7697_v55  ;;  %v8772_v8 = vld [vmem:[#allocation9 + $0xabc] sm:$0xf] }
 0x29e   :  { %5086 = vmatpush.bf16.msra.mxu3 %v8102_v59  ;;  %5125 = vmatpush.bf16.msrb.mxu2 %v7146_v60  ;;  %v9244_v59 = vpop.f32.mrf.mxu2  ;;  %v7049_v60 = vld [vmem:[#allocation9 + $0x370] sm:$0xf] }
 0x2a0   :  { %5105 = vmatpush.bf16.msrb.mxu0 %v6618_v23  ;;  %v4899_v12 = vpop.f32.mrf.mxu0  ;;  %v7482_v23 = vor.u32 %v8650_v14, %v7481_v13  ;;  %v7979_v13 = vld [vmem:[#allocation9 + $0xad0] sm:$0xf0]  ;;  %v7626_v14 = vor.u32 %v8686_v6, %v7625_v5  ;;  %v7337_v6 = vld [vmem:[#allocation9 + $0x5b0] sm:$0xf] }
 0x2a1   :  { %5118 = vmatpush.bf16.msrb.mxu1 %v6810_v42  ;;  %v4900_v16 = vadd.f32 %v4899_v12, %v2752_v63  ;;  %v4912_v31 = vpop.f32.mrf.mxu1  ;;  %v8548_v42 = vld [vmem:[#allocation9 + $0x3b4] sm:$0xf0]  ;;  %v8542_v63 = vld [vmem:[#allocation9 + $0x384] sm:$0xf0]  ;;  %v7982_v24 = vor.u32 %v8772_v8, %v7979_v13  ;;  %v8515_v13 = vld [vmem:[#allocation9 + $0x2b4] sm:$0xf] }
 0x2a2   :  { %5087 = vmatpush.bf16.msra.mxu3 %v8078_v17  ;;  %5126 = vmatpush.bf16.msrb.mxu2 %v7122_v19  ;;  %v7074_v3 = vor.u32 %v8548_v42, %v7073_v61  ;;  %v7050_v55 = vor.u32 %v8542_v63, %v7049_v60  ;;  %v8536_v17 = vld [vmem:[#allocation9 + $0x354] sm:$0xf0]  ;;  %v7601_v19 = vld [vmem:[#allocation9 + $0x7c0] sm:$0xf]  ;;  %v4784_v0 = vpop.f32.mrf.mxu3  ;;  %v7938_v63 = vor.u32 %v8764_v48, %v7937_v44  ;;  %v8758_v8 = vld [vmem:[#allocation9 + $0xa44] sm:$0xf0] }
 0x2a3   :  { %5106 = vmatmul.bf16.vlgmr.msrb.gmra.mxu0 %v9156_v33  ;;  %v9240_v32 = vadd.f32 %v4912_v31, %v4900_v16  ;;  %v7025_v16 = vld [vmem:[#allocation9 + $0x340] sm:$0xf]  ;;  %v7602_v29 = vor.u32 %v8680_v20, %v7601_v19  ;;  %v8620_v42 = vld [vmem:[#allocation9 + $0x5f4] sm:$0xf0]  ;;  %v6958_v0 = vor.u32 %v8515_v13, %v6955_v30  ;;  %v6691_v44 = vld [vmem:[#allocation9 + $0xb8] sm:$0xf0] }
 0x2a4   :  { %5150 = vmatpush.bf16.msra.mxu0 %v7554_v25  ;;  %5119 = vmatmul.bf16.vlgmr.msrb.gmra.mxu1 %v9158_v35  ;;  %v8698_v25 = vld [vmem:[#allocation9 + $0x864] sm:$0xf0]  ;;  %v7361_v61 = vld [vmem:[#allocation9 + $0x5e0] sm:$0xf]  ;;  %v8608_v19 = vld [vmem:[#allocation9 + $0x594] sm:$0xf0] }
 0x2a5   :  { %5163 = vmatpush.bf16.msra.mxu1 %v7746_v4  ;;  %v7674_v38 = vor.u32 %v8698_v25, %v7673_v56  ;;  %v8638_v4 = vld [vmem:[#allocation9 + $0x684] sm:$0xf0]  ;;  %v7026_v56 = vor.u32 %v8536_v17, %v7025_v16  ;;  %v8766_v25 = vld [vmem:[#allocation9 + $0xa8c] sm:$0xf]  ;;  %v7362_v60 = vor.u32 %v8620_v42, %v7361_v61  ;;  %v7313_v17 = vld [vmem:[#allocation9 + $0x580] sm:$0xf] }
 0x2a6   :  { %5088 = vmatpush.bf16.msra.mxu3 %v8054_v34  ;;  %5127 = vmatpush.bf16.msrb.mxu2 %v7098_v18  ;;  %v7434_v39 = vor.u32 %v8638_v4, %v7433_v51  ;;  %v4875_v34 = vpop.f32.mrf.mxu2  ;;  %v7001_v18 = vld [vmem:[#allocation9 + $0x310] sm:$0xf]  ;;  %v8521_v51 = vld [vmem:[#allocation9 + $0x2e4] sm:$0xf]  ;;  %v7958_v4 = vor.u32 %v8766_v25, %v7955_v27  ;;  %v7314_v25 = vor.u32 %v8608_v19, %v7313_v17  ;;  %v6907_v61 = vld [vmem:[#allocation9 + $0x268] sm:$0xf0] }
 0x2a7   :  { %v8602_v34 = vld [vmem:[#allocation9 + $0x564] sm:$0xf0]  ;;  %v8449_v42 = vld [vmem:[#allocation9 + $0xa4] sm:$0xf]  ;;  %v6859_v19 = vld [vmem:[#allocation9 + $0x208] sm:$0xf0] }
 0x2a8   :  { %5151 = vmatpush.bf16.msra.mxu0 %v7530_v40  ;;  %v4901_v40 = vpop.f32.mrf.mxu0  ;;  %v8590_v13 = vld [vmem:[#allocation9 + $0x504] sm:$0xf0] }
 0x2a9   :  { %5164 = vmatpush.bf16.msra.mxu1 %v7722_v7  ;;  %v7409_v7 = vld [vmem:[#allocation9 + $0x640] sm:$0xf]  ;;  %v4914_v45 = vpop.f32.mrf.mxu1  ;;  %v7002_v40 = vor.u32 %v8530_v1, %v7001_v18 }
 0x2aa   :  { %5089 = vmatpush.bf16.msra.mxu3 %v8030_v50  ;;  %5128 = vmatpush.bf16.msrb.mxu2 %v7074_v3  ;;  %v6979_v50 = vld [vmem:[#allocation9 + $0x2f8] sm:$0xf0]  ;;  %v8467_v3 = vld [vmem:[#allocation9 + $0x134] sm:$0xf]  ;;  %v4834_v5 = vpop.f32.mrf.mxu3 }
 0x2ab   :  { %v6766_v45 = vor.u32 %v8467_v3, %v6763_v53 }
 0x2ac   :  { %5152 = vmatpush.bf16.msra.mxu0 %v7506_v9  ;;  %v8632_v9 = vld [vmem:[#allocation9 + $0x654] sm:$0xf0] }
 0x2ad   :  { %5165 = vmatpush.bf16.msra.mxu1 %v7698_v22  ;;  %v7410_v12 = vor.u32 %v8632_v9, %v7409_v7  ;;  %v8626_v22 = vld [vmem:[#allocation9 + $0x624] sm:$0xf0]  ;;  %v6982_v9 = vor.u32 %v8521_v51, %v6979_v50  ;;  %v8596_v50 = vld [vmem:[#allocation9 + $0x534] sm:$0xf0] }
 0x2ae   :  { %5090 = vmatpush.bf16.msra.mxu3 %v8006_v10  ;;  %5129 = vmatpush.bf16.msrb.mxu2 %v7050_v55  ;;  %v7386_v31 = vor.u32 %v8626_v22, %v7385_v21  ;;  %v8614_v7 = vld [vmem:[#allocation9 + $0x5c4] sm:$0xf0]  ;;  %v4835_v10 = vadd.f32 %v4834_v5, %v4822_v54  ;;  %v7913_v55 = vld [vmem:[#allocation9 + $0xa30] sm:$0xf]  ;;  %v7889_v21 = vld [vmem:[#allocation9 + $0xa00] sm:$0xf]  ;;  %v6694_v54 = vor.u32 %v8449_v42, %v6691_v44 }
 0x2af   :  { %v7914_v16 = vor.u32 %v8758_v8, %v7913_v55  ;;  %v8752_v22 = vld [vmem:[#allocation9 + $0xa14] sm:$0xf0]  ;;  %v6883_v5 = vld [vmem:[#allocation9 + $0x238] sm:$0xf0]  ;;  %v7241_v8 = vld [vmem:[#allocation9 + $0x4f0] sm:$0xf] }
 0x2b0   :  { %5153 = vmatpush.bf16.msra.mxu0 %v7482_v23  ;;  %v8473_v23 = vld [vmem:[#allocation9 + $0x164] sm:$0xf]  ;;  %v7890_v27 = vor.u32 %v8752_v22, %v7889_v21  ;;  %v7193_v42 = vld [vmem:[#allocation9 + $0x490] sm:$0xf]  ;;  %v8578_v44 = vld [vmem:[#allocation9 + $0x4a4] sm:$0xf0] }
 0x2b1   :  { %5166 = vmatpush.bf16.msra.mxu1 %v7674_v38  ;;  %v6790_v38 = vor.u32 %v8473_v23, %v6787_v49  ;;  %v8509_v23 = vld [vmem:[#allocation9 + $0x284] sm:$0xf]  ;;  %v6931_v49 = vld [vmem:[#allocation9 + $0x298] sm:$0xf0] }
 0x2b2   :  { %5091 = vmatpush.bf16.msra.mxu3 %v7982_v24  ;;  %5130 = vmatpush.bf16.msrb.mxu2 %v7026_v56  ;;  %v8455_v24 = vld [vmem:[#allocation9 + $0xd4] sm:$0xf]  ;;  %v6934_v18 = vor.u32 %v8509_v23, %v6931_v49  ;;  %v7242_v23 = vor.u32 %v8590_v13, %v7241_v8  ;;  %v7747_v8 = vld [vmem:[#allocation9 + $0x8f8] sm:$0xf0] }
 0x2b3   :  { %v8659_v13 = vld [vmem:[#allocation9 + $0x734] sm:$0xf] }
 0x2b4   :  { %5154 = vmatpush.bf16.msra.mxu0 %v7458_v41  ;;  %v8674_v41 = vld [vmem:[#allocation9 + $0x7a4] sm:$0xf0] }
 0x2b5   :  { %5167 = vmatpush.bf16.msra.mxu1 %v7650_v57  ;;  %v4783_v57 = vadd.f32 %v9242_v47, %v9229_v46  ;;  %v6739_v46 = vld [vmem:[#allocation9 + $0x118] sm:$0xf0] }
 0x2b6   :  { %5092 = vmatpush.bf16.msra.mxu3 %v7958_v4  ;;  %5131 = vmatpush.bf16.msrb.mxu2 %v7002_v40  ;;  %v6742_v20 = vor.u32 %v8461_v43, %v6739_v46  ;;  %v7265_v40 = vld [vmem:[#allocation9 + $0x520] sm:$0xf] }
 0x2b7   :  { %v8135_v47 = vmul.f32 -1.442695, %v4783_v57  ;;  %v7841_v57 = vld [vmem:[#allocation9 + $0x9a0] sm:$0xf] }
 0x2b8   :  { %5155 = vmatpush.bf16.msra.mxu0 %v7434_v39  ;;  %v7578_v39 = vor.u32 %v8674_v41, %v7577_v37  ;;  %v7865_v37 = vld [vmem:[#allocation9 + $0x9d0] sm:$0xf]  ;;  %v8503_v41 = vld [vmem:[#allocation9 + $0x254] sm:$0xf] }
 0x2b9   :  { %5168 = vmatpush.bf16.msra.mxu1 %v7626_v14  ;;  %v4848_v14 = vadd.f32 %v9224_v15, %v4835_v10  ;;  %5093 = vmatmul.bf16.vlgmr.msra.gmra.mxu3 %v9188_v2  ;;  %v6715_v15 = vld [vmem:[#allocation9 + $0xe8] sm:$0xf0]  ;;  %8825 = vpow2.f32 %v8135_v47  ;;  %v6910_v53 = vor.u32 %v8503_v41, %v6907_v61  ;;  %v7266_v10 = vor.u32 %v8596_v50, %v7265_v40  ;;  %v7769_v50 = vld [vmem:[#allocation9 + $0x910] sm:$0xf] }
 0x2ba   :  { %5137 = vmatpush.bf16.msrb.mxu3 %v7362_v60  ;;  %5176 = vmatpush.bf16.msra.mxu2 %v7938_v63  ;;  %v6718_v1 = vor.u32 %v8455_v24, %v6715_v15  ;;  %v8497_v60 = vld [vmem:[#allocation9 + $0x224] sm:$0xf]  ;;  %v7217_v24 = vld [vmem:[#allocation9 + $0x4c0] sm:$0xf] }
 0x2bb   :  { %5132 = vmatmul.bf16.vlgmr.msrb.gmra.mxu2 %v9162_v52  ;;  %v4861_v63 = vadd.f32 %v9226_v26, %v4848_v14  ;;  %v6886_v30 = vor.u32 %v8497_v60, %v6883_v5  ;;  %v7817_v26 = vld [vmem:[#allocation9 + $0x970] sm:$0xf]  ;;  %v8734_v14 = vld [vmem:[#allocation9 + $0x984] sm:$0xf0]  ;;  %v7793_v15 = vld [vmem:[#allocation9 + $0x940] sm:$0xf] }
 0x2bc   :  { %5156 = vmatpush.bf16.msra.mxu0 %v7410_v12  ;;  %v7338_v12 = vor.u32 %v8614_v7, %v7337_v6  ;;  %v8443_v6 = vld [vmem:[#allocation9 + $0x74] sm:$0xf]  ;;  %v6667_v7 = vld [vmem:[#allocation9 + $0x88] sm:$0xf0]  ;;  %v4925_v43 = vpop.f32.mrf.mxu2  ;;  %v7818_v49 = vor.u32 %v8734_v14, %v7817_v26  ;;  %v8812_v5 = vld [vmem:[#allocation9 + $0xbf4] sm:$0xf0] }
 0x2bd   :  { %5169 = vmatpush.bf16.msra.mxu1 %v7602_v29  ;;  %v4836_v29 = vpop.f32.mrf.mxu3  ;;  %v6670_v46 = vor.u32 %v8443_v6, %v6667_v7  ;;  %v4874_v47 = vadd.f32 %v9244_v59, %v4861_v63  ;;  %v8584_v59 = vld [vmem:[#allocation9 + $0x4d4] sm:$0xf0]  ;;  %v6811_v60 = vld [vmem:[#allocation9 + $0x1a8] sm:$0xf0]  ;;  %v8129_v63 = vld [vmem:[#allocation9 + $0xbe0] sm:$0xf] }
 0x2be   :  { %5138 = vmatpush.bf16.msrb.mxu3 %v7338_v12  ;;  %5177 = vmatpush.bf16.msra.mxu2 %v7914_v16  ;;  %v8491_v12 = vld [vmem:[#allocation9 + $0x1f4] sm:$0xf]  ;;  %v9264_v16 = vadd.f32 %v4925_v43, %v9240_v32  ;;  %v8728_v29 = vld [vmem:[#allocation9 + $0x954] sm:$0xf0]  ;;  %v7218_v41 = vor.u32 %v8584_v59, %v7217_v24  ;;  %v8569_v6 = vld [vmem:[#allocation9 + $0x464] sm:$0xf]  ;;  %v8130_v14 = vor.u32 %v8812_v5, %v8129_v63 }
 0x2bf   :  { %v8826_v3 = vpop.eup %8825  ;;  %v6862_v32 = vor.u32 %v8491_v12, %v6859_v19  ;;  %v7794_v61 = vor.u32 %v8728_v29, %v7793_v15  ;;  %v7171_v7 = vld [vmem:[#allocation9 + $0x478] sm:$0xf0]  ;;  %v8806_v19 = vld [vmem:[#allocation9 + $0xbc4] sm:$0xf0]  ;;  %v8653_v24 = vld [vmem:[#allocation9 + $0x704] sm:$0xf] }
 0x2c0   :  { %5157 = vmatpush.bf16.msra.mxu0 %v7386_v31  ;;  %v9255_v56 = vpop.f32.mrf.mxu0  ;;  %v7289_v31 = vld [vmem:[#allocation9 + $0x550] sm:$0xf]  ;;  %v7174_v12 = vor.u32 %v8569_v6, %v7171_v7  ;;  %v7507_v59 = vld [vmem:[#allocation9 + $0x718] sm:$0xf0]  ;;  %v8800_v29 = vld [vmem:[#allocation9 + $0xb94] sm:$0xf0] }
 0x2c1   :  { %5170 = vmatpush.bf16.msra.mxu1 %v7578_v39  ;;  %v9257_v48 = vpop.f32.mrf.mxu1  ;;  %v7290_v51 = vor.u32 %v8602_v34, %v7289_v31  ;;  %v8740_v39 = vld [vmem:[#allocation9 + $0x9b4] sm:$0xf0]  ;;  %v8485_v31 = vld [vmem:[#allocation9 + $0x1c4] sm:$0xf]  ;;  %v6835_v34 = vld [vmem:[#allocation9 + $0x1d8] sm:$0xf0] }
 0x2c2   :  { %5139 = vmatpush.bf16.msrb.mxu3 %v7314_v25  ;;  %5178 = vmatpush.bf16.msra.mxu2 %v7890_v27  ;;  %v7842_v55 = vor.u32 %v8740_v39, %v7841_v57  ;;  %v7675_v6 = vld [vmem:[#allocation9 + $0x868] sm:$0xf0]  ;;  %v8641_v7 = vld [vmem:[#allocation9 + $0x6a4] sm:$0xf] }
 0x2c3   :  { %5158 = vmatmul.bf16.vlgmr.msra.gmra.mxu0 %v9169_v11 }
 0x2c4   :  { %5202 = vmatpush.bf16.msrb.mxu0 %v6790_v38  ;;  %5171 = vmatmul.bf16.vlgmr.msra.gmra.mxu1 %v9175_v62  ;;  %v8746_v38 = vld [vmem:[#allocation9 + $0x9e4] sm:$0xf0] }
 0x2c5   :  { %5215 = vmatpush.bf16.msrb.mxu1 %v6982_v9  ;;  %v7866_v4 = vor.u32 %v8746_v38, %v7865_v37  ;;  %v9260_v9 = vadd.f32 1.0, %v8826_v3  ;;  %v4886_v17 = vpop.f32.mrf.mxu3  ;;  %v8665_v37 = vld [vmem:[#allocation9 + $0x764] sm:$0xf]  ;;  %v7555_v38 = vld [vmem:[#allocation9 + $0x778] sm:$0xf0] }
 0x2c6   :  { %5140 = vmatpush.bf16.msrb.mxu3 %v7290_v51  ;;  %v4887_v21 = vadd.f32 %v4886_v17, %v4874_v47  ;;  %v6838_v51 = vor.u32 %v8485_v31, %v6835_v34  ;;  %v8722_v3 = vld [vmem:[#allocation9 + $0x924] sm:$0xf0]  ;;  %v7558_v39 = vor.u32 %v8665_v37, %v7555_v38  ;;  %v8105_v17 = vld [vmem:[#allocation9 + $0xbb0] sm:$0xf]  ;;  %v8557_v31 = vld [vmem:[#allocation9 + $0x404] sm:$0xf] }
 0x2c7   :  { %5179 = vmatpush.bf16.msra.mxu2 %v7866_v4  ;;  %8827 = vrcp.f32 %v9260_v9  ;;  %v4927_v4 = vpop.f32.mrf.mxu2  ;;  %v7123_v34 = vld [vmem:[#allocation9 + $0x418] sm:$0xf0]  ;;  %v2753_v37 = vperm.slane %v9234_v28, 3  ;;  %v8701_v38 = vld [vmem:[#allocation9 + $0x884] sm:$0xf]  ;;  %vm5335_vm0 = vweird.f32 %v9260_v9 }
 0x2c8   :  { %5203 = vmatpush.bf16.msrb.mxu0 %v6766_v45  ;;  %v4953_v45 = vpop.f32.mrf.mxu0  ;;  %v8136_v25 = vmul.f32 -1.442695, %v4887_v21  ;;  %v8563_v21 = vld [vmem:[#allocation9 + $0x434] sm:$0xf]  ;;  %v8794_v4 = vld [vmem:[#allocation9 + $0xb64] sm:$0xf0] }
 0x2c9   :  { %5216 = vmatpush.bf16.msrb.mxu1 %v6958_v0  ;;  %v8437_v0 = vld [vmem:[#allocation9 + $0x44] sm:$0xf]  ;;  %v4966_v22 = vpop.f32.mrf.mxu1 }
 0x2ca   :  { %5141 = vmatpush.bf16.msrb.mxu3 %v7266_v10  ;;  %8829 = vpow2.f32 %v8136_v25  ;;  %v8713_v45 = vld [vmem:[#allocation9 + $0x8e4] sm:$0xf]  ;;  %v7194_v10 = vor.u32 %v8578_v44, %v7193_v42  ;;  %v7147_v22 = vld [vmem:[#allocation9 + $0x448] sm:$0xf0]  ;;  %v8081_v25 = vld [vmem:[#allocation9 + $0xb80] sm:$0xf] }
 0x2cb   :  { %5180 = vmatpush.bf16.msra.mxu2 %v7842_v55  ;;  %v7770_v55 = vor.u32 %v8722_v3, %v7769_v50  ;;  %v5339_v44 = vand.u32 2147483647, %v9260_v9  ;;  %v8082_v50 = vor.u32 %v8800_v29, %v8081_v25  ;;  %v7126_v3 = vor.u32 %v8557_v31, %v7123_v34  ;;  %v7435_v25 = vld [vmem:[#allocation9 + $0x688] sm:$0xf0]  ;;  %v8009_v29 = vld [vmem:[#allocation9 + $0xaf0] sm:$0xf] }
 0x2cc   :  { %5204 = vmatpush.bf16.msrb.mxu0 %v6742_v20  ;;  %v6643_v20 = vld [vmem:[#allocation9 + $0x58] sm:$0xf0] }
 0x2cd   :  { %5217 = vmatpush.bf16.msrb.mxu1 %v6934_v18  ;;  %v6646_v27 = vor.u32 %v8437_v0, %v6643_v20  ;;  %v8431_v18 = vld [vmem:[#allocation9 + $0x14] sm:$0xf]  ;;  %v4888_v57 = vpop.f32.mrf.mxu3  ;;  %v7750_v0 = vor.u32 %v8713_v45, %v7747_v8  ;;  %v7459_v45 = vld [vmem:[#allocation9 + $0x6b8] sm:$0xf0]  ;;  %vm9289_vm2 = vcmp.eq.f32.partialorder %v5339_v44, 8.507059e+37 }
 0x2ce   :  { %5142 = vmatpush.bf16.msrb.mxu3 %v7242_v23  ;;  %v8707_v23 = vld [vmem:[#allocation9 + $0x8b4] sm:$0xf]  ;;  %v7051_v44 = vld [vmem:[#allocation9 + $0x388] sm:$0xf0]  ;;  %v8677_v8 = vld [vmem:[#allocation9 + $0x7c4] sm:$0xf] }
 0x2cf   :  { %5181 = vmatpush.bf16.msra.mxu2 %v7818_v49  ;;  %v7723_v49 = vld [vmem:[#allocation9 + $0x8c8] sm:$0xf0]  ;;  %v8551_v57 = vld [vmem:[#allocation9 + $0x3d4] sm:$0xf] }
 0x2d0   :  { %5205 = vmatpush.bf16.msrb.mxu0 %v6718_v1  ;;  %v6619_v1 = vld [vmem:[#allocation9 + $0x28] sm:$0xf0] }
 0x2d1   :  { %5218 = vmatpush.bf16.msrb.mxu1 %v6910_v53  ;;  %v6622_v40 = vor.u32 %v8431_v18, %v6619_v1  ;;  %v8479_v53 = vld [vmem:[#allocation9 + $0x194] sm:$0xf]  ;;  %v7726_v18 = vor.u32 %v8707_v23, %v7723_v49  ;;  %v7510_v1 = vor.u32 %v8653_v24, %v7507_v59  ;;  %v7075_v49 = vld [vmem:[#allocation9 + $0x3b8] sm:$0xf0]  ;;  %v8689_v24 = vld [vmem:[#allocation9 + $0x824] sm:$0xf] }
 0x2d2   :  { %5143 = vmatpush.bf16.msrb.mxu3 %v7218_v41  ;;  %v6814_v47 = vor.u32 %v8479_v53, %v6811_v60  ;;  %v7699_v41 = vld [vmem:[#allocation9 + $0x898] sm:$0xf0]  ;;  %v8695_v60 = vld [vmem:[#allocation9 + $0x854] sm:$0xf] }
 0x2d3   :  { %5182 = vmatpush.bf16.msra.mxu2 %v7794_v61  ;;  %v7483_v61 = vld [vmem:[#allocation9 + $0x6e8] sm:$0xf0]  ;;  %v7702_v53 = vor.u32 %v8701_v38, %v7699_v41  ;;  %v7651_v59 = vld [vmem:[#allocation9 + $0x838] sm:$0xf0]  ;;  %v8539_v38 = vld [vmem:[#allocation9 + $0x374] sm:$0xf] }
 0x2d4   :  { %5206 = vmatpush.bf16.msrb.mxu0 %v6694_v54  ;;  %v9267_v54 = vpop.eup %8827  ;;  %v7654_v41 = vor.u32 %v8689_v24, %v7651_v59  ;;  %v7579_v24 = vld [vmem:[#allocation9 + $0x7a8] sm:$0xf0]  ;;  %v8617_v59 = vld [vmem:[#allocation9 + $0x5e4] sm:$0xf] }
 0x2d5   :  { %5219 = vmatpush.bf16.msrb.mxu1 %v6886_v30  ;;  %v7531_v30 = vld [vmem:[#allocation9 + $0x748] sm:$0xf0]  ;;  %v8830_v43 = vpop.eup %8829  ;;  %vm5336_vm1 = vweird.f32 %v9267_v54 }
 0x2d6   :  { %v9271_v26 = vadd.f32 1.0, %v8830_v43  ;;  %v7534_v20 = vor.u32 %v8659_v13, %v7531_v30  ;;  %5144 = vmatpush.bf16.msrb.mxu3 %v7194_v10  ;;  %v5341_v10 = vand.u32 2147483648, %v9260_v9  ;;  %v8033_v43 = vld [vmem:[#allocation9 + $0xb20] sm:$0xf]  ;;  %vm9298_vm3 = vmor %vm5335_vm0, %vm5336_vm1 }
 0x2d7   :  { %5183 = vmatpush.bf16.msra.mxu2 %v7770_v55 }
 0x2d8   :  { %5207 = vmatpush.bf16.msrb.mxu0 %v6670_v46  ;;  %v5331_v46 = vmul.f32 %v9267_v54, %v9260_v9  ;;  %8831 = vrcp.f32 %v9271_v26  ;;  %vm5350_vm5 = vweird.f32 %v9271_v26 }
 0x2d9   :  { %5220 = vmatpush.bf16.msrb.mxu1 %v6862_v32  ;;  %v8106_v32 = vor.u32 %v8806_v19, %v8105_v17  ;;  %5145 = vmatmul.bf16.vlgmr.msrb.gmra.mxu3 %v9164_v58  ;;  %v7462_v17 = vor.u32 %v8641_v7, %v7459_v45  ;;  %v8788_v19 = vld [vmem:[#allocation9 + $0xb34] sm:$0xf0] }
 0x2da   :  { %v5332_v15 = vsub.f32 1.0, %v5331_v46  ;;  %5189 = vmatpush.bf16.msra.mxu3 %v8130_v14  ;;  %5184 = vmatmul.bf16.vlgmr.msra.gmra.mxu2 %v9181_v36  ;;  %v5356_v46 = vand.u32 2147483648, %v9271_v26 }
 0x2db   :  { %5228 = vmatpush.bf16.msrb.mxu2 %v7174_v12  ;;  %v7678_v12 = vor.u32 %v8695_v60, %v7675_v6  ;;  %v8776_v6 = vld [vmem:[#allocation9 + $0xad4] sm:$0xf0] }
 0x2dc   :  { %5208 = vmatpush.bf16.msrb.mxu0 %v6646_v27  ;;  %v7150_v27 = vor.u32 %v8563_v21, %v7147_v22  ;;  %v5333_v42 = vmul.f32 %v9267_v54, %v5332_v15  ;;  %v5354_v22 = vand.u32 2147483647, %v9271_v26  ;;  %v8635_v15 = vld [vmem:[#allocation9 + $0x674] sm:$0xf]  ;;  %v5357_v34 = vor.u32 1.1754944e-38, %v5356_v46 }
 0x2dd   :  { %5221 = vmatpush.bf16.msrb.mxu1 %v6838_v51  ;;  %v8057_v51 = vld [vmem:[#allocation9 + $0xb50] sm:$0xf] }
 0x2de   :  { %5190 = vmatpush.bf16.msra.mxu3 %v8106_v32  ;;  %v5334_v55 = vadd.f32 %v9267_v54, %v5333_v42  ;;  %v8058_v30 = vor.u32 %v8794_v4, %v8057_v51  ;;  %v5342_v32 = vor.u32 1.1754944e-38, %v5341_v10  ;;  %vm5355_vm8 = vcmp.eq.f32.partialorder %v5354_v22, 8.507059e+37  ;;  %v8683_v51 = vld [vmem:[#allocation9 + $0x7f4] sm:$0xf]  ;;  %v8533_v10 = vld [vmem:[#allocation9 + $0x344] sm:$0xf] }
 0x2df   :  { %5229 = vmatpush.bf16.msrb.mxu2 %v7150_v27  ;;  %v7438_v42 = vor.u32 %v8635_v15, %v7435_v25  ;;  %v8527_v22 = vld [vmem:[#allocation9 + $0x314] sm:$0xf]  ;;  %v7363_v15 = vld [vmem:[#allocation9 + $0x5f8] sm:$0xf0]  ;;  %v8761_v25 = vld [vmem:[#allocation9 + $0xa64] sm:$0xf] }
 0x2e0   :  { %5209 = vmatpush.bf16.msrb.mxu0 %v6622_v40  ;;  %v9281_v40 = vpop.eup %8831  ;;  %v5003_v28 = vpop.f32.mrf.mxu0  ;;  %v5338_v9 = vsel %vm9298_vm3, %v9267_v54, %v5334_v55  ;;  %v8782_v54 = vld [vmem:[#allocation9 + $0xb04] sm:$0xf0]  ;;  %v7027_v55 = vld [vmem:[#allocation9 + $0x358] sm:$0xf0]  ;;  %v7366_v31 = vor.u32 %v8617_v59, %v7363_v15 }
 0x2e1   :  { %5222 = vmatpush.bf16.msrb.mxu1 %v6814_v47  ;;  %v5346_v63 = vmul.f32 %v9281_v40, %v9271_v26  ;;  %v5004_v5 = vadd.f32 %v5003_v28, %v2753_v37  ;;  %v5016_v47 = vpop.f32.mrf.mxu1  ;;  %vm5351_vm4 = vweird.f32 %v9281_v40 }
 0x2e2   :  { %5191 = vmatpush.bf16.msra.mxu3 %v8082_v50  ;;  %vm9314_vm6 = vmor %vm5350_vm5, %vm5351_vm4  ;;  %v7627_v50 = vld [vmem:[#allocation9 + $0x808] sm:$0xf0] }
 0x2e3   :  { %5210 = vmatmul.bf16.vlgmr.msrb.gmra.mxu0 %v9156_v33  ;;  %v8647_v33 = vld [vmem:[#allocation9 + $0x6d4] sm:$0xf]  ;;  %v5347_v13 = vsub.f32 1.0, %v5346_v63  ;;  %5230 = vmatpush.bf16.msrb.mxu2 %v7126_v3  ;;  %v9305_v23 = vadd.f32 %v5016_v47, %v5004_v5  ;;  %v8629_v3 = vld [vmem:[#allocation9 + $0x644] sm:$0xf]  ;;  %v8010_v63 = vor.u32 %v8782_v54, %v8009_v29  ;;  %v7054_v5 = vor.u32 %v8539_v38, %v7051_v44 }
 0x2e4   :  { %5254 = vmatpush.bf16.msra.mxu0 %v7558_v39  ;;  %5223 = vmatmul.bf16.vlgmr.msrb.gmra.mxu1 %v9158_v35  ;;  %v7099_v39 = vld [vmem:[#allocation9 + $0x3e8] sm:$0xf0]  ;;  %v7486_v35 = vor.u32 %v8647_v33, %v7483_v61  ;;  %v4938_v33 = vpop.f32.mrf.mxu3  ;;  %v4977_v61 = vpop.f32.mrf.mxu2 }
 0x2e5   :  { %5267 = vmatpush.bf16.msra.mxu1 %v7750_v0  ;;  %v7102_v14 = vor.u32 %v8551_v57, %v7099_v39  ;;  %v8545_v0 = vld [vmem:[#allocation9 + $0x3a4] sm:$0xf]  ;;  %v5348_v21 = vmul.f32 %v9281_v40, %v5347_v13  ;;  %v4939_v28 = vadd.f32 %v4938_v33, %v9264_v16  ;;  %v5343_v57 = vsel %vm9289_vm2, %v5342_v32, %v5338_v9  ;;  %v7603_v13 = vld [vmem:[#allocation9 + $0x7d8] sm:$0xf0]  ;;  %v7915_v54 = vld [vmem:[#allocation9 + $0xa48] sm:$0xf0] }
 0x2e6   :  { %5192 = vmatpush.bf16.msra.mxu3 %v8058_v30  ;;  %v7078_v37 = vor.u32 %v8545_v0, %v7075_v49  ;;  %v7630_v16 = vor.u32 %v8683_v51, %v7627_v50  ;;  %v8623_v30 = vld [vmem:[#allocation9 + $0x614] sm:$0xf]  ;;  %v7003_v49 = vld [vmem:[#allocation9 + $0x328] sm:$0xf0]  ;;  %v7939_v9 = vld [vmem:[#allocation9 + $0xa78] sm:$0xf0] }
 0x2e7   :  { %v5349_v27 = vadd.f32 %v9281_v40, %v5348_v21  ;;  %5231 = vmatpush.bf16.msrb.mxu2 %v7102_v14  ;;  %v7030_v14 = vor.u32 %v8533_v10, %v7027_v55  ;;  %v8770_v21 = vld [vmem:[#allocation9 + $0xaa4] sm:$0xf0]  ;;  %v7315_v33 = vld [vmem:[#allocation9 + $0x598] sm:$0xf0]  ;;  %v8743_v50 = vld [vmem:[#allocation9 + $0x9d4] sm:$0xf] }
 0x2e8   :  { %5255 = vmatpush.bf16.msra.mxu0 %v7534_v20  ;;  %v8731_v10 = vld [vmem:[#allocation9 + $0x974] sm:$0xf]  ;;  %v7819_v55 = vld [vmem:[#allocation9 + $0x988] sm:$0xf0] }
 0x2e9   :  { %5268 = vmatpush.bf16.msra.mxu1 %v7726_v18  ;;  %v5005_v18 = vpop.f32.mrf.mxu0  ;;  %v5353_v26 = vsel %vm9314_vm6, %v9281_v40, %v5349_v27  ;;  %v4952_v40 = vadd.f32 %v9255_v56, %v4939_v28  ;;  %v5018_v60 = vpop.f32.mrf.mxu1  ;;  %v7006_v27 = vor.u32 %v8527_v22, %v7003_v49  ;;  %v7291_v28 = vld [vmem:[#allocation9 + $0x568] sm:$0xf0]  ;;  %v8719_v22 = vld [vmem:[#allocation9 + $0x914] sm:$0xf] }
 0x2ea   :  { %v5358_v4 = vsel %vm5355_vm8, %v5357_v34, %v5353_v26  ;;  %v7942_v34 = vor.u32 %v8761_v25, %v7939_v9  ;;  %v8611_v18 = vld [vmem:[#allocation9 + $0x5b4] sm:$0xf]  ;;  %v8737_v60 = vld [vmem:[#allocation9 + $0x9a4] sm:$0xf]  ;;  %v7771_v49 = vld [vmem:[#allocation9 + $0x928] sm:$0xf0] }
 0x2eb   :  { %v5426_v39 = vrot.slane %v5358_v4, 4  ;;  %5232 = vmatpush.bf16.msrb.mxu2 %v7078_v37  ;;  %v4965_v56 = vadd.f32 %v9257_v48, %v4952_v40  ;;  %v8671_v48 = vld [vmem:[#allocation9 + $0x794] sm:$0xf]  ;;  %v7267_v40 = vld [vmem:[#allocation9 + $0x538] sm:$0xf0]  ;;  %v7774_v15 = vor.u32 %v8719_v22, %v7771_v49 }
 0x2ec   :  { %5256 = vmatpush.bf16.msra.mxu0 %v7510_v1  ;;  %v8034_v1 = vor.u32 %v8788_v19, %v8033_v43  ;;  %v7387_v43 = vld [vmem:[#allocation9 + $0x628] sm:$0xf0]  ;;  %v4940_v19 = vpop.f32.mrf.mxu3  ;;  %v4979_v0 = vpop.f32.mrf.mxu2  ;;  %v7582_v29 = vor.u32 %v8671_v48, %v7579_v24  ;;  %v8755_v37 = vld [vmem:[#allocation9 + $0xa34] sm:$0xf]  ;;  %v8809_v48 = vld [vmem:[#allocation9 + $0xbe4] sm:$0xf] }
 0x2ed   :  { %5269 = vmatpush.bf16.msra.mxu1 %v7702_v53  ;;  %v7411_v53 = vld [vmem:[#allocation9 + $0x658] sm:$0xf0]  ;;  %v5430_v7 = vsel %vm5429_vm7, %v5343_v57, %v5426_v39  ;;  %v9330_v46 = vadd.f32 %v4977_v61, %v4965_v56  ;;  %v7390_v20 = vor.u32 %v8623_v30, %v7387_v43  ;;  %v7918_v26 = vor.u32 %v8755_v37, %v7915_v54  ;;  %v8749_v61 = vld [vmem:[#allocation9 + $0xa04] sm:$0xf]  ;;  %v8599_v4 = vld [vmem:[#allocation9 + $0x554] sm:$0xf] }
 0x2ee   :  { %5193 = vmatpush.bf16.msra.mxu3 %v8034_v1  ;;  %v7414_v45 = vor.u32 %v8629_v3, %v7411_v53  ;;  %5436 = vst [vmem:[%s9378_s7] sm:$0xff] %v5430_v7  ;;  %v7339_v1 = vld [vmem:[#allocation9 + $0x5c8] sm:$0xf0]  ;;  %v8593_v39 = vld [vmem:[#allocation9 + $0x524] sm:$0xf]  ;;  %v7219_v43 = vld [vmem:[#allocation9 + $0x4d8] sm:$0xf0] }
 0x2ef   :  { %5233 = vmatpush.bf16.msrb.mxu2 %v7054_v5  ;;  %v7342_v38 = vor.u32 %v8611_v18, %v7339_v1  ;;  %v7867_v3 = vld [vmem:[#allocation9 + $0x9e8] sm:$0xf0]  ;;  %v7270_v5 = vor.u32 %v8593_v39, %v7267_v40  ;;  %v8581_v30 = vld [vmem:[#allocation9 + $0x4c4] sm:$0xf]  ;;  %v8575_v19 = vld [vmem:[#allocation9 + $0x494] sm:$0xf] }
 0x2f0   :  { %5257 = vmatpush.bf16.msra.mxu0 %v7486_v35  ;;  %v7985_v35 = vld [vmem:[#allocation9 + $0xac0] sm:$0xf]  ;;  %v7870_v57 = vor.u32 %v8743_v50, %v7867_v3  ;;  %v8131_v24 = vld [vmem:[#allocation9 + $0xbf8] sm:$0xf0]  ;;  %v8803_v9 = vld [vmem:[#allocation9 + $0xbb4] sm:$0xf] }
 0x2f1   :  { %5270 = vmatpush.bf16.msra.mxu1 %v7678_v12  ;;  %v7986_v47 = vor.u32 %v8776_v6, %v7985_v35  ;;  %v7961_v12 = vld [vmem:[#allocation9 + $0xa90] sm:$0xf]  ;;  %v8587_v6 = vld [vmem:[#allocation9 + $0x4f4] sm:$0xf]  ;;  %v8134_v25 = vor.u32 %v8809_v48, %v8131_v24  ;;  %v7987_v39 = vld [vmem:[#allocation9 + $0xad8] sm:$0xf0] }
 0x2f2   :  { %5194 = vmatpush.bf16.msra.mxu3 %v8010_v63  ;;  %v7962_v32 = vor.u32 %v8770_v21, %v7961_v12  ;;  %v7222_v12 = vor.u32 %v8581_v30, %v7219_v43  ;;  %v7195_v21 = vld [vmem:[#allocation9 + $0x4a8] sm:$0xf0]  ;;  %v8791_v54 = vld [vmem:[#allocation9 + $0xb54] sm:$0xf] }
 0x2f3   :  { %5234 = vmatpush.bf16.msrb.mxu2 %v7030_v14  ;;  %v7795_v14 = vld [vmem:[#allocation9 + $0x958] sm:$0xf0]  ;;  %v7198_v59 = vor.u32 %v8575_v19, %v7195_v21 }
 0x2f4   :  { %5258 = vmatpush.bf16.msra.mxu0 %v7462_v17  ;;  %v7606_v17 = vor.u32 %v8677_v8, %v7603_v13  ;;  %v7822_v13 = vor.u32 %v8731_v10, %v7819_v55 }
 0x2f5   :  { %5271 = vmatpush.bf16.msra.mxu1 %v7654_v41  ;;  %v8605_v41 = vld [vmem:[#allocation9 + $0x584] sm:$0xf] }
 0x2f6   :  { %5195 = vmatpush.bf16.msra.mxu3 %v7986_v47  ;;  %v8725_v47 = vld [vmem:[#allocation9 + $0x944] sm:$0xf] }
 0x2f7   :  { %5235 = vmatpush.bf16.msrb.mxu2 %v7006_v27 }
 0x2f8   :  { %5259 = vmatpush.bf16.msra.mxu0 %v7438_v42  ;;  %v7891_v42 = vld [vmem:[#allocation9 + $0xa18] sm:$0xf0] }
 0x2f9   :  { %5272 = vmatpush.bf16.msra.mxu1 %v7630_v16  ;;  %v7894_v51 = vor.u32 %v8749_v61, %v7891_v42  ;;  %v8785_v61 = vld [vmem:[#allocation9 + $0xb24] sm:$0xf]  ;;  %v8035_v42 = vld [vmem:[#allocation9 + $0xb38] sm:$0xf0] }
 0x2fa   :  { %5196 = vmatpush.bf16.msra.mxu3 %v7962_v32  ;;  %5236 = vmatmul.bf16.vlgmr.msrb.gmra.mxu2 %v9162_v52  ;;  %v7294_v52 = vor.u32 %v8599_v4, %v7291_v28  ;;  %v8107_v32 = vld [vmem:[#allocation9 + $0xbc8] sm:$0xf0] }
 0x2fb   :  { %5280 = vmatpush.bf16.msra.mxu2 %v7942_v34  ;;  %v8110_v27 = vor.u32 %v8803_v9, %v8107_v32  ;;  %v9346_v34 = vld [vmem:[#allocation10] sm:$0x3f]  ;;  %v8011_v4 = vld [vmem:[#allocation9 + $0xb08] sm:$0xf0] }
 0x2fc   :  { %5260 = vmatpush.bf16.msra.mxu0 %v7414_v45  ;;  %v9340_v7 = vpop.f32.mrf.mxu3  ;;  %v7243_v45 = vld [vmem:[#allocation9 + $0x508] sm:$0xf0]  ;;  %v2754_v18 = vperm.slane %v9346_v34, 4  ;;  %v2755_v49 = vperm.slane %v9346_v34, 5 }
 0x2fd   :  { %5273 = vmatpush.bf16.msra.mxu1 %v7606_v17  ;;  %5197 = vmatmul.bf16.vlgmr.msra.gmra.mxu3 %v9188_v2  ;;  %v7246_v56 = vor.u32 %v8587_v6, %v7243_v45  ;;  %v7798_v17 = vor.u32 %v8725_v47, %v7795_v14  ;;  %v4991_v6 = vadd.f32 %v9340_v7, %v9330_v46 }
 0x2fe   :  { %5241 = vmatpush.bf16.msrb.mxu3 %v7366_v31  ;;  %v9342_v16 = vpop.f32.mrf.mxu2  ;;  %v8083_v31 = vld [vmem:[#allocation9 + $0xb98] sm:$0xf0] }
 0x2ff   :  { %5281 = vmatpush.bf16.msra.mxu2 %v7918_v26  ;;  %v5030_v45 = vadd.f32 %v9342_v16, %v9305_v23  ;;  %v8137_v10 = vmul.f32 -1.442695, %v4991_v6 }
 0x300   :  { %5261 = vmatpush.bf16.msra.mxu0 %v7390_v20  ;;  %v9336_v44 = vpop.f32.mrf.mxu0 }
 0x301   :  { %5274 = vmatpush.bf16.msra.mxu1 %v7582_v29  ;;  %v9338_v53 = vpop.f32.mrf.mxu1  ;;  %v8797_v29 = vld [vmem:[#allocation9 + $0xb84] sm:$0xf]  ;;  %8833 = vpow2.f32 %v8137_v10 }
 0x302   :  { %5242 = vmatpush.bf16.msrb.mxu3 %v7342_v38  ;;  %v8086_v1 = vor.u32 %v8797_v29, %v8083_v31  ;;  %v8059_v38 = vld [vmem:[#allocation9 + $0xb68] sm:$0xf0] }
 0x303   :  { %5262 = vmatmul.bf16.vlgmr.msra.gmra.mxu0 %v9169_v11  ;;  %v7318_v11 = vor.u32 %v8605_v41, %v7315_v33  ;;  %5282 = vmatpush.bf16.msra.mxu2 %v7894_v51  ;;  %v8062_v41 = vor.u32 %v8791_v54, %v8059_v38 }
 0x304   :  { %5275 = vmatmul.bf16.vlgmr.msra.gmra.mxu1 %v9175_v62  ;;  %v7843_v62 = vld [vmem:[#allocation9 + $0x9b8] sm:$0xf0]  ;;  %v4992_v0 = vpop.f32.mrf.mxu3 }
 0x305   :  { %v7846_v35 = vor.u32 %v8737_v60, %v7843_v62  ;;  %v8767_v60 = vld [vmem:[#allocation9 + $0xa94] sm:$0xf]  ;;  %v7963_v62 = vld [vmem:[#allocation9 + $0xaa8] sm:$0xf0] }
 0x306   :  { %5243 = vmatpush.bf16.msrb.mxu3 %v7318_v11  ;;  %v5031_v20 = vpop.f32.mrf.mxu2 }
 0x307   :  { %5283 = vmatpush.bf16.msra.mxu2 %v7870_v57  ;;  %v8773_v57 = vld [vmem:[#allocation9 + $0xac4] sm:$0xf]  ;;  %v8834_v43 = vpop.eup %8833 }
 0x308   :  { %v5057_v63 = vpop.f32.mrf.mxu0  ;;  %v7990_v40 = vor.u32 %v8773_v57, %v7987_v39 }
 0x309   :  { %v5070_v8 = vpop.f32.mrf.mxu1 }
 0x30a   :  { %5244 = vmatpush.bf16.msrb.mxu3 %v7294_v52 }
 0x30b   :  { %5284 = vmatpush.bf16.msra.mxu2 %v7846_v35  ;;  %v7966_v35 = vor.u32 %v8767_v60, %v7963_v62 }
 0x30e   :  { %5245 = vmatpush.bf16.msrb.mxu3 %v7270_v5 }
 0x30f   :  { %5285 = vmatpush.bf16.msra.mxu2 %v7822_v13 }
 0x312   :  { %5246 = vmatpush.bf16.msrb.mxu3 %v7246_v56 }
 0x313   :  { %5286 = vmatpush.bf16.msra.mxu2 %v7798_v17 }
 0x316   :  { %5247 = vmatpush.bf16.msrb.mxu3 %v7222_v12  ;;  %v5326_v12 = vadd.f32 1.0, %v8834_v43 }
 0x317   :  { %5287 = vmatpush.bf16.msra.mxu2 %v7774_v15 }
 0x318   :  { %8835 = vrcp.f32 %v5326_v12  ;;  %vm5365_vm11 = vweird.f32 %v5326_v12  ;;  %v5369_v34 = vand.u32 2147483647, %v5326_v12 }
 0x31a   :  { %5248 = vmatpush.bf16.msrb.mxu3 %v7198_v59  ;;  %5288 = vmatmul.bf16.vlgmr.msra.gmra.mxu2 %v9181_v36  ;;  %v8779_v36 = vld [vmem:[#allocation9 + $0xaf4] sm:$0xf]  ;;  %vm5370_vm0 = vcmp.eq.f32.partialorder %v5369_v34, 8.507059e+37 }
 0x31b   :  { %v8014_v3 = vor.u32 %v8779_v36, %v8011_v4 }
 0x31c   :  { %v5042_v28 = vpop.f32.mrf.mxu3 }
 0x31d   :  { %5249 = vmatmul.bf16.vlgmr.msrb.gmra.mxu3 %v9164_v58  ;;  %v8038_v58 = vor.u32 %v8785_v61, %v8035_v42  ;;  %v5043_v55 = vadd.f32 %v5042_v28, %v5030_v45 }
 0x31e   :  { %5293 = vmatpush.bf16.msra.mxu3 %v8134_v25  ;;  %v5081_v50 = vpop.f32.mrf.mxu2  ;;  %v8836_v20 = vpop.eup %8835 }
 0x31f   :  { %v5056_v8 = vadd.f32 %v9336_v44, %v5043_v55  ;;  %v5361_v22 = vmul.f32 %v8836_v20, %v5326_v12  ;;  %vm5366_vm9 = vweird.f32 %v8836_v20 }
 0x320   :  { %v5107_v37 = vpop.f32.mrf.mxu0  ;;  %vm9357_vm12 = vmor %vm5365_vm11, %vm5366_vm9 }
 0x321   :  { %v5108_v26 = vadd.f32 %v5107_v37, %v2754_v18  ;;  %v5120_v33 = vpop.f32.mrf.mxu1  ;;  %v5069_v13 = vadd.f32 %v9338_v53, %v5056_v8  ;;  %v5362_v53 = vsub.f32 1.0, %v5361_v22 }
 0x322   :  { %5294 = vmatpush.bf16.msra.mxu3 %v8110_v27 }
 0x323   :  { %v5121_v11 = vadd.f32 %v5120_v33, %v5108_v26  ;;  %v5082_v47 = vadd.f32 %v5081_v50, %v5069_v13  ;;  %v5363_v24 = vmul.f32 %v8836_v20, %v5362_v53 }
 0x324   :  { %v5044_v63 = vpop.f32.mrf.mxu3 }
 0x325   :  { %v5364_v27 = vadd.f32 %v8836_v20, %v5363_v24 }
 0x326   :  { %5295 = vmatpush.bf16.msra.mxu3 %v8086_v1  ;;  %v5083_v5 = vpop.f32.mrf.mxu2  ;;  %v5371_v1 = vand.u32 2147483648, %v5326_v12 }
 0x328   :  { %v5109_v51 = vpop.f32.mrf.mxu0  ;;  %v5372_v42 = vor.u32 1.1754944e-38, %v5371_v1 }
 0x329   :  { %v5122_v52 = vpop.f32.mrf.mxu1 }
 0x32a   :  { %5296 = vmatpush.bf16.msra.mxu3 %v8062_v41  ;;  %v5368_v41 = vsel %vm9357_vm12, %v8836_v20, %v5364_v27 }
 0x32b   :  { %v5373_v28 = vsel %vm5370_vm0, %v5372_v42, %v5368_v41 }
 0x32e   :  { %5297 = vmatpush.bf16.msra.mxu3 %v8038_v58 }
 0x332   :  { %5298 = vmatpush.bf16.msra.mxu3 %v8014_v3 }
 0x336   :  { %5299 = vmatpush.bf16.msra.mxu3 %v7990_v40 }
 0x33a   :  { %5300 = vmatpush.bf16.msra.mxu3 %v7966_v35 }
 0x33c   :  { %v5094_v46 = vpop.f32.mrf.mxu3 }
 0x33d   :  { %5301 = vmatmul.bf16.vlgmr.msra.gmra.mxu3 %v9188_v2  ;;  %v5095_v17 = vadd.f32 %v5094_v46, %v5082_v47 }
 0x33e   :  { %v5133_v7 = vpop.f32.mrf.mxu2 }
 0x33f   :  { %v5134_v19 = vadd.f32 %v5133_v7, %v5121_v11  ;;  %v8138_v23 = vmul.f32 -1.442695, %v5095_v17 }
 0x340   :  { %v5159_v56 = vpop.f32.mrf.mxu0 }
 0x341   :  { %v5172_v30 = vpop.f32.mrf.mxu1  ;;  %8837 = vpow2.f32 %v8138_v23 }
 0x344   :  { %v5096_v2 = vpop.f32.mrf.mxu3 }
 0x346   :  { %v5135_v0 = vpop.f32.mrf.mxu2 }
 0x347   :  { %v8838_v44 = vpop.eup %8837 }
 0x348   :  { %v5161_v14 = vpop.f32.mrf.mxu0  ;;  %v5327_v21 = vadd.f32 1.0, %v8838_v44 }
 0x349   :  { %v5174_v16 = vpop.f32.mrf.mxu1 }
 0x34a   :  { %8839 = vrcp.f32 %v5327_v21  ;;  %v5386_v32 = vand.u32 2147483648, %v5327_v21  ;;  %v5384_v31 = vand.u32 2147483647, %v5327_v21  ;;  %vm5380_vm13 = vweird.f32 %v5327_v21 }
 0x34c   :  { %v5387_v26 = vor.u32 1.1754944e-38, %v5386_v32  ;;  %vm5385_vm15 = vcmp.eq.f32.partialorder %v5384_v31, 8.507059e+37 }
 0x350   :  { %v8840_v48 = vpop.eup %8839 }
 0x351   :  { %v5376_v59 = vmul.f32 %v8840_v48, %v5327_v21  ;;  %vm5381_vm10 = vweird.f32 %v8840_v48 }
 0x352   :  { %vm5382_vm14 = vmor %vm5380_vm13, %vm5381_vm10 }
 0x353   :  { %v5377_v9 = vsub.f32 1.0, %v5376_v59 }
 0x355   :  { %v5378_v29 = vmul.f32 %v8840_v48, %v5377_v9 }
 0x357   :  { %v5379_v38 = vadd.f32 %v8840_v48, %v5378_v29 }
 0x359   :  { %v5383_v33 = vsel %vm5382_vm14, %v8840_v48, %v5379_v38 }
 0x35a   :  { %v5388_v11 = vsel %vm5385_vm15, %v5387_v26, %v5383_v33 }
 0x35b   :  { %v5427_v36 = vrot.slane %v5388_v11, 4 }
 0x35c   :  { %v5146_v58 = vpop.f32.mrf.mxu3 }
 0x35d   :  { %v5185_v51 = vpop.f32.mrf.mxu2  ;;  %v5147_v4 = vadd.f32 %v5146_v58, %v5134_v19  ;;  %v5431_v50 = vsel %vm5429_vm7, %v5373_v28, %v5427_v36 }
 0x35e   :  { %5437 = vst [vmem:[%s9378_s7 + $0x8] sm:$0xff] %v5431_v50 }
 0x35f   :  { %v5160_v3 = vadd.f32 %v5159_v56, %v5147_v4 }
 0x360   :  { %v5211_v15 = vpop.f32.mrf.mxu0 }
 0x361   :  { %v5212_v25 = vadd.f32 %v5211_v15, %v2755_v49  ;;  %v5224_v18 = vpop.f32.mrf.mxu1  ;;  %v5173_v57 = vadd.f32 %v5172_v30, %v5160_v3 }
 0x363   :  { %v5225_v37 = vadd.f32 %v5224_v18, %v5212_v25  ;;  %v5186_v39 = vadd.f32 %v5185_v51, %v5173_v57 }
 0x364   :  { %v5148_v40 = vpop.f32.mrf.mxu3 }
 0x365   :  { %v5187_v60 = vpop.f32.mrf.mxu2 }
 0x368   :  { %v5213_v61 = vpop.f32.mrf.mxu0 }
 0x369   :  { %v5226_v52 = vpop.f32.mrf.mxu1 }
 0x37d   :  { %v5237_v6 = vpop.f32.mrf.mxu2 }
 0x37e   :  { %v5238_v14 = vadd.f32 %v5237_v6, %v5225_v37 }
 0x380   :  { %v5263_v62 = vpop.f32.mrf.mxu0  ;;  %v5198_v35 = vpop.f32.mrf.mxu3 }
 0x381   :  { %v5276_v63 = vpop.f32.mrf.mxu1  ;;  %v5199_v47 = vadd.f32 %v5198_v35, %v5186_v39 }
 0x383   :  { %v8139_v12 = vmul.f32 -1.442695, %v5199_v47 }
 0x385   :  { %v5239_v55 = vpop.f32.mrf.mxu2  ;;  %8841 = vpow2.f32 %v8139_v12 }
 0x388   :  { %v5265_v5 = vpop.f32.mrf.mxu0  ;;  %v5200_v10 = vpop.f32.mrf.mxu3 }
 0x389   :  { %v5278_v45 = vpop.f32.mrf.mxu1 }
 0x38b   :  { %v8842_v17 = vpop.eup %8841 }
 0x38c   :  { %v5328_v23 = vadd.f32 1.0, %v8842_v17 }
 0x38e   :  { %8843 = vrcp.f32 %v5328_v23  ;;  %vm5395_vm3 = vweird.f32 %v5328_v23  ;;  %v5401_v29 = vand.u32 2147483648, %v5328_v23  ;;  %v5399_v31 = vand.u32 2147483647, %v5328_v23 }
 0x390   :  { %v5402_v34 = vor.u32 1.1754944e-38, %v5401_v29  ;;  %vm5400_vm9 = vcmp.eq.f32.partialorder %v5399_v31, 8.507059e+37 }
 0x394   :  { %v8844_v44 = vpop.eup %8843 }
 0x395   :  { %v5391_v53 = vmul.f32 %v8844_v44, %v5328_v23  ;;  %vm5396_vm1 = vweird.f32 %v8844_v44 }
 0x396   :  { %vm5397_vm4 = vmor %vm5395_vm3, %vm5396_vm1 }
 0x397   :  { %v5392_v49 = vsub.f32 1.0, %v5391_v53 }
 0x399   :  { %v5393_v24 = vmul.f32 %v8844_v44, %v5392_v49 }
 0x39b   :  { %v5394_v9 = vadd.f32 %v8844_v44, %v5393_v24 }
 0x39d   :  { %v5289_v13 = vpop.f32.mrf.mxu2  ;;  %v5398_v37 = vsel %vm5397_vm4, %v8844_v44, %v5394_v9 }
 0x39e   :  { %v5403_v41 = vsel %vm5400_vm9, %v5402_v34, %v5398_v37 }
 0x3a0   :  { %v5250_v8 = vpop.f32.mrf.mxu3 }
 0x3a1   :  { %v5251_v46 = vadd.f32 %v5250_v8, %v5238_v14 }
 0x3a3   :  { %v5264_v30 = vadd.f32 %v5263_v62, %v5251_v46 }
 0x3a5   :  { %v5291_v43 = vpop.f32.mrf.mxu2  ;;  %v5277_v7 = vadd.f32 %v5276_v63, %v5264_v30 }
 0x3a7   :  { %v5290_v19 = vadd.f32 %v5289_v13, %v5277_v7 }
 0x3a8   :  { %v5252_v56 = vpop.f32.mrf.mxu3 }
 0x3c0   :  { %v5302_v16 = vpop.f32.mrf.mxu3 }
 0x3c1   :  { %v5303_v2 = vadd.f32 %v5302_v16, %v5290_v19 }
 0x3c3   :  { %v8140_v0 = vmul.f32 -1.442695, %v5303_v2 }
 0x3c5   :  { %8845 = vpow2.f32 %v8140_v0 }
 0x3c8   :  { %v5304_v20 = vpop.f32.mrf.mxu3 }
 0x3cb   :  { %v8846_v21 = vpop.eup %8845 }
 0x3cc   :  { %v5329_v22 = vadd.f32 1.0, %v8846_v21 }
 0x3ce   :  { %8847 = vrcp.f32 %v5329_v22  ;;  %v5416_v25 = vand.u32 2147483648, %v5329_v22  ;;  %v5414_v27 = vand.u32 2147483647, %v5329_v22  ;;  %vm5410_vm5 = vweird.f32 %v5329_v22 }
 0x3d0   :  { %v5417_v1 = vor.u32 1.1754944e-38, %v5416_v25  ;;  %vm5415_vm8 = vcmp.eq.f32.partialorder %v5414_v27, 8.507059e+37 }
 0x3d4   :  { %v8848_v48 = vpop.eup %8847 }
 0x3d5   :  { %v5406_v59 = vmul.f32 %v8848_v48, %v5329_v22  ;;  %vm5411_vm2 = vweird.f32 %v8848_v48 }
 0x3d6   :  { %vm5412_vm6 = vmor %vm5410_vm5, %vm5411_vm2 }
 0x3d7   :  { %v5407_v15 = vsub.f32 1.0, %v5406_v59 }
 0x3d9   :  { %v5408_v32 = vmul.f32 %v8848_v48, %v5407_v15 }
 0x3db   :  { %v5409_v18 = vadd.f32 %v8848_v48, %v5408_v32 }
 0x3dd   :  { %v5413_v54 = vsel %vm5412_vm6, %v8848_v48, %v5409_v18 }
 0x3de   :  { %v5418_v38 = vsel %vm5415_vm8, %v5417_v1, %v5413_v54 }
 0x3df   :  { %v5428_v26 = vrot.slane %v5418_v38, 4 }
 0x3e1   :  { %v5432_v33 = vsel %vm5429_vm7, %v5403_v41, %v5428_v26 }
 0x3e2   :  { %5438 = vst [vmem:[%s9378_s7 + $0x10] sm:$0xff] %v5432_v33 }
 0x3e3   :  { %5443 = vsyncpa [#allocation3], 1 }
 0x3e4   :  { %5444 = vsyncpa [#allocation5], 1 }
 0x3e5   :  { %5445 = vsyncpa [#allocation8], 1 }
 0x3e6   :  { %5446 = vsyncpa [#allocation11], 1 }

</bundles_post_ra>
